<compile_context>
chip_gen: v6e
topology: v6e:2x2x1
jax: 0.10.0
libtpu: 0.0.40
codegen_flags: <defaults>
</compile_context>

<pallas_src>
import functools

import jax
import jax.numpy as jnp
from jax import lax
from jax.experimental import pallas as pl
from jax.experimental.pallas import tpu as pltpu

_LN_EPS = 1e-5   # torch.nn.LayerNorm default


def _block_kernel(x_ref, slab_ref, wimg_ref, wpps_ref,
                  w1a_ref, w1b_ref, w2a_ref, w2b_ref, bfc1_ref,
                  out_ref, *, C, eps):
    f32 = jnp.float32

    slab = slab_ref[...].astype(f32)          # (16, C): LN params, biases, conv rows
    bfc1 = bfc1_ref[...].astype(f32)          # (2, Hd): mlp fc1 biases

    x0 = x_ref[:, :C].astype(f32)             # (TB, C) token 0 ("img")
    x1 = x_ref[:, C:].astype(f32)             # (TB, C) token 1 ("pps"/"lm")

    def row(r):                               # (1, C) broadcast row from the slab
        return slab[r:r + 1, :]

    def ln(z, r):                             # LayerNorm; gamma = row r, beta = row r+1
        mu = jnp.mean(z, axis=-1, keepdims=True)
        zc = z - mu
        var = jnp.mean(zc * zc, axis=-1, keepdims=True)
        return zc * lax.rsqrt(var + eps) * row(r) + row(r + 1)

    def mm(a, w_ref):                         # bf16 GEMM operands, f32 accumulation
        w = w_ref[...]
        return jnp.dot(a.astype(w.dtype), w, preferred_element_type=f32)

    # attn_img(norm1(x)): softmax over one key == 1  =>  proj(v(LN1(x)[token 1]))
    x_img = x0 + mm(ln(x1, 0), wimg_ref) + row(8)

    # mlp1(norm2(x_img))
    # TODO(synk): torch nn.GELU defaults to exact erf GELU; tanh approximation is
    # used here (and in the in-script reference) for Mosaic-friendly lowering.
    h1 = jax.nn.gelu(mm(ln(x_img, 2), w1a_ref) + bfc1[0:1, :], approximate=True)
    x_img = x_img + mm(h1, w1b_ref) + row(10)

    # attn_lm(norm3(x)): softmax over one key == 1  =>  proj(v(LN3(x)[token 0]))
    x_lm = x1 + mm(ln(x0, 4), wpps_ref) + row(9)

    # mlp2(norm4(x_lm))
    h2 = jax.nn.gelu(mm(ln(x_lm, 6), w2a_ref) + bfc1[1:2, :], approximate=True)
    x_lm = x_lm + mm(h2, w2b_ref) + row(11)

    # Conv1d(in=2, out=1, kernel=1): scalar-weighted sum + bias (scalars broadcast
    # across lanes in slab rows 12/13/14).
    out_ref[...] = (row(12) * x_img + row(13) * x_lm + row(14)).astype(out_ref.dtype)


def prepare_block_params(p, compute_dtype=jnp.bfloat16):
    """One-time weight prep (keep OUT of the per-call hot path):
      * fold each attention's v-projection into its output projection -> one (C,C)
        GEMM weight per attention, pre-transposed to (in, out),
      * transpose all MLP Linear weights to (in, out) and cast GEMM weights to
        `compute_dtype` (bf16 -> native MXU rate, half the weight VMEM/DMA),
      * pack all small per-channel vectors (LN gammas/betas, proj/fc2 biases,
        Conv1d scalars broadcast over C) into one f32 (16, C) slab.
    """
    C = p['norm1_w'].shape[0]
    hp = lax.Precision.HIGHEST

    def fold_attn(kv_w, proj_w):
        wv_t = jnp.transpose(kv_w[C:, :])      # v half of kv weight, (in, out)
        wp_t = jnp.transpose(proj_w)           # (in, out)
        return jnp.dot(wv_t, wp_t, precision=hp).astype(compute_dtype)  # (C, C)

    conv_w0 = jnp.full((C,), p['conv_w'][0, 0, 0])
    conv_w1 = jnp.full((C,), p['conv_w'][0, 1, 0])
    conv_b = jnp.full((C,), p['conv_b'][0])
    slab = jnp.stack([
        p['norm1_w'], p['norm1_b'], p['norm2_w'], p['norm2_b'],   # rows 0-3
        p['norm3_w'], p['norm3_b'], p['norm4_w'], p['norm4_b'],   # rows 4-7
        p['attn_img_proj_b'], p['attn_lm_proj_b'],                # rows 8-9
        p['mlp1_fc2_b'], p['mlp2_fc2_b'],                         # rows 10-11
        conv_w0, conv_w1, conv_b,                                 # rows 12-14
        jnp.zeros((C,)),                                          # pad to 16 sublanes
    ]).astype(jnp.float32)                                        # (16, C)
    bfc1 = jnp.stack([p['mlp1_fc1_b'], p['mlp2_fc1_b']]).astype(jnp.float32)  # (2, Hd)

    return {
        'wimg': fold_attn(p['attn_img_kv_w'], p['attn_img_proj_w']),
        'wpps': fold_attn(p['attn_lm_kv_w'], p['attn_lm_proj_w']),
        'w1a': jnp.transpose(p['mlp1_fc1_w']).astype(compute_dtype),   # (C, Hd)
        'w1b': jnp.transpose(p['mlp1_fc2_w']).astype(compute_dtype),   # (Hd, C)
        'w2a': jnp.transpose(p['mlp2_fc1_w']).astype(compute_dtype),
        'w2b': jnp.transpose(p['mlp2_fc2_w']).astype(compute_dtype),
        'slab': slab, 'bfc1': bfc1,
    }


def block_forward(x, prepped, *, block_b=256, single_buffer_weights=True):
    """x: (B, 2, C), prepped from prepare_block_params  ->  (B, 1, C).

    block_b: batch tile (multiple of 8).  For production: multiple of 256 on v6e
    (fills the 2x256x256 MXU), 128 suffices on v5e, and pick it so cdiv(B, TB) >= 2
    on v7x so both TensorCores get work (the grid axis is "parallel")."""
    B, n_tok, C = x.shape
    assert n_tok == 2, "Block's attention reshapes only support sequence length 2"
    assert block_b % 8 == 0, "batch tile must be sublane-aligned"
    Hd = prepped['w1a'].shape[1]

    TB = block_b if B >= block_b else max(8, ((B + 7) // 8) * 8)
    Bp = TB * pl.cdiv(B, TB)        # pad batch so every tile is fully valid
    grid = (Bp // TB,)

    x2 = x.reshape(B, 2 * C)        # contiguous -> free reshape; token0 | token1 lanes
    if Bp != B:
        x2 = jnp.pad(x2, ((0, Bp - B), (0, 0)))   # zero rows are LN/GELU-safe

    # Explicit VMEM budget: single-buffered weights + double-buffered x/out tiles
    # + f32 temporaries (GELU hidden etc.), x1.5 headroom, clamped under physical
    # VMEM (v7x users with very large TB should re-derive against 64 MiB per TC).
    wbytes = jnp.dtype(prepped['wimg'].dtype).itemsize
    xbytes = jnp.dtype(x.dtype).itemsize
    resident = ((2 * C * C + 4 * C * Hd) * wbytes                 # GEMM weights
                + (prepped['slab'].size + prepped['bfc1'].size) * 4
                + 2 * TB * 3 * C * xbytes                         # 2x (x tile + out tile)
                + TB * (Hd + 8 * C) * 4)                          # f32 temporaries
    vmem_limit = int(min(max(1.5 * resident + (4 << 20), 32 << 20), 96 << 20))

    if single_buffer_weights:
        # Invariant across grid steps -> single VMEM buffer (halves weight VMEM).
        def rep(shape):
            return pl.BlockSpec(shape, lambda i: (0, 0), pipeline_mode=pl.Buffered(1))
    else:
        def rep(shape):
            return pl.BlockSpec(shape, lambda i: (0, 0))

    out2d = pl.pallas_call(
        functools.partial(_block_kernel, C=C, eps=_LN_EPS),
        out_shape=jax.ShapeDtypeStruct((Bp, C), x.dtype),
        grid=grid,
        in_specs=[
            pl.BlockSpec((TB, 2 * C), lambda i: (i, 0)),   # x, batch-tiled
            rep((16, C)),                                  # LN params / biases / conv
            rep((C, C)), rep((C, C)),                      # folded attention weights
            rep((C, Hd)), rep((Hd, C)),                    # mlp1 fc1 / fc2
            rep((C, Hd)), rep((Hd, C)),                    # mlp2 fc1 / fc2
            rep((2, Hd)),                                  # mlp fc1 biases
        ],
        out_specs=pl.BlockSpec((TB, C), lambda i: (i, 0)),
        compiler_params=pltpu.CompilerParams(
            dimension_semantics=("parallel",),
            vmem_limit_bytes=vmem_limit),
    )(x2, prepped['slab'], prepped['wimg'], prepped['wpps'],
      prepped['w1a'], prepped['w1b'], prepped['w2a'], prepped['w2b'],
      prepped['bfc1'])
    return out2d[:B].reshape(B, 1, C)


def block_reference(x, p, num_heads):
    """Pure-JAX transcription of the PyTorch Block.forward (full attention math)."""
    B, _, C = x.shape
    H = num_heads
    d = C // H
    scale = float(d) ** -0.5
    eps = _LN_EPS

    def ln(z, g, b):
        mu = jnp.mean(z, axis=-1, keepdims=True)
        var = jnp.mean((z - mu) ** 2, axis=-1, keepdims=True)
        return (z - mu) / jnp.sqrt(var + eps) * g + b

    def attention(y, kv_w, proj_w, proj_b, img_branch):
        y_img, y_pps = y[:, :1, :], y[:, 1:, :]
        kv_img = (y_img @ kv_w.T).reshape(B, 1, 2, H, d).transpose(2, 0, 3, 1, 4)
        kv_pps = (y_pps @ kv_w.T).reshape(B, 1, 2, H, d).transpose(2, 0, 3, 1, 4)
        k_img, v_img = kv_img[0], kv_img[1]
        k_pps, v_pps = kv_pps[0], kv_pps[1]
        q = y_pps.reshape(B, 1, H, d).transpose(0, 2, 1, 3)
        if img_branch:     # Attention_img: q_img @ k_img^T ; attn @ v_pps
            attn = jax.nn.softmax((q @ jnp.swapaxes(k_img, -2, -1)) * scale, axis=-1)
            o = attn @ v_pps
        else:              # Attention_pps: q_pps @ k_pps^T ; attn @ v_img
            attn = jax.nn.softmax((q @ jnp.swapaxes(k_pps, -2, -1)) * scale, axis=-1)
            o = attn @ v_img
        o = o.transpose(0, 2, 1, 3).reshape(B, 1, C)
        return o @ proj_w.T + proj_b

    def mlp(z, fc1_w, fc1_b, fc2_w, fc2_b):
        h = jax.nn.gelu(z @ fc1_w.T + fc1_b, approximate=True)
        return h @ fc2_w.T + fc2_b

    x_img = x[:, :1, :]
    x_lm = x[:, 1:, :]
    x_img = x_img + attention(ln(x, p['norm1_w'], p['norm1_b']),
                              p['attn_img_kv_w'], p['attn_img_proj_w'],
                              p['attn_img_proj_b'], True)
    x_img = x_img + mlp(ln(x_img, p['norm2_w'], p['norm2_b']),
                        p['mlp1_fc1_w'], p['mlp1_fc1_b'],
                        p['mlp1_fc2_w'], p['mlp1_fc2_b'])
    x_lm = x_lm + attention(ln(x, p['norm3_w'], p['norm3_b']),
                            p['attn_lm_kv_w'], p['attn_lm_proj_w'],
                            p['attn_lm_proj_b'], False)
    x_lm = x_lm + mlp(ln(x_lm, p['norm4_w'], p['norm4_b']),
                      p['mlp2_fc1_w'], p['mlp2_fc1_b'],
                      p['mlp2_fc2_w'], p['mlp2_fc2_b'])
    xc = jnp.concatenate([x_img, x_lm], axis=1)           # (B, 2, C)
    out = (xc[:, 0, :] * p['conv_w'][0, 0, 0] +
           xc[:, 1, :] * p['conv_w'][0, 1, 0] + p['conv_b'][0])
    return out[:, None, :]


if __name__ == "__main__":
    # Small analogue of Block(dim=512, num_heads=8, mlp_ratio=4): keep C a multiple
    # of 128 (lane-dense GEMMs/stores) and batch a multiple of the 8-row sublanes.
    B, C, H = 16, 128, 8
    Hd = 4 * C

    key = jax.random.PRNGKey(0)
    ks = list(jax.random.split(key, 25))

    def rnd(shape, s=0.02):
        return jax.random.normal(ks.pop(), shape, dtype=jnp.float32) * s

    params = {
        'norm1_w': 1.0 + rnd((C,), 0.1), 'norm1_b': rnd((C,), 0.1),
        'norm2_w': 1.0 + rnd((C,), 0.1), 'norm2_b': rnd((C,), 0.1),
        'norm3_w': 1.0 + rnd((C,), 0.1), 'norm3_b': rnd((C,), 0.1),
        'norm4_w': 1.0 + rnd((C,), 0.1), 'norm4_b': rnd((C,), 0.1),
        'attn_img_kv_w': rnd((2 * C, C)), 'attn_img_proj_w': rnd((C, C)),
        'attn_img_proj_b': rnd((C,)),
        'attn_lm_kv_w': rnd((2 * C, C)), 'attn_lm_proj_w': rnd((C, C)),
        'attn_lm_proj_b': rnd((C,)),
        'mlp1_fc1_w': rnd((Hd, C)), 'mlp1_fc1_b': rnd((Hd,)),
        'mlp1_fc2_w': rnd((C, Hd)), 'mlp1_fc2_b': rnd((C,)),
        'mlp2_fc1_w': rnd((Hd, C)), 'mlp2_fc1_b': rnd((Hd,)),
        'mlp2_fc2_w': rnd((C, Hd)), 'mlp2_fc2_b': rnd((C,)),
        'conv_w': rnd((1, 2, 1), 0.5), 'conv_b': rnd((1,), 0.5),
    }
    x = jax.random.normal(ks.pop(), (B, 2, C), dtype=jnp.float32)

    # One-time weight prep (fold / transpose / pack / bf16-cast) OUTSIDE the hot path.
    prepped = prepare_block_params(params, compute_dtype=jnp.bfloat16)

    fwd = jax.jit(functools.partial(block_forward, block_b=8))   # grid=(2,), pipelined
    try:
        out = jax.block_until_ready(fwd(x, prepped))
    except Exception:
        # Fallback for JAX versions that reject pl.Buffered(1) on the top-level
        # pipeline: identical kernel with default double-buffered weight blocks.
        fwd = jax.jit(functools.partial(block_forward, block_b=8,
                                        single_buffer_weights=False))
        out = jax.block_until_ready(fwd(x, prepped))

    ref = block_reference(x, params, num_heads=H)

    assert out.shape == (B, 1, C), out.shape
    err = float(jnp.max(jnp.abs(out - ref)))
    assert jnp.allclose(out, ref, atol=5e-3, rtol=5e-3), err
    print("KERNEL_OK")
</pallas_src>

<mosaic_0001>
module attributes {stable_mosaic.version = 11 : i64} {
  func.func @_block_kernel(%arg0: i32, %arg1: memref<8x256xf32, #tpu.memory_space<vmem>>, %arg2: memref<16x128xf32, #tpu.memory_space<vmem>>, %arg3: memref<128x128xbf16, #tpu.memory_space<vmem>>, %arg4: memref<128x128xbf16, #tpu.memory_space<vmem>>, %arg5: memref<128x512xbf16, #tpu.memory_space<vmem>>, %arg6: memref<512x128xbf16, #tpu.memory_space<vmem>>, %arg7: memref<128x512xbf16, #tpu.memory_space<vmem>>, %arg8: memref<512x128xbf16, #tpu.memory_space<vmem>>, %arg9: memref<2x512xf32, #tpu.memory_space<vmem>>, %arg10: memref<8x128xf32, #tpu.memory_space<vmem>>) attributes {dimension_semantics = [#tpu.dimension_semantics<parallel>], iteration_bounds = array<i64: 2>, scalar_prefetch = 0 : i64, scratch_operands = 0 : i64, tpu.core_type = #tpu.core_type<tc>, window_params = [{transform_indices = @transform_0, window_bounds = array<i64: 8, 256>}, {pipeline_mode = #tpu.pipeline_mode<synchronous>, transform_indices = @transform_1, window_bounds = array<i64: 16, 128>}, {pipeline_mode = #tpu.pipeline_mode<synchronous>, transform_indices = @transform_2, window_bounds = array<i64: 128, 128>}, {pipeline_mode = #tpu.pipeline_mode<synchronous>, transform_indices = @transform_3, window_bounds = array<i64: 128, 128>}, {pipeline_mode = #tpu.pipeline_mode<synchronous>, transform_indices = @transform_4, window_bounds = array<i64: 128, 512>}, {pipeline_mode = #tpu.pipeline_mode<synchronous>, transform_indices = @transform_5, window_bounds = array<i64: 512, 128>}, {pipeline_mode = #tpu.pipeline_mode<synchronous>, transform_indices = @transform_6, window_bounds = array<i64: 128, 512>}, {pipeline_mode = #tpu.pipeline_mode<synchronous>, transform_indices = @transform_7, window_bounds = array<i64: 512, 128>}, {pipeline_mode = #tpu.pipeline_mode<synchronous>, transform_indices = @transform_8, window_bounds = array<i64: 2, 512>}, {transform_indices = @transform_9, window_bounds = array<i64: 8, 128>}]} {
    %c0 = arith.constant 0 : index
    %c0_0 = arith.constant 0 : index
    %0 = vector.load %arg2[%c0, %c0_0] : memref<16x128xf32, #tpu.memory_space<vmem>>, vector<16x128xf32>
    %c0_1 = arith.constant 0 : index
    %c0_2 = arith.constant 0 : index
    %1 = vector.load %arg9[%c0_1, %c0_2] : memref<2x512xf32, #tpu.memory_space<vmem>>, vector<2x512xf32>
    %c0_3 = arith.constant 0 : index
    %c0_4 = arith.constant 0 : index
    %2 = vector.load %arg1[%c0_3, %c0_4] : memref<8x256xf32, #tpu.memory_space<vmem>>, vector<8x128xf32>
    %c0_5 = arith.constant 0 : index
    %c128 = arith.constant 128 : index
    %3 = vector.load %arg1[%c0_5, %c128] : memref<8x256xf32, #tpu.memory_space<vmem>>, vector<8x128xf32>
    %cst = arith.constant dense<0.000000e+00> : vector<8xf32>
    %4 = vector.multi_reduction <add>, %3, %cst [1] : vector<8x128xf32> to vector<8xf32>
    %5 = vector.shape_cast %4 : vector<8xf32> to vector<8x1xf32>
    %cst_6 = arith.constant 1.280000e+02 : f32
    %6 = vector.broadcast %cst_6 : f32 to vector<8x1xf32>
    %7 = arith.divf %5, %6 : vector<8x1xf32>
    %8 = vector.broadcast %7 : vector<8x1xf32> to vector<8x128xf32>
    %9 = arith.subf %3, %8 : vector<8x128xf32>
    %10 = arith.mulf %9, %9 : vector<8x128xf32>
    %cst_7 = arith.constant dense<0.000000e+00> : vector<8xf32>
    %11 = vector.multi_reduction <add>, %10, %cst_7 [1] : vector<8x128xf32> to vector<8xf32>
    %12 = vector.shape_cast %11 : vector<8xf32> to vector<8x1xf32>
    %cst_8 = arith.constant 1.280000e+02 : f32
    %13 = vector.broadcast %cst_8 : f32 to vector<8x1xf32>
    %14 = arith.divf %12, %13 : vector<8x1xf32>
    %cst_9 = arith.constant 9.99999974E-6 : f32
    %15 = vector.broadcast %cst_9 : f32 to vector<8x1xf32>
    %16 = arith.addf %14, %15 : vector<8x1xf32>
    %17 = math.rsqrt %16 : vector<8x1xf32>
    %18 = vector.broadcast %17 : vector<8x1xf32> to vector<8x128xf32>
    %19 = arith.mulf %9, %18 : vector<8x128xf32>
    %20 = vector.extract_strided_slice %0 {offsets = [0, 0], sizes = [1, 128], strides = [1, 1]} : vector<16x128xf32> to vector<1x128xf32>
    %21 = vector.broadcast %20 : vector<1x128xf32> to vector<8x128xf32>
    %22 = arith.mulf %19, %21 : vector<8x128xf32>
    %23 = vector.extract_strided_slice %0 {offsets = [1, 0], sizes = [1, 128], strides = [1, 1]} : vector<16x128xf32> to vector<1x128xf32>
    %24 = vector.broadcast %23 : vector<1x128xf32> to vector<8x128xf32>
    %25 = arith.addf %22, %24 : vector<8x128xf32>
    %c0_10 = arith.constant 0 : index
    %c0_11 = arith.constant 0 : index
    %26 = vector.load %arg3[%c0_10, %c0_11] : memref<128x128xbf16, #tpu.memory_space<vmem>>, vector<128x128xbf16>
    %27 = arith.truncf %25 : vector<8x128xf32> to vector<8x128xbf16>
    %cst_12 = arith.constant dense<0.000000e+00> : vector<8x128xf32>
    %28 = tpu.matmul %27, %26, %cst_12 {dimension_numbers = #tpu.dot_dimension_numbers<[1], [0], [0], [1], [0, 0, 1, 1], [], []>} : vector<8x128xbf16>, vector<128x128xbf16>, vector<8x128xf32> -> vector<8x128xf32>
    %29 = arith.addf %2, %28 : vector<8x128xf32>
    %30 = vector.extract_strided_slice %0 {offsets = [8, 0], sizes = [1, 128], strides = [1, 1]} : vector<16x128xf32> to vector<1x128xf32>
    %31 = vector.broadcast %30 : vector<1x128xf32> to vector<8x128xf32>
    %32 = arith.addf %29, %31 : vector<8x128xf32>
    %cst_13 = arith.constant dense<0.000000e+00> : vector<8xf32>
    %33 = vector.multi_reduction <add>, %32, %cst_13 [1] : vector<8x128xf32> to vector<8xf32>
    %34 = vector.shape_cast %33 : vector<8xf32> to vector<8x1xf32>
    %cst_14 = arith.constant 1.280000e+02 : f32
    %35 = vector.broadcast %cst_14 : f32 to vector<8x1xf32>
    %36 = arith.divf %34, %35 : vector<8x1xf32>
    %37 = vector.broadcast %36 : vector<8x1xf32> to vector<8x128xf32>
    %38 = arith.subf %32, %37 : vector<8x128xf32>
    %39 = arith.mulf %38, %38 : vector<8x128xf32>
    %cst_15 = arith.constant dense<0.000000e+00> : vector<8xf32>
    %40 = vector.multi_reduction <add>, %39, %cst_15 [1] : vector<8x128xf32> to vector<8xf32>
    %41 = vector.shape_cast %40 : vector<8xf32> to vector<8x1xf32>
    %cst_16 = arith.constant 1.280000e+02 : f32
    %42 = vector.broadcast %cst_16 : f32 to vector<8x1xf32>
    %43 = arith.divf %41, %42 : vector<8x1xf32>
    %cst_17 = arith.constant 9.99999974E-6 : f32
    %44 = vector.broadcast %cst_17 : f32 to vector<8x1xf32>
    %45 = arith.addf %43, %44 : vector<8x1xf32>
    %46 = math.rsqrt %45 : vector<8x1xf32>
    %47 = vector.broadcast %46 : vector<8x1xf32> to vector<8x128xf32>
    %48 = arith.mulf %38, %47 : vector<8x128xf32>
    %49 = vector.extract_strided_slice %0 {offsets = [2, 0], sizes = [1, 128], strides = [1, 1]} : vector<16x128xf32> to vector<1x128xf32>
    %50 = vector.broadcast %49 : vector<1x128xf32> to vector<8x128xf32>
    %51 = arith.mulf %48, %50 : vector<8x128xf32>
    %52 = vector.extract_strided_slice %0 {offsets = [3, 0], sizes = [1, 128], strides = [1, 1]} : vector<16x128xf32> to vector<1x128xf32>
    %53 = vector.broadcast %52 : vector<1x128xf32> to vector<8x128xf32>
    %54 = arith.addf %51, %53 : vector<8x128xf32>
    %c0_18 = arith.constant 0 : index
    %c0_19 = arith.constant 0 : index
    %55 = vector.load %arg5[%c0_18, %c0_19] : memref<128x512xbf16, #tpu.memory_space<vmem>>, vector<128x512xbf16>
    %56 = arith.truncf %54 : vector<8x128xf32> to vector<8x128xbf16>
    %cst_20 = arith.constant dense<0.000000e+00> : vector<8x512xf32>
    %57 = tpu.matmul %56, %55, %cst_20 {dimension_numbers = #tpu.dot_dimension_numbers<[1], [0], [0], [1], [0, 0, 1, 1], [], []>} : vector<8x128xbf16>, vector<128x512xbf16>, vector<8x512xf32> -> vector<8x512xf32>
    %58 = vector.extract_strided_slice %1 {offsets = [0, 0], sizes = [1, 512], strides = [1, 1]} : vector<2x512xf32> to vector<1x512xf32>
    %59 = vector.broadcast %58 : vector<1x512xf32> to vector<8x512xf32>
    %60 = arith.addf %57, %59 : vector<8x512xf32>
    %61 = arith.mulf %60, %60 : vector<8x512xf32>
    %62 = arith.mulf %60, %61 : vector<8x512xf32>
    %cst_21 = arith.constant 4.471500e-02 : f32
    %63 = vector.broadcast %cst_21 : f32 to vector<8x512xf32>
    %64 = arith.mulf %63, %62 : vector<8x512xf32>
    %65 = arith.addf %60, %64 : vector<8x512xf32>
    %cst_22 = arith.constant 0.797884583 : f32
    %66 = vector.broadcast %cst_22 : f32 to vector<8x512xf32>
    %67 = arith.mulf %66, %65 : vector<8x512xf32>
    %68 = math.tanh %67 : vector<8x512xf32>
    %cst_23 = arith.constant 1.000000e+00 : f32
    %69 = vector.broadcast %cst_23 : f32 to vector<8x512xf32>
    %70 = arith.addf %69, %68 : vector<8x512xf32>
    %cst_24 = arith.constant 5.000000e-01 : f32
    %71 = vector.broadcast %cst_24 : f32 to vector<8x512xf32>
    %72 = arith.mulf %71, %70 : vector<8x512xf32>
    %73 = arith.mulf %60, %72 : vector<8x512xf32>
    %c0_25 = arith.constant 0 : index
    %c0_26 = arith.constant 0 : index
    %74 = vector.load %arg6[%c0_25, %c0_26] : memref<512x128xbf16, #tpu.memory_space<vmem>>, vector<512x128xbf16>
    %75 = arith.truncf %73 : vector<8x512xf32> to vector<8x512xbf16>
    %cst_27 = arith.constant dense<0.000000e+00> : vector<8x128xf32>
    %76 = tpu.matmul %75, %74, %cst_27 {dimension_numbers = #tpu.dot_dimension_numbers<[1], [0], [0], [1], [0, 0, 1, 1], [], []>} : vector<8x512xbf16>, vector<512x128xbf16>, vector<8x128xf32> -> vector<8x128xf32>
    %77 = arith.addf %32, %76 : vector<8x128xf32>
    %78 = vector.extract_strided_slice %0 {offsets = [10, 0], sizes = [1, 128], strides = [1, 1]} : vector<16x128xf32> to vector<1x128xf32>
    %79 = vector.broadcast %78 : vector<1x128xf32> to vector<8x128xf32>
    %80 = arith.addf %77, %79 : vector<8x128xf32>
    %cst_28 = arith.constant dense<0.000000e+00> : vector<8xf32>
    %81 = vector.multi_reduction <add>, %2, %cst_28 [1] : vector<8x128xf32> to vector<8xf32>
    %82 = vector.shape_cast %81 : vector<8xf32> to vector<8x1xf32>
    %cst_29 = arith.constant 1.280000e+02 : f32
    %83 = vector.broadcast %cst_29 : f32 to vector<8x1xf32>
    %84 = arith.divf %82, %83 : vector<8x1xf32>
    %85 = vector.broadcast %84 : vector<8x1xf32> to vector<8x128xf32>
    %86 = arith.subf %2, %85 : vector<8x128xf32>
    %87 = arith.mulf %86, %86 : vector<8x128xf32>
    %cst_30 = arith.constant dense<0.000000e+00> : vector<8xf32>
    %88 = vector.multi_reduction <add>, %87, %cst_30 [1] : vector<8x128xf32> to vector<8xf32>
    %89 = vector.shape_cast %88 : vector<8xf32> to vector<8x1xf32>
    %cst_31 = arith.constant 1.280000e+02 : f32
    %90 = vector.broadcast %cst_31 : f32 to vector<8x1xf32>
    %91 = arith.divf %89, %90 : vector<8x1xf32>
    %cst_32 = arith.constant 9.99999974E-6 : f32
    %92 = vector.broadcast %cst_32 : f32 to vector<8x1xf32>
    %93 = arith.addf %91, %92 : vector<8x1xf32>
    %94 = math.rsqrt %93 : vector<8x1xf32>
    %95 = vector.broadcast %94 : vector<8x1xf32> to vector<8x128xf32>
    %96 = arith.mulf %86, %95 : vector<8x128xf32>
    %97 = vector.extract_strided_slice %0 {offsets = [4, 0], sizes = [1, 128], strides = [1, 1]} : vector<16x128xf32> to vector<1x128xf32>
    %98 = vector.broadcast %97 : vector<1x128xf32> to vector<8x128xf32>
    %99 = arith.mulf %96, %98 : vector<8x128xf32>
    %100 = vector.extract_strided_slice %0 {offsets = [5, 0], sizes = [1, 128], strides = [1, 1]} : vector<16x128xf32> to vector<1x128xf32>
    %101 = vector.broadcast %100 : vector<1x128xf32> to vector<8x128xf32>
    %102 = arith.addf %99, %101 : vector<8x128xf32>
    %c0_33 = arith.constant 0 : index
    %c0_34 = arith.constant 0 : index
    %103 = vector.load %arg4[%c0_33, %c0_34] : memref<128x128xbf16, #tpu.memory_space<vmem>>, vector<128x128xbf16>
    %104 = arith.truncf %102 : vector<8x128xf32> to vector<8x128xbf16>
    %cst_35 = arith.constant dense<0.000000e+00> : vector<8x128xf32>
    %105 = tpu.matmul %104, %103, %cst_35 {dimension_numbers = #tpu.dot_dimension_numbers<[1], [0], [0], [1], [0, 0, 1, 1], [], []>} : vector<8x128xbf16>, vector<128x128xbf16>, vector<8x128xf32> -> vector<8x128xf32>
    %106 = arith.addf %3, %105 : vector<8x128xf32>
    %107 = vector.extract_strided_slice %0 {offsets = [9, 0], sizes = [1, 128], strides = [1, 1]} : vector<16x128xf32> to vector<1x128xf32>
    %108 = vector.broadcast %107 : vector<1x128xf32> to vector<8x128xf32>
    %109 = arith.addf %106, %108 : vector<8x128xf32>
    %cst_36 = arith.constant dense<0.000000e+00> : vector<8xf32>
    %110 = vector.multi_reduction <add>, %109, %cst_36 [1] : vector<8x128xf32> to vector<8xf32>
    %111 = vector.shape_cast %110 : vector<8xf32> to vector<8x1xf32>
    %cst_37 = arith.constant 1.280000e+02 : f32
    %112 = vector.broadcast %cst_37 : f32 to vector<8x1xf32>
    %113 = arith.divf %111, %112 : vector<8x1xf32>
    %114 = vector.broadcast %113 : vector<8x1xf32> to vector<8x128xf32>
    %115 = arith.subf %109, %114 : vector<8x128xf32>
    %116 = arith.mulf %115, %115 : vector<8x128xf32>
    %cst_38 = arith.constant dense<0.000000e+00> : vector<8xf32>
    %117 = vector.multi_reduction <add>, %116, %cst_38 [1] : vector<8x128xf32> to vector<8xf32>
    %118 = vector.shape_cast %117 : vector<8xf32> to vector<8x1xf32>
    %cst_39 = arith.constant 1.280000e+02 : f32
    %119 = vector.broadcast %cst_39 : f32 to vector<8x1xf32>
    %120 = arith.divf %118, %119 : vector<8x1xf32>
    %cst_40 = arith.constant 9.99999974E-6 : f32
    %121 = vector.broadcast %cst_40 : f32 to vector<8x1xf32>
    %122 = arith.addf %120, %121 : vector<8x1xf32>
    %123 = math.rsqrt %122 : vector<8x1xf32>
    %124 = vector.broadcast %123 : vector<8x1xf32> to vector<8x128xf32>
    %125 = arith.mulf %115, %124 : vector<8x128xf32>
    %126 = vector.extract_strided_slice %0 {offsets = [6, 0], sizes = [1, 128], strides = [1, 1]} : vector<16x128xf32> to vector<1x128xf32>
    %127 = vector.broadcast %126 : vector<1x128xf32> to vector<8x128xf32>
    %128 = arith.mulf %125, %127 : vector<8x128xf32>
    %129 = vector.extract_strided_slice %0 {offsets = [7, 0], sizes = [1, 128], strides = [1, 1]} : vector<16x128xf32> to vector<1x128xf32>
    %130 = vector.broadcast %129 : vector<1x128xf32> to vector<8x128xf32>
    %131 = arith.addf %128, %130 : vector<8x128xf32>
    %c0_41 = arith.constant 0 : index
    %c0_42 = arith.constant 0 : index
    %132 = vector.load %arg7[%c0_41, %c0_42] : memref<128x512xbf16, #tpu.memory_space<vmem>>, vector<128x512xbf16>
    %133 = arith.truncf %131 : vector<8x128xf32> to vector<8x128xbf16>
    %cst_43 = arith.constant dense<0.000000e+00> : vector<8x512xf32>
    %134 = tpu.matmul %133, %132, %cst_43 {dimension_numbers = #tpu.dot_dimension_numbers<[1], [0], [0], [1], [0, 0, 1, 1], [], []>} : vector<8x128xbf16>, vector<128x512xbf16>, vector<8x512xf32> -> vector<8x512xf32>
    %135 = vector.extract_strided_slice %1 {offsets = [1, 0], sizes = [1, 512], strides = [1, 1]} : vector<2x512xf32> to vector<1x512xf32>
    %136 = vector.broadcast %135 : vector<1x512xf32> to vector<8x512xf32>
    %137 = arith.addf %134, %136 : vector<8x512xf32>
    %138 = arith.mulf %137, %137 : vector<8x512xf32>
    %139 = arith.mulf %137, %138 : vector<8x512xf32>
    %cst_44 = arith.constant 4.471500e-02 : f32
    %140 = vector.broadcast %cst_44 : f32 to vector<8x512xf32>
    %141 = arith.mulf %140, %139 : vector<8x512xf32>
    %142 = arith.addf %137, %141 : vector<8x512xf32>
    %cst_45 = arith.constant 0.797884583 : f32
    %143 = vector.broadcast %cst_45 : f32 to vector<8x512xf32>
    %144 = arith.mulf %143, %142 : vector<8x512xf32>
    %145 = math.tanh %144 : vector<8x512xf32>
    %cst_46 = arith.constant 1.000000e+00 : f32
    %146 = vector.broadcast %cst_46 : f32 to vector<8x512xf32>
    %147 = arith.addf %146, %145 : vector<8x512xf32>
    %cst_47 = arith.constant 5.000000e-01 : f32
    %148 = vector.broadcast %cst_47 : f32 to vector<8x512xf32>
    %149 = arith.mulf %148, %147 : vector<8x512xf32>
    %150 = arith.mulf %137, %149 : vector<8x512xf32>
    %c0_48 = arith.constant 0 : index
    %c0_49 = arith.constant 0 : index
    %151 = vector.load %arg8[%c0_48, %c0_49] : memref<512x128xbf16, #tpu.memory_space<vmem>>, vector<512x128xbf16>
    %152 = arith.truncf %150 : vector<8x512xf32> to vector<8x512xbf16>
    %cst_50 = arith.constant dense<0.000000e+00> : vector<8x128xf32>
    %153 = tpu.matmul %152, %151, %cst_50 {dimension_numbers = #tpu.dot_dimension_numbers<[1], [0], [0], [1], [0, 0, 1, 1], [], []>} : vector<8x512xbf16>, vector<512x128xbf16>, vector<8x128xf32> -> vector<8x128xf32>
    %154 = arith.addf %109, %153 : vector<8x128xf32>
    %155 = vector.extract_strided_slice %0 {offsets = [11, 0], sizes = [1, 128], strides = [1, 1]} : vector<16x128xf32> to vector<1x128xf32>
    %156 = vector.broadcast %155 : vector<1x128xf32> to vector<8x128xf32>
    %157 = arith.addf %154, %156 : vector<8x128xf32>
    %158 = vector.extract_strided_slice %0 {offsets = [12, 0], sizes = [1, 128], strides = [1, 1]} : vector<16x128xf32> to vector<1x128xf32>
    %159 = vector.broadcast %158 : vector<1x128xf32> to vector<8x128xf32>
    %160 = arith.mulf %159, %80 : vector<8x128xf32>
    %161 = vector.extract_strided_slice %0 {offsets = [13, 0], sizes = [1, 128], strides = [1, 1]} : vector<16x128xf32> to vector<1x128xf32>
    %162 = vector.broadcast %161 : vector<1x128xf32> to vector<8x128xf32>
    %163 = arith.mulf %162, %157 : vector<8x128xf32>
    %164 = arith.addf %160, %163 : vector<8x128xf32>
    %165 = vector.extract_strided_slice %0 {offsets = [14, 0], sizes = [1, 128], strides = [1, 1]} : vector<16x128xf32> to vector<1x128xf32>
    %166 = vector.broadcast %165 : vector<1x128xf32> to vector<8x128xf32>
    %167 = arith.addf %164, %166 : vector<8x128xf32>
    %c0_51 = arith.constant 0 : index
    %c0_52 = arith.constant 0 : index
    %168 = vector.load %arg10[%c0_51, %c0_52] : memref<8x128xf32, #tpu.memory_space<vmem>>, vector<8x128xf32>
    tpu.vector_store %arg10[%c0_51, %c0_52], %167 {strides = array<i32>} : memref<8x128xf32, #tpu.memory_space<vmem>>, vector<8x128xf32>,
    return
  }
  func.func @transform_0(%arg0: i32) -> (i32, i32) {
    %c0_i32 = arith.constant 0 : i32
    %c0_i32_0 = arith.constant 0 : i32
    return %arg0, %c0_i32 : i32, i32
  }
  func.func @transform_1(%arg0: i32) -> (i32, i32) {
    %c0_i32 = arith.constant 0 : i32
    %c0_i32_0 = arith.constant 0 : i32
    %c0_i32_1 = arith.constant 0 : i32
    return %c0_i32, %c0_i32_0 : i32, i32
  }
  func.func @transform_2(%arg0: i32) -> (i32, i32) {
    %c0_i32 = arith.constant 0 : i32
    %c0_i32_0 = arith.constant 0 : i32
    %c0_i32_1 = arith.constant 0 : i32
    return %c0_i32, %c0_i32_0 : i32, i32
  }
  func.func @transform_3(%arg0: i32) -> (i32, i32) {
    %c0_i32 = arith.constant 0 : i32
    %c0_i32_0 = arith.constant 0 : i32
    %c0_i32_1 = arith.constant 0 : i32
    return %c0_i32, %c0_i32_0 : i32, i32
  }
  func.func @transform_4(%arg0: i32) -> (i32, i32) {
    %c0_i32 = arith.constant 0 : i32
    %c0_i32_0 = arith.constant 0 : i32
    %c0_i32_1 = arith.constant 0 : i32
    return %c0_i32, %c0_i32_0 : i32, i32
  }
  func.func @transform_5(%arg0: i32) -> (i32, i32) {
    %c0_i32 = arith.constant 0 : i32
    %c0_i32_0 = arith.constant 0 : i32
    %c0_i32_1 = arith.constant 0 : i32
    return %c0_i32, %c0_i32_0 : i32, i32
  }
  func.func @transform_6(%arg0: i32) -> (i32, i32) {
    %c0_i32 = arith.constant 0 : i32
    %c0_i32_0 = arith.constant 0 : i32
    %c0_i32_1 = arith.constant 0 : i32
    return %c0_i32, %c0_i32_0 : i32, i32
  }
  func.func @transform_7(%arg0: i32) -> (i32, i32) {
    %c0_i32 = arith.constant 0 : i32
    %c0_i32_0 = arith.constant 0 : i32
    %c0_i32_1 = arith.constant 0 : i32
    return %c0_i32, %c0_i32_0 : i32, i32
  }
  func.func @transform_8(%arg0: i32) -> (i32, i32) {
    %c0_i32 = arith.constant 0 : i32
    %c0_i32_0 = arith.constant 0 : i32
    %c0_i32_1 = arith.constant 0 : i32
    return %c0_i32, %c0_i32_0 : i32, i32
  }
  func.func @transform_9(%arg0: i32) -> (i32, i32) {
    %c0_i32 = arith.constant 0 : i32
    %c0_i32_0 = arith.constant 0 : i32
    return %arg0, %c0_i32 : i32, i32
  }
}

module attributes {stable_mosaic.version = 11 : i64} {
  func.func @_block_kernel(%arg0: i32, %arg1: memref<8x256xf32, #tpu.memory_space<vmem>>, %arg2: memref<16x128xf32, #tpu.memory_space<vmem>>, %arg3: memref<128x128xbf16, #tpu.memory_space<vmem>>, %arg4: memref<128x128xbf16, #tpu.memory_space<vmem>>, %arg5: memref<128x512xbf16, #tpu.memory_space<vmem>>, %arg6: memref<512x128xbf16, #tpu.memory_space<vmem>>, %arg7: memref<128x512xbf16, #tpu.memory_space<vmem>>, %arg8: memref<512x128xbf16, #tpu.memory_space<vmem>>, %arg9: memref<2x512xf32, #tpu.memory_space<vmem>>, %arg10: memref<8x128xf32, #tpu.memory_space<vmem>>) attributes {dimension_semantics = [#tpu.dimension_semantics<parallel>], iteration_bounds = array<i64: 2>, scalar_prefetch = 0 : i64, scratch_operands = 0 : i64, tpu.core_type = #tpu.core_type<tc>, window_params = [{transform_indices = @transform_0, window_bounds = array<i64: 8, 256>}, {pipeline_mode = #tpu.pipeline_mode<synchronous>, transform_indices = @transform_1, window_bounds = array<i64: 16, 128>}, {pipeline_mode = #tpu.pipeline_mode<synchronous>, transform_indices = @transform_2, window_bounds = array<i64: 128, 128>}, {pipeline_mode = #tpu.pipeline_mode<synchronous>, transform_indices = @transform_3, window_bounds = array<i64: 128, 128>}, {pipeline_mode = #tpu.pipeline_mode<synchronous>, transform_indices = @transform_4, window_bounds = array<i64: 128, 512>}, {pipeline_mode = #tpu.pipeline_mode<synchronous>, transform_indices = @transform_5, window_bounds = array<i64: 512, 128>}, {pipeline_mode = #tpu.pipeline_mode<synchronous>, transform_indices = @transform_6, window_bounds = array<i64: 128, 512>}, {pipeline_mode = #tpu.pipeline_mode<synchronous>, transform_indices = @transform_7, window_bounds = array<i64: 512, 128>}, {pipeline_mode = #tpu.pipeline_mode<synchronous>, transform_indices = @transform_8, window_bounds = array<i64: 2, 512>}, {transform_indices = @transform_9, window_bounds = array<i64: 8, 128>}]} {
    %c0 = arith.constant 0 : index
    %c0_0 = arith.constant 0 : index
    %0 = vector.load %arg2[%c0, %c0_0] : memref<16x128xf32, #tpu.memory_space<vmem>>, vector<16x128xf32>
    %c0_1 = arith.constant 0 : index
    %c0_2 = arith.constant 0 : index
    %1 = vector.load %arg9[%c0_1, %c0_2] : memref<2x512xf32, #tpu.memory_space<vmem>>, vector<2x512xf32>
    %c0_3 = arith.constant 0 : index
    %c0_4 = arith.constant 0 : index
    %2 = vector.load %arg1[%c0_3, %c0_4] : memref<8x256xf32, #tpu.memory_space<vmem>>, vector<8x128xf32>
    %c0_5 = arith.constant 0 : index
    %c128 = arith.constant 128 : index
    %3 = vector.load %arg1[%c0_5, %c128] : memref<8x256xf32, #tpu.memory_space<vmem>>, vector<8x128xf32>
    %cst = arith.constant dense<0.000000e+00> : vector<8xf32>
    %4 = vector.multi_reduction <add>, %3, %cst [1] : vector<8x128xf32> to vector<8xf32>
    %5 = vector.shape_cast %4 : vector<8xf32> to vector<8x1xf32>
    %cst_6 = arith.constant 1.280000e+02 : f32
    %6 = vector.broadcast %cst_6 : f32 to vector<8x1xf32>
    %7 = arith.divf %5, %6 : vector<8x1xf32>
    %8 = vector.broadcast %7 : vector<8x1xf32> to vector<8x128xf32>
    %9 = arith.subf %3, %8 : vector<8x128xf32>
    %10 = arith.mulf %9, %9 : vector<8x128xf32>
    %cst_7 = arith.constant dense<0.000000e+00> : vector<8xf32>
    %11 = vector.multi_reduction <add>, %10, %cst_7 [1] : vector<8x128xf32> to vector<8xf32>
    %12 = vector.shape_cast %11 : vector<8xf32> to vector<8x1xf32>
    %cst_8 = arith.constant 1.280000e+02 : f32
    %13 = vector.broadcast %cst_8 : f32 to vector<8x1xf32>
    %14 = arith.divf %12, %13 : vector<8x1xf32>
    %cst_9 = arith.constant 9.99999974E-6 : f32
    %15 = vector.broadcast %cst_9 : f32 to vector<8x1xf32>
    %16 = arith.addf %14, %15 : vector<8x1xf32>
    %17 = math.rsqrt %16 : vector<8x1xf32>
    %18 = vector.broadcast %17 : vector<8x1xf32> to vector<8x128xf32>
    %19 = arith.mulf %9, %18 : vector<8x128xf32>
    %20 = vector.extract_strided_slice %0 {offsets = [0, 0], sizes = [1, 128], strides = [1, 1]} : vector<16x128xf32> to vector<1x128xf32>
    %21 = vector.broadcast %20 : vector<1x128xf32> to vector<8x128xf32>
    %22 = arith.mulf %19, %21 : vector<8x128xf32>
    %23 = vector.extract_strided_slice %0 {offsets = [1, 0], sizes = [1, 128], strides = [1, 1]} : vector<16x128xf32> to vector<1x128xf32>
    %24 = vector.broadcast %23 : vector<1x128xf32> to vector<8x128xf32>
    %25 = arith.addf %22, %24 : vector<8x128xf32>
    %c0_10 = arith.constant 0 : index
    %c0_11 = arith.constant 0 : index
    %26 = vector.load %arg3[%c0_10, %c0_11] : memref<128x128xbf16, #tpu.memory_space<vmem>>, vector<128x128xbf16>
    %27 = arith.truncf %25 : vector<8x128xf32> to vector<8x128xbf16>
    %cst_12 = arith.constant dense<0.000000e+00> : vector<8x128xf32>
    %28 = tpu.matmul %27, %26, %cst_12 {dimension_numbers = #tpu.dot_dimension_numbers<[1], [0], [0], [1], [0, 0, 1, 1], [], []>} : vector<8x128xbf16>, vector<128x128xbf16>, vector<8x128xf32> -> vector<8x128xf32>
    %29 = arith.addf %2, %28 : vector<8x128xf32>
    %30 = vector.extract_strided_slice %0 {offsets = [8, 0], sizes = [1, 128], strides = [1, 1]} : vector<16x128xf32> to vector<1x128xf32>
    %31 = vector.broadcast %30 : vector<1x128xf32> to vector<8x128xf32>
    %32 = arith.addf %29, %31 : vector<8x128xf32>
    %cst_13 = arith.constant dense<0.000000e+00> : vector<8xf32>
    %33 = vector.multi_reduction <add>, %32, %cst_13 [1] : vector<8x128xf32> to vector<8xf32>
    %34 = vector.shape_cast %33 : vector<8xf32> to vector<8x1xf32>
    %cst_14 = arith.constant 1.280000e+02 : f32
    %35 = vector.broadcast %cst_14 : f32 to vector<8x1xf32>
    %36 = arith.divf %34, %35 : vector<8x1xf32>
    %37 = vector.broadcast %36 : vector<8x1xf32> to vector<8x128xf32>
    %38 = arith.subf %32, %37 : vector<8x128xf32>
    %39 = arith.mulf %38, %38 : vector<8x128xf32>
    %cst_15 = arith.constant dense<0.000000e+00> : vector<8xf32>
    %40 = vector.multi_reduction <add>, %39, %cst_15 [1] : vector<8x128xf32> to vector<8xf32>
    %41 = vector.shape_cast %40 : vector<8xf32> to vector<8x1xf32>
    %cst_16 = arith.constant 1.280000e+02 : f32
    %42 = vector.broadcast %cst_16 : f32 to vector<8x1xf32>
    %43 = arith.divf %41, %42 : vector<8x1xf32>
    %cst_17 = arith.constant 9.99999974E-6 : f32
    %44 = vector.broadcast %cst_17 : f32 to vector<8x1xf32>
    %45 = arith.addf %43, %44 : vector<8x1xf32>
    %46 = math.rsqrt %45 : vector<8x1xf32>
    %47 = vector.broadcast %46 : vector<8x1xf32> to vector<8x128xf32>
    %48 = arith.mulf %38, %47 : vector<8x128xf32>
    %49 = vector.extract_strided_slice %0 {offsets = [2, 0], sizes = [1, 128], strides = [1, 1]} : vector<16x128xf32> to vector<1x128xf32>
    %50 = vector.broadcast %49 : vector<1x128xf32> to vector<8x128xf32>
    %51 = arith.mulf %48, %50 : vector<8x128xf32>
    %52 = vector.extract_strided_slice %0 {offsets = [3, 0], sizes = [1, 128], strides = [1, 1]} : vector<16x128xf32> to vector<1x128xf32>
    %53 = vector.broadcast %52 : vector<1x128xf32> to vector<8x128xf32>
    %54 = arith.addf %51, %53 : vector<8x128xf32>
    %c0_18 = arith.constant 0 : index
    %c0_19 = arith.constant 0 : index
    %55 = vector.load %arg5[%c0_18, %c0_19] : memref<128x512xbf16, #tpu.memory_space<vmem>>, vector<128x512xbf16>
    %56 = arith.truncf %54 : vector<8x128xf32> to vector<8x128xbf16>
    %cst_20 = arith.constant dense<0.000000e+00> : vector<8x512xf32>
    %57 = tpu.matmul %56, %55, %cst_20 {dimension_numbers = #tpu.dot_dimension_numbers<[1], [0], [0], [1], [0, 0, 1, 1], [], []>} : vector<8x128xbf16>, vector<128x512xbf16>, vector<8x512xf32> -> vector<8x512xf32>
    %58 = vector.extract_strided_slice %1 {offsets = [0, 0], sizes = [1, 512], strides = [1, 1]} : vector<2x512xf32> to vector<1x512xf32>
    %59 = vector.broadcast %58 : vector<1x512xf32> to vector<8x512xf32>
    %60 = arith.addf %57, %59 : vector<8x512xf32>
    %61 = arith.mulf %60, %60 : vector<8x512xf32>
    %62 = arith.mulf %60, %61 : vector<8x512xf32>
    %cst_21 = arith.constant 4.471500e-02 : f32
    %63 = vector.broadcast %cst_21 : f32 to vector<8x512xf32>
    %64 = arith.mulf %63, %62 : vector<8x512xf32>
    %65 = arith.addf %60, %64 : vector<8x512xf32>
    %cst_22 = arith.constant 0.797884583 : f32
    %66 = vector.broadcast %cst_22 : f32 to vector<8x512xf32>
    %67 = arith.mulf %66, %65 : vector<8x512xf32>
    %68 = math.tanh %67 : vector<8x512xf32>
    %cst_23 = arith.constant 1.000000e+00 : f32
    %69 = vector.broadcast %cst_23 : f32 to vector<8x512xf32>
    %70 = arith.addf %69, %68 : vector<8x512xf32>
    %cst_24 = arith.constant 5.000000e-01 : f32
    %71 = vector.broadcast %cst_24 : f32 to vector<8x512xf32>
    %72 = arith.mulf %71, %70 : vector<8x512xf32>
    %73 = arith.mulf %60, %72 : vector<8x512xf32>
    %c0_25 = arith.constant 0 : index
    %c0_26 = arith.constant 0 : index
    %74 = vector.load %arg6[%c0_25, %c0_26] : memref<512x128xbf16, #tpu.memory_space<vmem>>, vector<512x128xbf16>
    %75 = arith.truncf %73 : vector<8x512xf32> to vector<8x512xbf16>
    %cst_27 = arith.constant dense<0.000000e+00> : vector<8x128xf32>
    %76 = tpu.matmul %75, %74, %cst_27 {dimension_numbers = #tpu.dot_dimension_numbers<[1], [0], [0], [1], [0, 0, 1, 1], [], []>} : vector<8x512xbf16>, vector<512x128xbf16>, vector<8x128xf32> -> vector<8x128xf32>
    %77 = arith.addf %32, %76 : vector<8x128xf32>
    %78 = vector.extract_strided_slice %0 {offsets = [10, 0], sizes = [1, 128], strides = [1, 1]} : vector<16x128xf32> to vector<1x128xf32>
    %79 = vector.broadcast %78 : vector<1x128xf32> to vector<8x128xf32>
    %80 = arith.addf %77, %79 : vector<8x128xf32>
    %cst_28 = arith.constant dense<0.000000e+00> : vector<8xf32>
    %81 = vector.multi_reduction <add>, %2, %cst_28 [1] : vector<8x128xf32> to vector<8xf32>
    %82 = vector.shape_cast %81 : vector<8xf32> to vector<8x1xf32>
    %cst_29 = arith.constant 1.280000e+02 : f32
    %83 = vector.broadcast %cst_29 : f32 to vector<8x1xf32>
    %84 = arith.divf %82, %83 : vector<8x1xf32>
    %85 = vector.broadcast %84 : vector<8x1xf32> to vector<8x128xf32>
    %86 = arith.subf %2, %85 : vector<8x128xf32>
    %87 = arith.mulf %86, %86 : vector<8x128xf32>
    %cst_30 = arith.constant dense<0.000000e+00> : vector<8xf32>
    %88 = vector.multi_reduction <add>, %87, %cst_30 [1] : vector<8x128xf32> to vector<8xf32>
    %89 = vector.shape_cast %88 : vector<8xf32> to vector<8x1xf32>
    %cst_31 = arith.constant 1.280000e+02 : f32
    %90 = vector.broadcast %cst_31 : f32 to vector<8x1xf32>
    %91 = arith.divf %89, %90 : vector<8x1xf32>
    %cst_32 = arith.constant 9.99999974E-6 : f32
    %92 = vector.broadcast %cst_32 : f32 to vector<8x1xf32>
    %93 = arith.addf %91, %92 : vector<8x1xf32>
    %94 = math.rsqrt %93 : vector<8x1xf32>
    %95 = vector.broadcast %94 : vector<8x1xf32> to vector<8x128xf32>
    %96 = arith.mulf %86, %95 : vector<8x128xf32>
    %97 = vector.extract_strided_slice %0 {offsets = [4, 0], sizes = [1, 128], strides = [1, 1]} : vector<16x128xf32> to vector<1x128xf32>
    %98 = vector.broadcast %97 : vector<1x128xf32> to vector<8x128xf32>
    %99 = arith.mulf %96, %98 : vector<8x128xf32>
    %100 = vector.extract_strided_slice %0 {offsets = [5, 0], sizes = [1, 128], strides = [1, 1]} : vector<16x128xf32> to vector<1x128xf32>
    %101 = vector.broadcast %100 : vector<1x128xf32> to vector<8x128xf32>
    %102 = arith.addf %99, %101 : vector<8x128xf32>
    %c0_33 = arith.constant 0 : index
    %c0_34 = arith.constant 0 : index
    %103 = vector.load %arg4[%c0_33, %c0_34] : memref<128x128xbf16, #tpu.memory_space<vmem>>, vector<128x128xbf16>
    %104 = arith.truncf %102 : vector<8x128xf32> to vector<8x128xbf16>
    %cst_35 = arith.constant dense<0.000000e+00> : vector<8x128xf32>
    %105 = tpu.matmul %104, %103, %cst_35 {dimension_numbers = #tpu.dot_dimension_numbers<[1], [0], [0], [1], [0, 0, 1, 1], [], []>} : vector<8x128xbf16>, vector<128x128xbf16>, vector<8x128xf32> -> vector<8x128xf32>
    %106 = arith.addf %3, %105 : vector<8x128xf32>
    %107 = vector.extract_strided_slice %0 {offsets = [9, 0], sizes = [1, 128], strides = [1, 1]} : vector<16x128xf32> to vector<1x128xf32>
    %108 = vector.broadcast %107 : vector<1x128xf32> to vector<8x128xf32>
    %109 = arith.addf %106, %108 : vector<8x128xf32>
    %cst_36 = arith.constant dense<0.000000e+00> : vector<8xf32>
    %110 = vector.multi_reduction <add>, %109, %cst_36 [1] : vector<8x128xf32> to vector<8xf32>
    %111 = vector.shape_cast %110 : vector<8xf32> to vector<8x1xf32>
    %cst_37 = arith.constant 1.280000e+02 : f32
    %112 = vector.broadcast %cst_37 : f32 to vector<8x1xf32>
    %113 = arith.divf %111, %112 : vector<8x1xf32>
    %114 = vector.broadcast %113 : vector<8x1xf32> to vector<8x128xf32>
    %115 = arith.subf %109, %114 : vector<8x128xf32>
    %116 = arith.mulf %115, %115 : vector<8x128xf32>
    %cst_38 = arith.constant dense<0.000000e+00> : vector<8xf32>
    %117 = vector.multi_reduction <add>, %116, %cst_38 [1] : vector<8x128xf32> to vector<8xf32>
    %118 = vector.shape_cast %117 : vector<8xf32> to vector<8x1xf32>
    %cst_39 = arith.constant 1.280000e+02 : f32
    %119 = vector.broadcast %cst_39 : f32 to vector<8x1xf32>
    %120 = arith.divf %118, %119 : vector<8x1xf32>
    %cst_40 = arith.constant 9.99999974E-6 : f32
    %121 = vector.broadcast %cst_40 : f32 to vector<8x1xf32>
    %122 = arith.addf %120, %121 : vector<8x1xf32>
    %123 = math.rsqrt %122 : vector<8x1xf32>
    %124 = vector.broadcast %123 : vector<8x1xf32> to vector<8x128xf32>
    %125 = arith.mulf %115, %124 : vector<8x128xf32>
    %126 = vector.extract_strided_slice %0 {offsets = [6, 0], sizes = [1, 128], strides = [1, 1]} : vector<16x128xf32> to vector<1x128xf32>
    %127 = vector.broadcast %126 : vector<1x128xf32> to vector<8x128xf32>
    %128 = arith.mulf %125, %127 : vector<8x128xf32>
    %129 = vector.extract_strided_slice %0 {offsets = [7, 0], sizes = [1, 128], strides = [1, 1]} : vector<16x128xf32> to vector<1x128xf32>
    %130 = vector.broadcast %129 : vector<1x128xf32> to vector<8x128xf32>
    %131 = arith.addf %128, %130 : vector<8x128xf32>
    %c0_41 = arith.constant 0 : index
    %c0_42 = arith.constant 0 : index
    %132 = vector.load %arg7[%c0_41, %c0_42] : memref<128x512xbf16, #tpu.memory_space<vmem>>, vector<128x512xbf16>
    %133 = arith.truncf %131 : vector<8x128xf32> to vector<8x128xbf16>
    %cst_43 = arith.constant dense<0.000000e+00> : vector<8x512xf32>
    %134 = tpu.matmul %133, %132, %cst_43 {dimension_numbers = #tpu.dot_dimension_numbers<[1], [0], [0], [1], [0, 0, 1, 1], [], []>} : vector<8x128xbf16>, vector<128x512xbf16>, vector<8x512xf32> -> vector<8x512xf32>
    %135 = vector.extract_strided_slice %1 {offsets = [1, 0], sizes = [1, 512], strides = [1, 1]} : vector<2x512xf32> to vector<1x512xf32>
    %136 = vector.broadcast %135 : vector<1x512xf32> to vector<8x512xf32>
    %137 = arith.addf %134, %136 : vector<8x512xf32>
    %138 = arith.mulf %137, %137 : vector<8x512xf32>
    %139 = arith.mulf %137, %138 : vector<8x512xf32>
    %cst_44 = arith.constant 4.471500e-02 : f32
    %140 = vector.broadcast %cst_44 : f32 to vector<8x512xf32>
    %141 = arith.mulf %140, %139 : vector<8x512xf32>
    %142 = arith.addf %137, %141 : vector<8x512xf32>
    %cst_45 = arith.constant 0.797884583 : f32
    %143 = vector.broadcast %cst_45 : f32 to vector<8x512xf32>
    %144 = arith.mulf %143, %142 : vector<8x512xf32>
    %145 = math.tanh %144 : vector<8x512xf32>
    %cst_46 = arith.constant 1.000000e+00 : f32
    %146 = vector.broadcast %cst_46 : f32 to vector<8x512xf32>
    %147 = arith.addf %146, %145 : vector<8x512xf32>
    %cst_47 = arith.constant 5.000000e-01 : f32
    %148 = vector.broadcast %cst_47 : f32 to vector<8x512xf32>
    %149 = arith.mulf %148, %147 : vector<8x512xf32>
    %150 = arith.mulf %137, %149 : vector<8x512xf32>
    %c0_48 = arith.constant 0 : index
    %c0_49 = arith.constant 0 : index
    %151 = vector.load %arg8[%c0_48, %c0_49] : memref<512x128xbf16, #tpu.memory_space<vmem>>, vector<512x128xbf16>
    %152 = arith.truncf %150 : vector<8x512xf32> to vector<8x512xbf16>
    %cst_50 = arith.constant dense<0.000000e+00> : vector<8x128xf32>
    %153 = tpu.matmul %152, %151, %cst_50 {dimension_numbers = #tpu.dot_dimension_numbers<[1], [0], [0], [1], [0, 0, 1, 1], [], []>} : vector<8x512xbf16>, vector<512x128xbf16>, vector<8x128xf32> -> vector<8x128xf32>
    %154 = arith.addf %109, %153 : vector<8x128xf32>
    %155 = vector.extract_strided_slice %0 {offsets = [11, 0], sizes = [1, 128], strides = [1, 1]} : vector<16x128xf32> to vector<1x128xf32>
    %156 = vector.broadcast %155 : vector<1x128xf32> to vector<8x128xf32>
    %157 = arith.addf %154, %156 : vector<8x128xf32>
    %158 = vector.extract_strided_slice %0 {offsets = [12, 0], sizes = [1, 128], strides = [1, 1]} : vector<16x128xf32> to vector<1x128xf32>
    %159 = vector.broadcast %158 : vector<1x128xf32> to vector<8x128xf32>
    %160 = arith.mulf %159, %80 : vector<8x128xf32>
    %161 = vector.extract_strided_slice %0 {offsets = [13, 0], sizes = [1, 128], strides = [1, 1]} : vector<16x128xf32> to vector<1x128xf32>
    %162 = vector.broadcast %161 : vector<1x128xf32> to vector<8x128xf32>
    %163 = arith.mulf %162, %157 : vector<8x128xf32>
    %164 = arith.addf %160, %163 : vector<8x128xf32>
    %165 = vector.extract_strided_slice %0 {offsets = [14, 0], sizes = [1, 128], strides = [1, 1]} : vector<16x128xf32> to vector<1x128xf32>
    %166 = vector.broadcast %165 : vector<1x128xf32> to vector<8x128xf32>
    %167 = arith.addf %164, %166 : vector<8x128xf32>
    %c0_51 = arith.constant 0 : index
    %c0_52 = arith.constant 0 : index
    %168 = vector.load %arg10[%c0_51, %c0_52] : memref<8x128xf32, #tpu.memory_space<vmem>>, vector<8x128xf32>
    tpu.vector_store %arg10[%c0_51, %c0_52], %167 {strides = array<i32>} : memref<8x128xf32, #tpu.memory_space<vmem>>, vector<8x128xf32>,
    return
  }
  func.func @transform_0(%arg0: i32) -> (i32, i32) {
    %c0_i32 = arith.constant 0 : i32
    %c0_i32_0 = arith.constant 0 : i32
    return %arg0, %c0_i32 : i32, i32
  }
  func.func @transform_1(%arg0: i32) -> (i32, i32) {
    %c0_i32 = arith.constant 0 : i32
    %c0_i32_0 = arith.constant 0 : i32
    %c0_i32_1 = arith.constant 0 : i32
    return %c0_i32, %c0_i32_0 : i32, i32
  }
  func.func @transform_2(%arg0: i32) -> (i32, i32) {
    %c0_i32 = arith.constant 0 : i32
    %c0_i32_0 = arith.constant 0 : i32
    %c0_i32_1 = arith.constant 0 : i32
    return %c0_i32, %c0_i32_0 : i32, i32
  }
  func.func @transform_3(%arg0: i32) -> (i32, i32) {
    %c0_i32 = arith.constant 0 : i32
    %c0_i32_0 = arith.constant 0 : i32
    %c0_i32_1 = arith.constant 0 : i32
    return %c0_i32, %c0_i32_0 : i32, i32
  }
  func.func @transform_4(%arg0: i32) -> (i32, i32) {
    %c0_i32 = arith.constant 0 : i32
    %c0_i32_0 = arith.constant 0 : i32
    %c0_i32_1 = arith.constant 0 : i32
    return %c0_i32, %c0_i32_0 : i32, i32
  }
  func.func @transform_5(%arg0: i32) -> (i32, i32) {
    %c0_i32 = arith.constant 0 : i32
    %c0_i32_0 = arith.constant 0 : i32
    %c0_i32_1 = arith.constant 0 : i32
    return %c0_i32, %c0_i32_0 : i32, i32
  }
  func.func @transform_6(%arg0: i32) -> (i32, i32) {
    %c0_i32 = arith.constant 0 : i32
    %c0_i32_0 = arith.constant 0 : i32
    %c0_i32_1 = arith.constant 0 : i32
    return %c0_i32, %c0_i32_0 : i32, i32
  }
  func.func @transform_7(%arg0: i32) -> (i32, i32) {
    %c0_i32 = arith.constant 0 : i32
    %c0_i32_0 = arith.constant 0 : i32
    %c0_i32_1 = arith.constant 0 : i32
    return %c0_i32, %c0_i32_0 : i32, i32
  }
  func.func @transform_8(%arg0: i32) -> (i32, i32) {
    %c0_i32 = arith.constant 0 : i32
    %c0_i32_0 = arith.constant 0 : i32
    %c0_i32_1 = arith.constant 0 : i32
    return %c0_i32, %c0_i32_0 : i32, i32
  }
  func.func @transform_9(%arg0: i32) -> (i32, i32) {
    %c0_i32 = arith.constant 0 : i32
    %c0_i32_0 = arith.constant 0 : i32
    return %arg0, %c0_i32 : i32, i32
  }
}

</mosaic_0001>

<bundles_post_ra>
// kernel: block_forward.1
= control target key start
LH: loop header
LB: loop body
LE: loop exit
PB: predicated region body
PF: predicated region fallthrough
CT: control target
= control target key end

     0   :  { %s3529_s0 = inlined_call_operand.vmem [shape: f32[16,256], index: 0, kind: input, shape index: {}]   ;;  %s3530_s1 = inlined_call_operand.hbm [shape: f32[16,128], index: 1, kind: input, shape index: {}]   ;;  %s3531_s2 = inlined_call_operand.vmem [shape: bf16[128,128], index: 2, kind: input, shape index: {}]   ;;  %s3532_s3 = inlined_call_operand.hbm [shape: bf16[128,128], index: 3, kind: input, shape index: {}]   ;;  %s3533_s4 = inlined_call_operand.hbm [shape: bf16[128,512], index: 4, kind: input, shape index: {}]   ;;  %s3534_s5 = inlined_call_operand.hbm [shape: bf16[512,128], index: 5, kind: input, shape index: {}]   ;;  %s3535_s6 = inlined_call_operand.hbm [shape: bf16[128,512], index: 6, kind: input, shape index: {}]   ;;  %s3536_s7 = inlined_call_operand.hbm [shape: bf16[512,128], index: 7, kind: input, shape index: {}]   ;;  %s3537_s8 = inlined_call_operand.vmem [shape: f32[2,512], index: 8, kind: input, shape index: {}]   ;;  %s3538_s9 = inlined_call_operand.hbm [shape: f32[16,128], index: 9, kind: output, shape index: {}]  }
   0x1   :  { %3544 = sst [smem:[#allocation20_spill]] %s3530_s1 }
   0x2   :  { %14 = vsyncpa [#allocation3], 0 }
   0x3   :  { %15 = vsyncpa [#allocation6], 0 }
   0x4   :  { %16 = vsyncpa [#allocation9], 0 }
   0x5   :  { %17 = vsyncpa [#allocation12], 0 }
   0x6   :  { %18 = vsyncpa [#allocation4], 0 }
   0x7   :  { %20 = vsyncpa [#allocation4 + $0x1], 0  ;;  %s3194_s30 = smov 0   ;;  %s3196_s10 = smov 0  }
   0x8   :  { %s3198_s11 = smov 0   ;;  %s3200_s12 = smov 0  }
   0x9 LB: > { %s3215_s13 = sadd.s32 4294967295, %s3126_s12   ;;  %s2269_s14 = sadd.s32 4294967294, %s3126_s12   ;;  %s3126_s12 = sphi %s3200_s12, %s3569_s12   ;;  %s3122_s11 = sphi %s3198_s11, %s3568_s11   ;;  %s3118_s10 = sphi %s3196_s10, %s3567_s10   ;;  %s3114_s30 = sphi %s3194_s30, %s3566_s30  }
   0xa   : > { %s3219_s15 = sadd.s32 1, %s3126_s12   ;;  %s227_s16 = sadd.s32 1, %s3122_s11 }
   0xb   : > { %s224_s17 = ssub.s32 %s3126_s12, %s3219_s15  ;;  %p237_p0 = scmp.ne.s32.totalorder %s3122_s11, %s3118_s10 }
   0xc   : > { %p225_p1 = scmp.eq.s32.totalorder %s224_s17, 0  ;;  %p238_p2 = scmp.eq.s32.totalorder %s3215_s13, 1 }
   0xd   : > { %p243_p3 = scmp.ne.s32.totalorder %s3118_s10, %s3114_s30  ;;  %p244_p4 = scmp.eq.s32.totalorder %s2269_s14, 1 }
   0xe   : > { %s3230_s18 = scalar_select %p225_p1, %s3122_s11, %s227_s16  }
   0xf   : > { %p3232_p5 = por %p238_p2, %p237_p0  ;;  %p3236_p6 = por %p244_p4, %p243_p3 }
  0x10   : > { %3545 = sst [smem:[#allocation19_spill]] %s3230_s18  ;;  %p2270_p7 = scmp.ge.s32.totalorder %s3126_s12, 1 }
  0x11   : > { %s3546_s19 = scalar_select %p3232_p5, 1, 0 }
  0x12   : > { %s3547_s20 = scalar_select %p3236_p6, 1, 0 }
  0x13   : > { %p251_p8 = scmp.lt.s32.totalorder %s3126_s12, 3  ;;  %p3539_p9 = scmp.eq.s32.totalorder %s3215_s13, 0 }
  0x14   : > { %s3128_s22 = smov [#allocation5]   ;;  %s3129_s25 = smov [#allocation8]  }
  0x15   : > { %p3243_p10 = pnand %p2270_p7, %p251_p8  ;;  %s279_s23 = sshll.u32 %s3128_s22, 4  ;;  %s280_s23 = int_to_ptr.vmem [resolvable:$true] %s279_s23 }
  0x16   : > { %s305_s26 = sshll.u32 %s3129_s25, 4  ;;  %s3130_s27 = smov [#allocation2]   ;;  %s306_s26 = int_to_ptr.vmem [resolvable:$true] %s305_s26 }
  0x17   : > { %s3548_s21 = scalar_select %p3243_p10, 1, 0 }
  0x18   : > { %p2609_p11 = pneg %p3243_p10  ;;  %s263_s28 = sshll.u32 %s3130_s27, 4  ;;  %s264_s28 = int_to_ptr.vmem [resolvable:$true] %s263_s28 }
  0x19   : > { %s2905_s14 = scalar_lea.vmem %s280_s23, 1024  ;;  %p2913_p3 = scmp.lt.s32.totalorder %s280_s23, %s280_s23 }
  0x1a   : > { %p3251_p12 = pnand %p3539_p9, %p2609_p11  ;;  %p2906_p0 = scmp.ne.s32.totalorder %s280_s23, %s2905_s14 }
  0x1b   : > { %p2914_p4 = scmp.lt.s32.totalorder %s2905_s14, %s2905_s14 }
  0x1c   : > { %p3257_p13 = pneg %p3251_p12 }
  0x1d   : > { %p2915_p7 = por %p2914_p4, %p2913_p3 }
  0x1e   : > { %p2908_p1 = pnand %p2906_p0, %p3257_p13 }
  0x20   : > { %p2909_p2 = pneg %p2908_p1 }
  0x22   : > { %p2916_p8 = pnand %p2915_p7, %p2909_p2 }
  0x24   : > { %2919 = shalt.err (!%p2916_p8)
}
  0x25   : > { %s3540_s16 = smov 64   ;;  %s3541_s17 = smov 4  }
  0x26   : > { %2615 = dma.hbm_to_vmem [thread:$0]  (!%p3251_p12), %s3532_s3, 1024, %s280_s23, [#allocation6], %s3540_s16, %s3540_s16, %s3541_s17  }
  0x27   : > { %s2931_s27 = scalar_lea.vmem %s306_s26, 4096  ;;  %p2939_p3 = scmp.lt.s32.totalorder %s306_s26, %s306_s26 }
  0x28   : > { %p2932_p11 = scmp.ne.s32.totalorder %s306_s26, %s2931_s27  ;;  %p2940_p2 = scmp.lt.s32.totalorder %s2931_s27, %s2931_s27 }
  0x2a   : > { %p2934_p0 = pnand %p2932_p11, %p3257_p13  ;;  %p2941_p4 = por %p2940_p2, %p2939_p3 }
  0x2c   : > { %p2935_p1 = pneg %p2934_p0 }
  0x2e   : > { %p2942_p7 = pnand %p2941_p4, %p2935_p1 }
  0x30   : > { %2945 = shalt.err (!%p2942_p7)
}
  0x31   : > { %2621 = dma.hbm_to_vmem [thread:$0]  (!%p3251_p12), %s3534_s5, 4096, %s306_s26, [#allocation9], %s3540_s16, %s3540_s16, %s3541_s17  }
  0x32   : > { %s2957_s23 = scalar_lea.vmem %s264_s28, 256  ;;  %p2965_p9 = scmp.lt.s32.totalorder %s264_s28, %s264_s28 }
  0x33   : > { %p2958_p8 = scmp.ne.s32.totalorder %s264_s28, %s2957_s23  ;;  %p2966_p3 = scmp.lt.s32.totalorder %s2957_s23, %s2957_s23 }
  0x35   : > { %p2960_p11 = pnand %p2958_p8, %p3257_p13  ;;  %p2967_p1 = por %p2966_p3, %p2965_p9 }
  0x37   : > { %p2961_p0 = pneg %p2960_p11 }
  0x39   : > { %p2968_p2 = pnand %p2967_p1, %p2961_p0 }
  0x3b   : > { %2971 = shalt.err (!%p2968_p2)
}
  0x3c   : > { %s3133_s22 = smov 128   ;;  %s3134_s25 = smov 8  }
  0x3d   : > { %s3551_s1 = sld [smem:[#allocation20_spill]]  ;;  %s3135_s26 = smov [#allocation7]  }
  0x3e   : > { %s292_s14 = sshll.u32 %s3135_s26, 4  ;;  %s293_s14 = int_to_ptr.vmem [resolvable:$true] %s292_s14 }
  0x3f   : > { %s2983_s16 = scalar_lea.vmem %s293_s14, 4096  ;;  %p2991_p9 = scmp.lt.s32.totalorder %s293_s14, %s293_s14 }
  0x40   : > { %p2984_p4 = scmp.ne.s32.totalorder %s293_s14, %s2983_s16  ;;  %p2992_p11 = scmp.lt.s32.totalorder %s2983_s16, %s2983_s16 }
  0x42   : > { %p2986_p7 = pnand %p2984_p4, %p3257_p13  ;;  %p2993_p0 = por %p2992_p11, %p2991_p9 }
  0x43   : > { %2612 = dma.hbm_to_vmem [thread:$0]  (!%p3251_p12), %s3551_s1, 256, %s264_s28, [#allocation3], %s3133_s22, %s3133_s22, %s3134_s25  }
  0x44   : > { %p2987_p8 = pneg %p2986_p7 }
  0x46   : > { %p2994_p3 = pnand %p2993_p0, %p2987_p8 }
  0x48   : > { %2997 = shalt.err (!%p2994_p3)
}
  0x49   : > { %s3136_s23 = smov 256   ;;  %s3137_s17 = smov 16  }
  0x4a   : > { %2618 = dma.hbm_to_vmem [thread:$0]  (!%p3251_p12), %s3533_s4, 4096, %s293_s14, [#allocation6], %s3136_s23, %s3136_s23, %s3137_s17  }
  0x4b   : > { %s3138_s22 = smov [#allocation10]   ;;  %s3139_s18 = smov [#allocation11]  }
  0x4c   : > { %s318_s25 = sshll.u32 %s3138_s22, 4  ;;  %s331_s26 = sshll.u32 %s3139_s18, 4  ;;  %s319_s25 = int_to_ptr.vmem [resolvable:$true] %s318_s25  ;;  %s332_s26 = int_to_ptr.vmem [resolvable:$true] %s331_s26 }
  0x4d   : > { %s3009_s1 = scalar_lea.vmem %s319_s25, 4096  ;;  %p3017_p7 = scmp.lt.s32.totalorder %s319_s25, %s319_s25 }
  0x4e   : > { %p3010_p1 = scmp.ne.s32.totalorder %s319_s25, %s3009_s1  ;;  %p3018_p8 = scmp.lt.s32.totalorder %s3009_s1, %s3009_s1 }
  0x50   : > { %p3012_p2 = pnand %p3010_p1, %p3257_p13  ;;  %p3019_p9 = por %p3018_p8, %p3017_p7 }
  0x52   : > { %p3013_p4 = pneg %p3012_p2 }
  0x54   : > { %p3020_p11 = pnand %p3019_p9, %p3013_p4 }
  0x56   : > { %3023 = shalt.err (!%p3020_p11)
}
  0x57   : > { %2624 = dma.hbm_to_vmem [thread:$0]  (!%p3251_p12), %s3535_s6, 4096, %s319_s25, [#allocation9], %s3136_s23, %s3136_s23, %s3137_s17  }
  0x58   : > { %s3035_s27 = scalar_lea.vmem %s332_s26, 4096  ;;  %p3043_p5 = scmp.lt.s32.totalorder %s332_s26, %s332_s26 }
  0x59   : > { %p3036_p0 = scmp.ne.s32.totalorder %s332_s26, %s3035_s27  ;;  %p3044_p1 = scmp.lt.s32.totalorder %s3035_s27, %s3035_s27 }
  0x5b   : > { %p3038_p3 = pnand %p3036_p0, %p3257_p13  ;;  %p3045_p2 = por %p3044_p1, %p3043_p5 }
  0x5d   : > { %p3039_p6 = pneg %p3038_p3 }
  0x5f   : > { %p3046_p10 = pnand %p3045_p2, %p3039_p6 }
  0x61   : > { %3049 = shalt.err (!%p3046_p10)
}
  0x62   : > { %s3552_s1 = smov 4   ;;  %s3553_s28 = smov 64  }
  0x63   : > { %2627 = dma.hbm_to_vmem [thread:$0]  (!%p3251_p12), %s3536_s7, 4096, %s332_s26, [#allocation12], %s3553_s28, %s3553_s28, %s3552_s1  }
  0x64   : > { %p3554_p4 = scmp.ne.s32.totalorder %s3548_s21, 0 }
  0x65   : > { %p3555_p13 = scmp.eq.s32.totalorder (!%p3554_p4), %s3215_s13, 0 }
  0x66   : > { %358 = sbr.rel (%p3554_p4) target bundleno = 2158 (0x86e), region = 56 }
  0x6b   : > { %3093 = dma.done.wait (%p3555_p13), [#allocation3], 256   ;;  %p3556_p7 = pmov %p3555_p13 }
  0x6d   : > { %3095 = vsyncadd (%p3556_p7), [#allocation3], 4294967040  ;;  %p3557_p5 = pmov %p3556_p7 }
  0x6f   : > { %3097 = dma.done.wait (%p3557_p5), [#allocation6], 5120   ;;  %p3558_p6 = pmov %p3557_p5 }
  0x70   : > { %p3559_p10 = pmov %p3557_p5 }
  0x71   : > { %3099 = vsyncadd (%p3558_p6), [#allocation6], 4294962176 }
  0x72   : > { %3101 = dma.done.wait (%p3559_p10), [#allocation9], 8192   ;;  %p3560_p12 = pmov %p3557_p5 }
  0x73   : > { %p3561_p8 = pmov %p3557_p5 }
  0x74   : > { %3103 = vsyncadd (%p3560_p12), [#allocation9], 4294959104 }
  0x75   : > { %3105 = dma.done.wait (%p3561_p8), [#allocation12], 4096   ;;  %p3562_p9 = pmov %p3557_p5 }
  0x76   : > { %p414_p11 = scmp.lt.s32.totalorder %s3215_s13, 1  ;;  %v2692_v1 = vld [vmem:[%s3531_s2 + $0x38] sm:$0xff]   ;;  %v2693_v2 = vld [vmem:[%s3531_s2 + $0x30] sm:$0xff]   ;;  %v3140_v3 = vmov 0.0   ;;  %v2694_v8 = vld [vmem:[%s3531_s2 + $0x28] sm:$0xff]   ;;  %vm3141_vm0 = vmmov 0   ;;  %v437_v18 = vlaneseq }
  0x77   : > { %3107 = vsyncadd (%p3562_p9), [#allocation12], 4294963200  ;;  %2543 = vmatprep.subr.bf16.mxu0 %v3140_v3  ;;  %v2695_v9 = vld [vmem:[%s3531_s2 + $0x20] sm:$0xff]   ;;  %2559 = vmatprep.mubr.msk.bf16.mxu0 %vm3141_vm0, %v3140_v3  ;;  %v2696_v10 = vld [vmem:[%s3531_s2 + $0x18] sm:$0xff]   ;;  %s2433_s28 = sshll.u32 %s3215_s13, 7  ;;  %p3563_p3 = scmp.ne.s32.totalorder %s3546_s19, 0 }
  0x78   : > { %s415_s21 = scalar_select %p414_p11, %s3215_s13, 1  ;;  %2544 = vmatpush3.bf16.msra.mxu0 %v2692_v1  ;;  %v2697_v11 = vld [vmem:[%s3531_s2 + $0x10] sm:$0xff]   ;;  %v2698_v12 = vld [vmem:[%s3531_s2 + $0x8] sm:$0xff]   ;;  %v2699_v13 = vld [vmem:[%s3531_s2] sm:$0xff]   ;;  %v3373_v19 = vshrl.u32 %v437_v18, 7 }
  0x79   : > { %2545 = vmatprep.subr.bf16.mxu0 %v3140_v3  ;;  %v3378_v21 = vld [vmem:[#allocation2] sm:$0xff]  ;;  %v3387_v30 = vld [vmem:[#allocation2 + $0x8] sm:$0xff]  ;;  %s2148_s29 = scalar_lea.hbm %s3538_s9, %s2433_s28  ;;  %s3143_s26 = smov [#allocation13]  }
  0x7a   : > { %s2436_s24 = sshll.u32 %s415_s21, 4  ;;  %v3376_v20 = vsub.s32 0, %v3373_v19  ;;  %v3381_v22 = vsub.s32 1, %v3373_v19  ;;  %v2700_v38 = vld [vmem:[#allocation7 + $0xe4] ss:$16 sps:$4 sm:$0xff]   ;;  %s3054_s16 = sshll.u32 %s3143_s26, 4  ;;  %s3055_s16 = int_to_ptr.vmem [resolvable:$false] %s3054_s16 }
  0x7b   : > { %s3335_s23 = scalar_lea.vmem %s3529_s0, %s2436_s24  ;;  %v2702_v39 = vld [vmem:[#allocation7 + $0xe8] ss:$16 sps:$4 sm:$0xff]   ;;  %v2704_v40 = vld [vmem:[#allocation7 + $0xec] ss:$16 sps:$4 sm:$0xff]   ;;  %v2705_v41 = vld [vmem:[#allocation7 + $0xe0] ss:$16 sps:$4 sm:$0xff]   ;;  %809 = vmatprep.subr.bf16.mxu1 %v2700_v38 }
  0x7c   : > { %v424_v0 = vld [vmem:[%s3335_s23 + $0x8] sm:$0xff]  ;;  %2546 = vmatpush3.bf16.msra.mxu0 %v2693_v2  ;;  %v423_v14 = vld [vmem:[%s3335_s23] sm:$0xff]  ;;  %v440_v23 = vrot.slane %v3378_v21, %v3376_v20  ;;  %v445_v26 = vrot.slane %v3378_v21, %v3381_v22  ;;  %v556_v31 = vrot.slane %v3387_v30, %v3376_v20  ;;  %810 = vmatpush1.bf16.msra.mxu1 %v2705_v41  ;;  %s3056_s13 = scalar_lea.vmem %s3055_s16, 256 }
  0x7d   : > { %425 = vadd.xlane.f32.xlu0 %v424_v0  ;;  %2547 = vmatprep.subr.bf16.mxu0 %v3140_v3  ;;  %v2706_v42 = vld [vmem:[#allocation7 + $0xc4] ss:$16 sps:$4 sm:$0xff]   ;;  %v2710_v43 = vld [vmem:[#allocation7 + $0xcc] ss:$16 sps:$4 sm:$0xff]   ;;  %v2708_v44 = vld [vmem:[#allocation7 + $0xc8] ss:$16 sps:$4 sm:$0xff]  }
  0x7e   : > { %v2711_v45 = vld [vmem:[#allocation7 + $0xc0] ss:$16 sps:$4 sm:$0xff]   ;;  %811 = vmatprep.subr.bf16.mxu1 %v2706_v42  ;;  %v2712_v54 = vld [vmem:[#allocation7 + $0xa4] ss:$16 sps:$4 sm:$0xff]   ;;  %v2716_v55 = vld [vmem:[#allocation7 + $0xac] ss:$16 sps:$4 sm:$0xff]  }
  0x7f   : > { %v2714_v56 = vld [vmem:[#allocation7 + $0xa8] ss:$16 sps:$4 sm:$0xff]   ;;  %v2717_v57 = vld [vmem:[#allocation7 + $0xa0] ss:$16 sps:$4 sm:$0xff]   ;;  %v2718_v58 = vld [vmem:[#allocation7 + $0x84] ss:$16 sps:$4 sm:$0xff]  }
  0x80   : > { %2548 = vmatpush3.bf16.msra.mxu0 %v2694_v8  ;;  %812 = vmatpush1.bf16.msra.mxu1 %v2711_v45  ;;  %v2720_v59 = vld [vmem:[#allocation7 + $0x88] ss:$16 sps:$4 sm:$0xff]   ;;  %v2722_v60 = vld [vmem:[#allocation7 + $0x8c] ss:$16 sps:$4 sm:$0xff]   ;;  %v2723_v61 = vld [vmem:[#allocation7 + $0x80] ss:$16 sps:$4 sm:$0xff]  }
  0x81   : > { %2549 = vmatprep.subr.bf16.mxu0 %v3140_v3  ;;  %813 = vmatprep.subr.bf16.mxu1 %v2712_v54  ;;  %v2724_v62 = vld [vmem:[#allocation7 + $0x64] ss:$16 sps:$4 sm:$0xff]   ;;  %v2728_v63 = vld [vmem:[#allocation7 + $0x6c] ss:$16 sps:$4 sm:$0xff]   ;;  %v2729_v1 = vld [vmem:[#allocation7 + $0x60] ss:$16 sps:$4 sm:$0xff]  }
  0x82   : > { %v2730_v2 = vld [vmem:[#allocation7 + $0x44] ss:$16 sps:$4 sm:$0xff]   ;;  %v2740_v8 = vld [vmem:[#allocation7 + $0x2c] ss:$16 sps:$4 sm:$0xff]  }
  0x83   : > { %v2752_v38 = vld [vmem:[#allocation8 + $0x70] sm:$0xff]   ;;  %v2756_v42 = vld [vmem:[#allocation8 + $0x68] sm:$0xff]   ;;  %v2767_v54 = vld [vmem:[#allocation8 + $0x98] sm:$0xff]  }
  0x84   : > { %2550 = vmatpush3.bf16.msra.mxu0 %v2695_v9  ;;  %814 = vmatpush1.bf16.msra.mxu1 %v2717_v57  ;;  %v3142_v9 = vmov 0   ;;  %v2755_v41 = vld [vmem:[#allocation8 + $0xb0] sm:$0xff]   ;;  %v2759_v45 = vld [vmem:[#allocation8 + $0xa8] sm:$0xff]  }
  0x85   : > { %2551 = vmatprep.subr.bf16.mxu0 %v3140_v3  ;;  %815 = vmatprep.subr.bf16.mxu1 %v2718_v58  ;;  %v2769_v57 = vld [vmem:[#allocation8 + $0x10] sm:$0xff]  }
  0x86   : > { %841 = vmatprep.mubr.bf16.mxu1 %v3142_v9  ;;  %v2771_v58 = vld [vmem:[#allocation8 + $0x90] sm:$0xff]  }
  0x88   : > { %2552 = vmatpush3.bf16.msra.mxu0 %v2696_v10  ;;  %816 = vmatpush1.bf16.msra.mxu1 %v2723_v61  ;;  %v2738_v10 = vld [vmem:[#allocation7 + $0x28] ss:$16 sps:$4 sm:$0xff]  }
  0x89   : > { %2553 = vmatprep.subr.bf16.mxu0 %v3140_v3  ;;  %817 = vmatprep.subr.bf16.mxu1 %v2724_v62  ;;  %v2773_v61 = vld [vmem:[#allocation8 + $0x8] sm:$0xff]  }
  0x8a   : > { %v2775_v62 = vld [vmem:[#allocation8 + $0x88] sm:$0xff]  }
  0x8c   : > { %2554 = vmatpush3.bf16.msra.mxu0 %v2697_v11  ;;  %818 = vmatpush1.bf16.msra.mxu1 %v2729_v1  ;;  %v2741_v11 = vld [vmem:[#allocation7 + $0x20] ss:$16 sps:$4 sm:$0xff]  }
  0x8d   : > { %2555 = vmatprep.subr.bf16.mxu0 %v3140_v3  ;;  %819 = vmatprep.subr.bf16.mxu1 %v2730_v2  ;;  %v2777_v1 = vld [vmem:[#allocation8] sm:$0xff]  }
  0x8e   : > { %v2779_v2 = vld [vmem:[#allocation8 + $0x80] sm:$0xff]  }
  0x90   : > { %2556 = vmatpush3.bf16.msra.mxu0 %v2698_v12  ;;  %v2742_v12 = vld [vmem:[#allocation7 + $0x4] ss:$16 sps:$4 sm:$0xff]  }
  0x91   : > { %2557 = vmatprep.subr.bf16.mxu0 %v3140_v3 }
  0x94   : > { %2558 = vmatpush3.bf16.msra.mxu0 %v2699_v13  ;;  %v2746_v13 = vld [vmem:[#allocation7 + $0xc] ss:$16 sps:$4 sm:$0xff]  }
  0x95   : > { %850 = vmatprep.subr.bf16.mxu0 %v2704_v40  ;;  %v2754_v40 = vld [vmem:[#allocation8 + $0xf0] sm:$0xff]  }
 0x106   : > { %v426_v4 = vpop.xlane.xlu0 %425 }
 0x107   : > { %v428_v5 = vmul.f32 0.0078125, %v426_v4  ;;  %v2734_v4 = vld [vmem:[#allocation7 + $0x4c] ss:$16 sps:$4 sm:$0xff]  }
 0x109   : > { %v429_v6 = vsub.f32 %v424_v0, %v428_v5  ;;  %v2726_v0 = vld [vmem:[#allocation7 + $0x68] ss:$16 sps:$4 sm:$0xff]  }
 0x10a   : > { %v2732_v5 = vld [vmem:[#allocation7 + $0x48] ss:$16 sps:$4 sm:$0xff]  }
 0x10b   : > { %v430_v7 = vmul.f32 %v429_v6, %v429_v6 }
 0x10d   : > { %431 = vadd.xlane.f32.xlu0 %v430_v7  ;;  %v2736_v7 = vld [vmem:[#allocation7 + $0x24] ss:$16 sps:$4 sm:$0xff]  }
 0x111   : > { %1273 = vadd.xlane.f32.xlu0 %v423_v14 }
 0x196   : > { %v432_v15 = vpop.xlane.xlu0 %431 }
 0x197   : > { %v433_v16 = vmul.f32 0.0078125, %v432_v15  ;;  %v2747_v15 = vld [vmem:[#allocation7] ss:$16 sps:$4 sm:$0xff]  }
 0x199   : > { %v434_v17 = vadd.f32 1e-05, %v433_v16 }
 0x19a   : > { %v1274_v46 = vpop.xlane.xlu0 %1273 }
 0x19b   : > { %2868 = vrsqrt.f32 %v434_v17  ;;  %v1275_v47 = vmul.f32 0.0078125, %v1274_v46  ;;  %v2760_v46 = vld [vmem:[#allocation8 + $0x60] sm:$0xff]  }
 0x19d   : > { %v3397_v51 = vsub.f32 %v423_v14, %v1275_v47  ;;  %v2761_v47 = vld [vmem:[#allocation8 + $0x20] sm:$0xff]  }
 0x19f   : > { %v1277_v53 = vmul.f32 %v3397_v51, %v3397_v51 }
 0x1a8   : > { %v2869_v24 = vpop.eup %2868 }
 0x1a9   : > { %v436_v25 = vmul.f32 %v2869_v24, %v429_v6  ;;  %v2735_v6 = vld [vmem:[#allocation7 + $0x40] ss:$16 sps:$4 sm:$0xff]   ;;  %v3409_v24 = vsub.s32 3, %v3373_v19 }
 0x1aa   : > { %820 = vmatpush1.bf16.msra.mxu1 %v2735_v6  ;;  %v3426_v6 = vsub.s32 6, %v3373_v19 }
 0x1ab   : > { %v441_v27 = vmul.f32 %v440_v23, %v436_v25  ;;  %821 = vmatprep.subr.bf16.mxu1 %v2736_v7  ;;  %v3406_v23 = vsub.s32 2, %v3373_v19 }
 0x1ad   : > { %v446_v28 = vadd.f32 %v445_v26, %v441_v27  ;;  %v572_v25 = vrot.slane %v3378_v21, %v3406_v23 }
 0x1ae   : > { %822 = vmatpush1.bf16.msra.mxu1 %v2741_v11 }
 0x1af   : > { %v463_v29 = vpack.c.bf16 %v446_v28, %v446_v28  ;;  %823 = vmatprep.subr.bf16.mxu1 %v2742_v12  ;;  %v577_v28 = vrot.slane %v3378_v21, %v3409_v24 }
 0x1b1   : > { %2560 = vmatmul.mubr.bf16.vlgmr.msra.gmra.mxu0 %v463_v29 }
 0x1b2   : > { %851 = vmatpush1.bf16.msra.mxu0 %v2702_v39  ;;  %882 = vmatprep.mubr.bf16.mxu0 %v3142_v9  ;;  %v2753_v39 = vld [vmem:[#allocation8 + $0x30] sm:$0xff]  }
 0x1b3   : > { %852 = vmatprep.subr.bf16.mxu0 %v2710_v43  ;;  %824 = vmatpush1.bf16.msra.mxu1 %v2747_v15  ;;  %v2757_v43 = vld [vmem:[#allocation8 + $0x28] sm:$0xff]  }
 0x1b6   : > { %853 = vmatpush1.bf16.msra.mxu0 %v2708_v44  ;;  %v2758_v44 = vld [vmem:[#allocation8 + $0xe8] sm:$0xff]  }
 0x1b7   : > { %854 = vmatprep.subr.bf16.mxu0 %v2716_v55  ;;  %v2768_v55 = vld [vmem:[#allocation8 + $0x50] sm:$0xff]  }
 0x1ba   : > { %855 = vmatpush1.bf16.msra.mxu0 %v2714_v56  ;;  %v2770_v56 = vld [vmem:[#allocation8 + $0xd0] sm:$0xff]  }
 0x1bb   : > { %856 = vmatprep.subr.bf16.mxu0 %v2722_v60  ;;  %v2774_v60 = vld [vmem:[#allocation8 + $0xc8] sm:$0xff]  }
 0x1be   : > { %857 = vmatpush1.bf16.msra.mxu0 %v2720_v59  ;;  %v2772_v59 = vld [vmem:[#allocation8 + $0x48] sm:$0xff]  }
 0x1bf   : > { %858 = vmatprep.subr.bf16.mxu0 %v2728_v63  ;;  %v2776_v63 = vld [vmem:[#allocation8 + $0x40] sm:$0xff]  }
 0x1c2   : > { %859 = vmatpush1.bf16.msra.mxu0 %v2726_v0  ;;  %v2778_v0 = vld [vmem:[#allocation8 + $0xc0] sm:$0xff]  }
 0x1c3   : > { %860 = vmatprep.subr.bf16.mxu0 %v2734_v4  ;;  %v3420_v4 = vld [vmem:[%s3537_s8] sm:$0xff] }
 0x1c4   : > { %v616_v7 = vrot.slane %v3420_v4, %v3376_v20  ;;  %v628_v11 = vrot.slane %v3420_v4, %v3426_v6 }
 0x1c6   : > { %861 = vmatpush1.bf16.msra.mxu0 %v2732_v5  ;;  %v3423_v5 = vsub.s32 4, %v3373_v19  ;;  %v636_v12 = vrot.slane %v616_v7, %v3376_v20  ;;  %v648_v15 = vrot.slane %v628_v11, %v3376_v20 }
 0x1c7   : > { %862 = vmatprep.subr.bf16.mxu0 %v2740_v8 }
 0x1c8   : > { %v624_v8 = vrot.slane %v3420_v4, %v3423_v5 }
 0x1ca   : > { %863 = vmatpush1.bf16.msra.mxu0 %v2738_v10  ;;  %v620_v10 = vrot.slane %v3420_v4, %v3406_v23 }
 0x1cb   : > { %864 = vmatprep.subr.bf16.mxu0 %v2746_v13  ;;  %v644_v13 = vrot.slane %v624_v8, %v3376_v20 }
 0x271   : > { %v546_v32 = vpop.f32.mrf.mxu0 }
 0x272   : > { %v552_v33 = vadd.f32 %v546_v32, %v423_v14  ;;  %v2744_v14 = vld [vmem:[#allocation7 + $0x8] ss:$16 sps:$4 sm:$0xff]  }
 0x273   : > { %v2561_v34 = vpop.f32.mrf.mxu0  ;;  %865 = vmatpush1.bf16.msra.mxu0 %v2744_v14  ;;  %v640_v14 = vrot.slane %v620_v10, %v3376_v20 }
 0x274   : > { %v3391_v35 = vadd.f32 %v556_v31, %v552_v33  ;;  %v2748_v33 = vld [vmem:[#allocation8 + $0x78] sm:$0xff]  }
 0x275   : > { %v549_v36 = vpop.f32.mrf.mxu0  ;;  %v2749_v34 = vld [vmem:[#allocation8 + $0x38] sm:$0xff]   ;;  %2446 = vmatprep.subr.bf16.mxu1 %v2748_v33 }
 0x276   : > { %558 = vadd.xlane.f32.xlu1 %v3391_v35  ;;  %v2750_v36 = vld [vmem:[#allocation8 + $0xf8] sm:$0xff]  }
 0x277   : > { %v2562_v37 = vpop.f32.mrf.mxu0  ;;  %2468 = vmatprep.subr.bf16.mxu0 %v2750_v36 }
 0x278   : > { %v2751_v37 = vld [vmem:[#allocation8 + $0xb8] sm:$0xff]  }
 0x2ff   : > { %v559_v48 = vpop.xlane.xlu1 %558 }
 0x300   : > { %v560_v49 = vmul.f32 0.0078125, %v559_v48  ;;  %v2762_v48 = vld [vmem:[#allocation8 + $0xe0] sm:$0xff]  }
 0x302   : > { %v3395_v50 = vsub.f32 %v3391_v35, %v560_v49  ;;  %v2763_v49 = vld [vmem:[#allocation8 + $0xa0] sm:$0xff]  }
 0x304   : > { %v562_v52 = vmul.f32 %v3395_v50, %v3395_v50 }
 0x306   : > { %563 = vadd.xlane.f32.xlu1 %v562_v52  ;;  %v2766_v52 = vld [vmem:[#allocation8 + $0xd8] sm:$0xff]  }
 0x30a   : > { %1278 = vadd.xlane.f32.xlu1 %v1277_v53  ;;  %v2765_v53 = vld [vmem:[#allocation8 + $0x18] sm:$0xff]  }
 0x38f   : > { %v564_v16 = vpop.xlane.xlu1 %563 }
 0x390   : > { %v565_v17 = vmul.f32 0.0078125, %v564_v16 }
 0x392   : > { %v566_v18 = vadd.f32 1e-05, %v565_v17 }
 0x394   : > { %2870 = vrsqrt.f32 %v566_v18 }
 0x3a1   : > { %v2871_v26 = vpop.eup %2870 }
 0x3a2   : > { %v568_v27 = vmul.f32 %v2871_v26, %v3395_v50  ;;  %v2764_v50 = vld [vmem:[#allocation8 + $0x58] sm:$0xff]  }
 0x3a4   : > { %v573_v29 = vmul.f32 %v572_v25, %v568_v27 }
 0x3a6   : > { %v578_v31 = vadd.f32 %v577_v28, %v573_v29 }
 0x3a8   : > { %v611_v32 = vpack.c.bf16 %v578_v31, %v578_v31 }
 0x3aa   : > { %842 = vmatmul.mubr.bf16.vlgmr.msra.gmra.mxu1 %v611_v32  ;;  %883 = vmatmul.mubr.bf16.vlgmr.msra.gmra.mxu0 %v611_v32 }
 0x3ab   : > { %2447 = vmatpush3.bf16.msra.mxu1 %v2749_v34  ;;  %2469 = vmatpush3.bf16.msra.mxu0 %v2751_v37 }
 0x3ac   : > { %2448 = vmatprep.subr.bf16.mxu1 %v2752_v38  ;;  %2470 = vmatprep.subr.bf16.mxu0 %v2754_v40 }
 0x3af   : > { %2449 = vmatpush3.bf16.msra.mxu1 %v2753_v39  ;;  %2471 = vmatpush3.bf16.msra.mxu0 %v2755_v41 }
 0x3b0   : > { %2450 = vmatprep.subr.bf16.mxu1 %v2756_v42  ;;  %2472 = vmatprep.subr.bf16.mxu0 %v2758_v44 }
 0x3b3   : > { %2451 = vmatpush3.bf16.msra.mxu1 %v2757_v43  ;;  %2473 = vmatpush3.bf16.msra.mxu0 %v2759_v45 }
 0x3b4   : > { %2452 = vmatprep.subr.bf16.mxu1 %v2760_v46  ;;  %2474 = vmatprep.subr.bf16.mxu0 %v2762_v48 }
 0x3b7   : > { %2453 = vmatpush3.bf16.msra.mxu1 %v2761_v47  ;;  %2475 = vmatpush3.bf16.msra.mxu0 %v2763_v49 }
 0x3b8   : > { %2454 = vmatprep.subr.bf16.mxu1 %v2764_v50  ;;  %2476 = vmatprep.subr.bf16.mxu0 %v2766_v52 }
 0x3bb   : > { %2455 = vmatpush3.bf16.msra.mxu1 %v2765_v53  ;;  %2477 = vmatpush3.bf16.msra.mxu0 %v2767_v54 }
 0x3bc   : > { %2456 = vmatprep.subr.bf16.mxu1 %v2768_v55  ;;  %2478 = vmatprep.subr.bf16.mxu0 %v2770_v56 }
 0x3bf   : > { %2457 = vmatpush3.bf16.msra.mxu1 %v2769_v57  ;;  %2479 = vmatpush3.bf16.msra.mxu0 %v2771_v58 }
 0x3c0   : > { %2458 = vmatprep.subr.bf16.mxu1 %v2772_v59  ;;  %2480 = vmatprep.subr.bf16.mxu0 %v2774_v60 }
 0x3c3   : > { %2459 = vmatpush3.bf16.msra.mxu1 %v2773_v61  ;;  %2481 = vmatpush3.bf16.msra.mxu0 %v2775_v62  ;;  %v1279_v62 = vpop.xlane.xlu1 %1278 }
 0x3c4   : > { %2460 = vmatprep.subr.bf16.mxu1 %v2776_v63  ;;  %2482 = vmatprep.subr.bf16.mxu0 %v2778_v0  ;;  %v1280_v8 = vmul.f32 0.0078125, %v1279_v62  ;;  %v2791_v62 = vld [vmem:[#allocation10 + $0xe8] ss:$16 sps:$4 sm:$0xff]  }
 0x3c7   : > { %2461 = vmatpush3.bf16.msra.mxu1 %v2777_v1  ;;  %2483 = vmatpush3.bf16.msra.mxu0 %v2779_v2 }
 0x3c8   : > { %2563 = vmatprep.subr.bf16.mxu1 %v3140_v3 }
 0x46a   : > { %v843_v16 = vpop.f32.mrf.mxu1  ;;  %v884_v17 = vpop.f32.mrf.mxu0 }
 0x46b   : > { %v844_v18 = vadd.f32 %v843_v16, %v636_v12  ;;  %v885_v25 = vadd.f32 %v884_v17, %v644_v13  ;;  %v2780_v16 = vld [vmem:[#allocation5 + $0x38] sm:$0xff]   ;;  %v1281_v17 = vadd.f32 1e-05, %v1280_v8 }
 0x46c   : > { %v845_v26 = vpop.f32.mrf.mxu1  ;;  %v886_v27 = vpop.f32.mrf.mxu0 }
 0x46d   : > { %v891_v28 = vmul.f32 %v844_v18, %v844_v18  ;;  %v893_v29 = vmul.f32 %v885_v25, %v885_v25  ;;  %v846_v31 = vadd.f32 %v845_v26, %v640_v14  ;;  %v887_v32 = vadd.f32 %v886_v27, %v648_v15 }
 0x46e   : > { %v847_v33 = vpop.f32.mrf.mxu1  ;;  %v888_v34 = vpop.f32.mrf.mxu0 }
 0x46f   : > { %v895_v36 = vmul.f32 %v891_v28, %v844_v18  ;;  %v897_v37 = vmul.f32 %v893_v29, %v885_v25  ;;  %v892_v38 = vmul.f32 %v846_v31, %v846_v31  ;;  %v894_v39 = vmul.f32 %v887_v32, %v887_v32  ;;  %v2781_v29 = vld [vmem:[#allocation5 + $0x30] sm:$0xff]  }
 0x470   : > { %v848_v40 = vpop.f32.mrf.mxu1  ;;  %v889_v41 = vpop.f32.mrf.mxu0  ;;  %v2785_v33 = vld [vmem:[#allocation5 + $0x10] sm:$0xff]  }
 0x471   : > { %v899_v42 = vmul.f32 0.044715, %v895_v36  ;;  %v901_v20 = vmul.f32 0.044715, %v897_v37  ;;  %v896_v43 = vmul.f32 %v892_v38, %v846_v31  ;;  %v898_v44 = vmul.f32 %v894_v39, %v887_v32  ;;  %v2786_v38 = vld [vmem:[#allocation5 + $0x8] sm:$0xff]   ;;  %v2787_v41 = vld [vmem:[#allocation5] sm:$0xff]  }
 0x472   : > { %v1287_v36 = vrot.slane %v3378_v21, %v3423_v5  ;;  %v3452_v37 = vsub.s32 5, %v3373_v19 }
 0x473   : > { %v903_v45 = vadd.f32 %v899_v42, %v844_v18  ;;  %v905_v46 = vadd.f32 %v901_v20, %v885_v25  ;;  %v900_v47 = vmul.f32 0.044715, %v896_v43  ;;  %v902_v48 = vmul.f32 0.044715, %v898_v44 }
 0x474   : > { %v1292_v40 = vrot.slane %v3378_v21, %v3452_v37 }
 0x475   : > { %v907_v49 = vmul.f32 0.7978846, %v903_v45  ;;  %v909_v50 = vmul.f32 0.7978846, %v905_v46  ;;  %v904_v52 = vadd.f32 %v900_v47, %v846_v31  ;;  %v906_v53 = vadd.f32 %v902_v48, %v887_v32 }
 0x477   : > { %2872 = vtanh.f32 %v907_v49  ;;  %v908_v54 = vmul.f32 0.7978846, %v904_v52  ;;  %v910_v55 = vmul.f32 0.7978846, %v906_v53 }
 0x478   : > { %2874 = vtanh.f32 %v909_v50 }
 0x479   : > { %2876 = vtanh.f32 %v908_v54 }
 0x47a   : > { %2878 = vtanh.f32 %v910_v55  ;;  %v2892_v55 = vld [vmem:[%s3335_s23 + $0x8] sm:$0xff]  ;;  %s411_s23 = sand.u32 1, %s3118_s10  }
 0x47b   : > { %2880 = vrsqrt.f32 %v1281_v17  ;;  %v2808_v17 = vld [vmem:[#allocation10 + $0x84] ss:$16 sps:$4 sm:$0xff]   ;;  %s2285_s1 = sshll.u32 %s411_s23, 3  ;;  %s2137_s17 = scalar_lea.sflag [#allocation4], %s411_s23 }
 0x47c   : > { %s413_s22 = scalar_lea.vmem [#allocation13], %s2285_s1 }
 0x47d   : > { %s2150_s18 = sshll.u32 %s413_s22, 4  ;;  %s2151_s18 = int_to_ptr.vmem [resolvable:$true] %s2150_s18 }
 0x47e   : > { %s3050_s25 = scalar_lea.vmem %s2151_s18, 128  ;;  %p3057_p4 = scmp.lt.s32.totalorder %s2151_s18, %s3055_s16 }
 0x47f   : > { %p3051_p0 = scmp.ne.s32.totalorder %s2151_s18, %s3050_s25  ;;  %p3058_p13 = scmp.lt.s32.totalorder %s3056_s13, %s3050_s25 }
 0x481   : > { %p3052_p1 = pnand %p3051_p0, %p3563_p3  ;;  %p3059_p7 = por %p3058_p13, %p3057_p4 }
 0x483   : > { %p3053_p2 = pneg %p3052_p1 }
 0x484   : > { %v2873_v56 = vpop.eup %2872 }
 0x485   : > { %v2875_v57 = vpop.eup %2874  ;;  %v915_v58 = vadd.f32 1.0, %v2873_v56  ;;  %p3060_p5 = pnand %p3059_p7, %p3053_p2 }
 0x486   : > { %v2877_v59 = vpop.eup %2876  ;;  %v917_v60 = vadd.f32 1.0, %v2875_v57 }
 0x487   : > { %v2879_v61 = vpop.eup %2878  ;;  %v916_v63 = vadd.f32 1.0, %v2877_v59  ;;  %v919_v0 = vmul.f32 0.5, %v915_v58 }
 0x488   : > { %v918_v1 = vadd.f32 1.0, %v2879_v61  ;;  %v921_v2 = vmul.f32 0.5, %v917_v60  ;;  %v2788_v60 = vld [vmem:[#allocation10 + $0xe0] ss:$16 sps:$4 sm:$0xff]   ;;  %v2790_v61 = vld [vmem:[#allocation10 + $0xe4] ss:$16 sps:$4 sm:$0xff]  }
 0x489   : > { %v920_v7 = vmul.f32 0.5, %v916_v63  ;;  %v923_v11 = vmul.f32 %v919_v0, %v844_v18  ;;  %v2782_v18 = vld [vmem:[#allocation5 + $0x28] sm:$0xff]   ;;  %v2796_v0 = vld [vmem:[#allocation10 + $0xc4] ss:$16 sps:$4 sm:$0xff]   ;;  %1655 = vmatprep.subr.bf16.mxu0 %v2790_v61 }
 0x48a   : > { %v922_v10 = vmul.f32 0.5, %v918_v1  ;;  %v925_v13 = vmul.f32 %v921_v2, %v885_v25  ;;  %v2783_v25 = vld [vmem:[#allocation5 + $0x20] sm:$0xff]   ;;  %v2793_v63 = vld [vmem:[#allocation10 + $0xec] ss:$16 sps:$4 sm:$0xff]   ;;  %v2797_v2 = vld [vmem:[#allocation10 + $0xc8] ss:$16 sps:$4 sm:$0xff]  }
 0x48b   : > { %v924_v12 = vmul.f32 %v920_v7, %v846_v31  ;;  %v991_v27 = vpack.c.bf16 %v923_v11, %v923_v11  ;;  %v2784_v31 = vld [vmem:[#allocation5 + $0x18] sm:$0xff]   ;;  %v2842_v61 = vld [vmem:[#allocation11 + $0x30] sm:$0xff]  }
 0x48c   : > { %v926_v14 = vmul.f32 %v922_v10, %v887_v32  ;;  %v993_v28 = vpack.c.bf16 %v925_v13, %v925_v13  ;;  %v2881_v32 = vpop.eup %2880  ;;  %v2799_v1 = vld [vmem:[#allocation10 + $0xcc] ss:$16 sps:$4 sm:$0xff]  }
 0x48d   : > { %v992_v15 = vpack.c.bf16 %v924_v12, %v924_v12  ;;  %v1283_v34 = vmul.f32 %v2881_v32, %v3397_v51  ;;  %v2802_v12 = vld [vmem:[#allocation10 + $0xa4] ss:$16 sps:$4 sm:$0xff]   ;;  %v2805_v13 = vld [vmem:[#allocation10 + $0xac] ss:$16 sps:$4 sm:$0xff]  }
 0x48e   : > { %v994_v26 = vpack.c.bf16 %v926_v14, %v926_v14  ;;  %v2800_v14 = vld [vmem:[#allocation10 + $0xa0] ss:$16 sps:$4 sm:$0xff]   ;;  %v2823_v32 = vld [vmem:[#allocation10 + $0x4c] ss:$16 sps:$4 sm:$0xff]  }
 0x48f   : > { %1219 = vmatprep.mubr.bf16.mxu1 %v992_v15  ;;  %v1288_v39 = vmul.f32 %v1287_v36, %v1283_v34  ;;  %v2803_v15 = vld [vmem:[#allocation10 + $0xa8] ss:$16 sps:$4 sm:$0xff]   ;;  %v2826_v36 = vld [vmem:[#allocation10 + $0x24] ss:$16 sps:$4 sm:$0xff]  }
 0x490   : > { %1259 = vmatprep.mubr.bf16.mxu0 %v994_v26  ;;  %1220 = vmatmul.mubr.bf16.vlgmr.msra.gmra.mxu1 %v991_v27  ;;  %v2809_v26 = vld [vmem:[#allocation10 + $0x88] ss:$16 sps:$4 sm:$0xff]   ;;  %v2811_v27 = vld [vmem:[#allocation10 + $0x8c] ss:$16 sps:$4 sm:$0xff]  }
 0x491   : > { %1260 = vmatmul.mubr.bf16.vlgmr.msra.gmra.mxu0 %v993_v28  ;;  %2564 = vmatpush3.bf16.msra.mxu1 %v2780_v16  ;;  %v1293_v42 = vadd.f32 %v1292_v40, %v1288_v39  ;;  %v2806_v16 = vld [vmem:[#allocation10 + $0x80] ss:$16 sps:$4 sm:$0xff]   ;;  %v2814_v28 = vld [vmem:[#allocation10 + $0x64] ss:$16 sps:$4 sm:$0xff]   ;;  %v2821_v34 = vld [vmem:[#allocation10 + $0x48] ss:$16 sps:$4 sm:$0xff]  }
 0x492   : > { %2565 = vmatprep.subr.bf16.mxu1 %v3140_v3  ;;  %2579 = vmatprep.mubr.msk.bf16.mxu1 %vm3141_vm0, %v3140_v3  ;;  %v2824_v39 = vld [vmem:[#allocation10 + $0x20] ss:$16 sps:$4 sm:$0xff]   ;;  %v2827_v40 = vld [vmem:[#allocation10 + $0x28] ss:$16 sps:$4 sm:$0xff]  }
 0x493   : > { %1687 = vmatprep.mubr.bf16.mxu0 %v3142_v9  ;;  %v1310_v51 = vpack.c.bf16 %v1293_v42, %v1293_v42  ;;  %1656 = vmatpush1.bf16.msra.mxu0 %v2788_v60  ;;  %v2835_v42 = vld [vmem:[#allocation10 + $0xc] ss:$16 sps:$4 sm:$0xff]   ;;  %v2841_v60 = vld [vmem:[#allocation11 + $0xf0] sm:$0xff]  }
 0x494   : > { %1657 = vmatprep.subr.bf16.mxu0 %v2796_v0  ;;  %v2846_v0 = vld [vmem:[#allocation11 + $0x28] sm:$0xff]  }
 0x495   : > { %2566 = vmatpush3.bf16.msra.mxu1 %v2781_v29  ;;  %v2817_v29 = vld [vmem:[#allocation10 + $0x6c] ss:$16 sps:$4 sm:$0xff]  }
 0x496   : > { %2567 = vmatprep.subr.bf16.mxu1 %v3140_v3 }
 0x499   : > { %2568 = vmatpush3.bf16.msra.mxu1 %v2782_v18  ;;  %v2812_v18 = vld [vmem:[#allocation10 + $0x60] ss:$16 sps:$4 sm:$0xff]  }
 0x49a   : > { %2569 = vmatprep.subr.bf16.mxu1 %v3140_v3 }
 0x49d   : > { %2570 = vmatpush3.bf16.msra.mxu1 %v2783_v25  ;;  %v2815_v25 = vld [vmem:[#allocation10 + $0x68] ss:$16 sps:$4 sm:$0xff]  }
 0x49e   : > { %2571 = vmatprep.subr.bf16.mxu1 %v3140_v3 }
 0x4a1   : > { %2572 = vmatpush3.bf16.msra.mxu1 %v2784_v31  ;;  %v2820_v31 = vld [vmem:[#allocation10 + $0x44] ss:$16 sps:$4 sm:$0xff]  }
 0x4a2   : > { %2573 = vmatprep.subr.bf16.mxu1 %v3140_v3 }
 0x4a5   : > { %2574 = vmatpush3.bf16.msra.mxu1 %v2785_v33  ;;  %v2818_v33 = vld [vmem:[#allocation10 + $0x40] ss:$16 sps:$4 sm:$0xff]  }
 0x4a6   : > { %2575 = vmatprep.subr.bf16.mxu1 %v3140_v3 }
 0x4a9   : > { %2576 = vmatpush3.bf16.msra.mxu1 %v2786_v38  ;;  %v2829_v38 = vld [vmem:[#allocation10 + $0x2c] ss:$16 sps:$4 sm:$0xff]  }
 0x4aa   : > { %2577 = vmatprep.subr.bf16.mxu1 %v3140_v3  ;;  %v1403_v3 = vrot.slane %v3387_v30, %v3381_v22  ;;  %v2794_v30 = vld [vmem:[#allocation10 + $0xc0] ss:$16 sps:$4 sm:$0xff]  }
 0x4ab   : > { %1658 = vmatpush1.bf16.msra.mxu0 %v2794_v30  ;;  %v2848_v30 = vld [vmem:[#allocation11 + $0x60] sm:$0xff]  }
 0x4ac   : > { %1659 = vmatprep.subr.bf16.mxu0 %v2802_v12  ;;  %v2854_v12 = vld [vmem:[#allocation11 + $0x18] sm:$0xff]  }
 0x4ad   : > { %2578 = vmatpush3.bf16.msra.mxu1 %v2787_v41  ;;  %v2832_v41 = vld [vmem:[#allocation10 + $0x4] ss:$16 sps:$4 sm:$0xff]  }
 0x4ae   : > { %1696 = vmatprep.subr.bf16.mxu1 %v2793_v63  ;;  %v2845_v63 = vld [vmem:[#allocation11 + $0xe8] sm:$0xff]  }
 0x4af   : > { %1660 = vmatpush1.bf16.msra.mxu0 %v2800_v14  ;;  %v2856_v14 = vld [vmem:[#allocation11 + $0x50] sm:$0xff]  }
 0x4b0   : > { %2580 = vmatmul.mubr.bf16.vlgmr.msra.gmra.mxu1 %v1310_v51  ;;  %1661 = vmatprep.subr.bf16.mxu0 %v2808_v17  ;;  %v2830_v51 = vld [vmem:[#allocation10] ss:$16 sps:$4 sm:$0xff]  }
 0x4b1   : > { %1728 = vmatprep.mubr.bf16.mxu1 %v3142_v9  ;;  %1697 = vmatpush1.bf16.msra.mxu1 %v2791_v62  ;;  %v2843_v62 = vld [vmem:[#allocation11 + $0xb0] sm:$0xff]  }
 0x4b2   : > { %1698 = vmatprep.subr.bf16.mxu1 %v2799_v1  ;;  %v2847_v1 = vld [vmem:[#allocation11 + $0xa8] sm:$0xff]   ;;  %v2859_v17 = vld [vmem:[#allocation11 + $0x90] sm:$0xff]  }
 0x4b3   : > { %1662 = vmatpush1.bf16.msra.mxu0 %v2806_v16  ;;  %v2858_v16 = vld [vmem:[#allocation11 + $0x10] sm:$0xff]  }
 0x4b4   : > { %1663 = vmatprep.subr.bf16.mxu0 %v2814_v28  ;;  %v2862_v28 = vld [vmem:[#allocation11 + $0x8] sm:$0xff]  }
 0x4b5   : > { %1699 = vmatpush1.bf16.msra.mxu1 %v2797_v2  ;;  %v2849_v2 = vld [vmem:[#allocation11 + $0xe0] sm:$0xff]  }
 0x4b6   : > { %1700 = vmatprep.subr.bf16.mxu1 %v2805_v13  ;;  %v2855_v13 = vld [vmem:[#allocation11 + $0x98] sm:$0xff]  }
 0x4b7   : > { %1664 = vmatpush1.bf16.msra.mxu0 %v2812_v18  ;;  %v2864_v18 = vld [vmem:[#allocation11 + $0x40] sm:$0xff]  }
 0x4b8   : > { %1665 = vmatprep.subr.bf16.mxu0 %v2820_v31  ;;  %v2866_v31 = vld [vmem:[#allocation11] sm:$0xff]  }
 0x4b9   : > { %1701 = vmatpush1.bf16.msra.mxu1 %v2803_v15  ;;  %v2857_v15 = vld [vmem:[#allocation11 + $0xd0] sm:$0xff]  }
 0x4ba   : > { %1702 = vmatprep.subr.bf16.mxu1 %v2811_v27  ;;  %v2861_v27 = vld [vmem:[#allocation11 + $0xc8] sm:$0xff]  }
 0x4bb   : > { %1666 = vmatpush1.bf16.msra.mxu0 %v2818_v33  ;;  %v1462_v33 = vrot.slane %v3420_v4, %v3381_v22 }
 0x4bc   : > { %1667 = vmatprep.subr.bf16.mxu0 %v2826_v36  ;;  %v1466_v36 = vrot.slane %v3420_v4, %v3409_v24 }
 0x4bd   : > { %1703 = vmatpush1.bf16.msra.mxu1 %v2809_v26  ;;  %v2860_v26 = vld [vmem:[#allocation11 + $0x48] sm:$0xff]  }
 0x4be   : > { %1704 = vmatprep.subr.bf16.mxu1 %v2817_v29  ;;  %v2863_v29 = vld [vmem:[#allocation11 + $0x88] sm:$0xff]  }
 0x4bf   : > { %1668 = vmatpush1.bf16.msra.mxu0 %v2824_v39  ;;  %v1482_v39 = vrot.slane %v1462_v33, %v3381_v22 }
 0x4c0   : > { %1669 = vmatprep.subr.bf16.mxu0 %v2832_v41  ;;  %v1486_v41 = vrot.slane %v1466_v36, %v3381_v22 }
 0x4c1   : > { %1705 = vmatpush1.bf16.msra.mxu1 %v2815_v25  ;;  %v2865_v25 = vld [vmem:[#allocation11 + $0xc0] sm:$0xff]  }
 0x4c2   : > { %1706 = vmatprep.subr.bf16.mxu1 %v2823_v32  ;;  %v2867_v32 = vld [vmem:[#allocation11 + $0x80] sm:$0xff]  }
 0x4c3   : > { %1670 = vmatpush1.bf16.msra.mxu0 %v2830_v51 }
 0x4c5   : > { %1707 = vmatpush1.bf16.msra.mxu1 %v2821_v34  ;;  %v1470_v34 = vrot.slane %v3420_v4, %v3452_v37 }
 0x4c6   : > { %1708 = vmatprep.subr.bf16.mxu1 %v2829_v38 }
 0x4c9   : > { %1709 = vmatpush1.bf16.msra.mxu1 %v2827_v40  ;;  %v1490_v40 = vrot.slane %v1470_v34, %v3381_v22 }
 0x4ca   : > { %1710 = vmatprep.subr.bf16.mxu1 %v2835_v42 }
 0x550   : > { %v2462_v20 = vpop.f32.mrf.mxu1 }
 0x551   : > { %v2484_v43 = vpop.f32.mrf.mxu0 }
 0x552   : > { %v2463_v44 = vpop.f32.mrf.mxu1 }
 0x553   : > { %v2464_v45 = vadd.f32 %v2463_v44, %v2462_v20  ;;  %v2485_v46 = vpop.f32.mrf.mxu0  ;;  %v2833_v20 = vld [vmem:[#allocation10 + $0x8] ss:$16 sps:$4 sm:$0xff]  }
 0x554   : > { %v2486_v47 = vadd.f32 %v2485_v46, %v2484_v43  ;;  %v2465_v48 = vpop.f32.mrf.mxu1  ;;  %1711 = vmatpush1.bf16.msra.mxu1 %v2833_v20  ;;  %v1423_v46 = vsub.s32 7, %v3373_v19 }
 0x555   : > { %v2487_v49 = vpop.f32.mrf.mxu0 }
 0x556   : > { %v3459_v50 = vadd.f32 %v2486_v47, %v2464_v45  ;;  %v2466_v52 = vpop.f32.mrf.mxu1  ;;  %v1419_v47 = vrot.slane %v3378_v21, %v3426_v6  ;;  %v1474_v38 = vrot.slane %v3420_v4, %v1423_v46 }
 0x557   : > { %v2488_v53 = vpop.f32.mrf.mxu0  ;;  %v1424_v52 = vrot.slane %v3378_v21, %v1423_v46  ;;  %v2844_v21 = vld [vmem:[#allocation11 + $0x68] sm:$0xff]  }
 0x558   : > { %v1494_v42 = vrot.slane %v1474_v38, %v3381_v22 }
 0x570   : > { %v1393_v54 = vpop.f32.mrf.mxu1 }
 0x571   : > { %v1399_v56 = vadd.f32 %v2892_v55, %v1393_v54  ;;  %v2836_v55 = vld [vmem:[#allocation11 + $0x78] sm:$0xff]  }
 0x572   : > { %v2581_v57 = vpop.f32.mrf.mxu1  ;;  %2499 = vmatprep.subr.bf16.mxu0 %v2836_v55 }
 0x573   : > { %v3464_v9 = vadd.f32 %v1403_v3, %v1399_v56  ;;  %v2837_v56 = vld [vmem:[#allocation11 + $0xf8] sm:$0xff]  }
 0x574   : > { %v1396_v58 = vpop.f32.mrf.mxu1  ;;  %v2838_v57 = vld [vmem:[#allocation11 + $0x38] sm:$0xff]   ;;  %2521 = vmatprep.subr.bf16.mxu1 %v2837_v56 }
 0x575   : > { %1405 = vadd.xlane.f32.xlu0 %v3464_v9  ;;  %v2839_v58 = vld [vmem:[#allocation11 + $0xb8] sm:$0xff]  }
 0x576   : > { %v2582_v59 = vpop.f32.mrf.mxu1 }
 0x577   : > { %v2840_v59 = vld [vmem:[#allocation11 + $0x70] sm:$0xff]  }
 0x5fe   : > { %v1406_v7 = vpop.xlane.xlu0 %1405 }
 0x5ff   : > { %v1407_v8 = vmul.f32 0.0078125, %v1406_v7  ;;  %v2850_v7 = vld [vmem:[#allocation11 + $0x20] sm:$0xff]  }
 0x601   : > { %v1408_v10 = vsub.f32 %v3464_v9, %v1407_v8  ;;  %v2851_v8 = vld [vmem:[#allocation11 + $0xa0] sm:$0xff]  }
 0x603   : > { %v1409_v11 = vmul.f32 %v1408_v10, %v1408_v10 }
 0x605   : > { %1410 = vadd.xlane.f32.xlu1 %v1409_v11  ;;  %v2853_v11 = vld [vmem:[#allocation11 + $0xd8] sm:$0xff]  }
 0x68e   : > { %v1411_v43 = vpop.xlane.xlu1 %1410 }
 0x68f   : > { %v1412_v44 = vmul.f32 0.0078125, %v1411_v43 }
 0x691   : > { %v1413_v45 = vadd.f32 1e-05, %v1412_v44 }
 0x693   : > { %2882 = vrsqrt.f32 %v1413_v45 }
 0x6a0   : > { %v2883_v48 = vpop.eup %2882 }
 0x6a1   : > { %v1415_v49 = vmul.f32 %v2883_v48, %v1408_v10  ;;  %v2852_v10 = vld [vmem:[#allocation11 + $0x58] sm:$0xff]  }
 0x6a3   : > { %v1420_v53 = vmul.f32 %v1419_v47, %v1415_v49 }
 0x6a5   : > { %v1425_v3 = vadd.f32 %v1424_v52, %v1420_v53 }
 0x6a7   : > { %v1458_v54 = vpack.c.bf16 %v1425_v3, %v1425_v3 }
 0x6a9   : > { %1688 = vmatmul.mubr.bf16.vlgmr.msra.gmra.mxu0 %v1458_v54  ;;  %1729 = vmatmul.mubr.bf16.vlgmr.msra.gmra.mxu1 %v1458_v54 }
 0x6aa   : > { %2500 = vmatpush3.bf16.msra.mxu0 %v2838_v57  ;;  %2522 = vmatpush3.bf16.msra.mxu1 %v2839_v58 }
 0x6ab   : > { %2501 = vmatprep.subr.bf16.mxu0 %v2840_v59  ;;  %2523 = vmatprep.subr.bf16.mxu1 %v2841_v60 }
 0x6ae   : > { %2502 = vmatpush3.bf16.msra.mxu0 %v2842_v61  ;;  %2524 = vmatpush3.bf16.msra.mxu1 %v2843_v62 }
 0x6af   : > { %2503 = vmatprep.subr.bf16.mxu0 %v2844_v21  ;;  %2525 = vmatprep.subr.bf16.mxu1 %v2845_v63 }
 0x6b2   : > { %2504 = vmatpush3.bf16.msra.mxu0 %v2846_v0  ;;  %2526 = vmatpush3.bf16.msra.mxu1 %v2847_v1 }
 0x6b3   : > { %2505 = vmatprep.subr.bf16.mxu0 %v2848_v30  ;;  %2527 = vmatprep.subr.bf16.mxu1 %v2849_v2 }
 0x6b6   : > { %2506 = vmatpush3.bf16.msra.mxu0 %v2850_v7  ;;  %2528 = vmatpush3.bf16.msra.mxu1 %v2851_v8 }
 0x6b7   : > { %2507 = vmatprep.subr.bf16.mxu0 %v2852_v10  ;;  %2529 = vmatprep.subr.bf16.mxu1 %v2853_v11 }
 0x6ba   : > { %2508 = vmatpush3.bf16.msra.mxu0 %v2854_v12  ;;  %2530 = vmatpush3.bf16.msra.mxu1 %v2855_v13 }
 0x6bb   : > { %2509 = vmatprep.subr.bf16.mxu0 %v2856_v14  ;;  %2531 = vmatprep.subr.bf16.mxu1 %v2857_v15 }
 0x6be   : > { %2510 = vmatpush3.bf16.msra.mxu0 %v2858_v16  ;;  %2532 = vmatpush3.bf16.msra.mxu1 %v2859_v17 }
 0x6bf   : > { %2511 = vmatprep.subr.bf16.mxu0 %v2860_v26  ;;  %2533 = vmatprep.subr.bf16.mxu1 %v2861_v27 }
 0x6c2   : > { %2512 = vmatpush3.bf16.msra.mxu0 %v2862_v28  ;;  %2534 = vmatpush3.bf16.msra.mxu1 %v2863_v29 }
 0x6c3   : > { %2513 = vmatprep.subr.bf16.mxu0 %v2864_v18  ;;  %2535 = vmatprep.subr.bf16.mxu1 %v2865_v25 }
 0x6c6   : > { %2514 = vmatpush3.bf16.msra.mxu0 %v2866_v31  ;;  %2536 = vmatpush3.bf16.msra.mxu1 %v2867_v32 }
 0x769   : > { %v1689_v51 = vpop.f32.mrf.mxu0  ;;  %v1730_v20 = vpop.f32.mrf.mxu1 }
 0x76a   : > { %v1690_v43 = vadd.f32 %v1689_v51, %v1482_v39  ;;  %v1731_v44 = vadd.f32 %v1730_v20, %v1490_v40  ;;  %v1267_v20 = vadd.f32 %v3459_v50, %v3391_v35 }
 0x76b   : > { %v1691_v45 = vpop.f32.mrf.mxu0  ;;  %v1732_v47 = vpop.f32.mrf.mxu1 }
 0x76c   : > { %v1737_v48 = vmul.f32 %v1690_v43, %v1690_v43  ;;  %v1739_v49 = vmul.f32 %v1731_v44, %v1731_v44  ;;  %v1692_v52 = vadd.f32 %v1691_v45, %v1486_v41  ;;  %v1733_v19 = vadd.f32 %v1732_v47, %v1494_v42 }
 0x76d   : > { %v1693_v53 = vpop.f32.mrf.mxu0  ;;  %v1734_v4 = vpop.f32.mrf.mxu1 }
 0x76e   : > { %v1741_v46 = vmul.f32 %v1737_v48, %v1690_v43  ;;  %v1743_v3 = vmul.f32 %v1739_v49, %v1731_v44  ;;  %v1738_v54 = vmul.f32 %v1692_v52, %v1692_v52  ;;  %v1740_v55 = vmul.f32 %v1733_v19, %v1733_v19 }
 0x76f   : > { %v1694_v56 = vpop.f32.mrf.mxu0  ;;  %v1735_v57 = vpop.f32.mrf.mxu1 }
 0x770   : > { %v1745_v58 = vmul.f32 0.044715, %v1741_v46  ;;  %v1747_v22 = vmul.f32 0.044715, %v1743_v3  ;;  %v1742_v59 = vmul.f32 %v1738_v54, %v1692_v52  ;;  %v1744_v60 = vmul.f32 %v1740_v55, %v1733_v19 }
 0x772   : > { %v1749_v61 = vadd.f32 %v1745_v58, %v1690_v43  ;;  %v1751_v62 = vadd.f32 %v1747_v22, %v1731_v44  ;;  %v1746_v21 = vmul.f32 0.044715, %v1742_v59  ;;  %v1748_v63 = vmul.f32 0.044715, %v1744_v60 }
 0x774   : > { %v1753_v0 = vmul.f32 0.7978846, %v1749_v61  ;;  %v1755_v1 = vmul.f32 0.7978846, %v1751_v62  ;;  %v1750_v30 = vadd.f32 %v1746_v21, %v1692_v52  ;;  %v1752_v2 = vadd.f32 %v1748_v63, %v1733_v19 }
 0x776   : > { %2884 = vtanh.f32 %v1753_v0  ;;  %v1754_v7 = vmul.f32 0.7978846, %v1750_v30  ;;  %v1756_v8 = vmul.f32 0.7978846, %v1752_v2 }
 0x777   : > { %2886 = vtanh.f32 %v1755_v1 }
 0x778   : > { %2888 = vtanh.f32 %v1754_v7 }
 0x779   : > { %2890 = vtanh.f32 %v1756_v8 }
 0x783   : > { %v2885_v10 = vpop.eup %2884 }
 0x784   : > { %v2887_v11 = vpop.eup %2886  ;;  %v1761_v12 = vadd.f32 1.0, %v2885_v10 }
 0x785   : > { %v2889_v13 = vpop.eup %2888  ;;  %v1763_v14 = vadd.f32 1.0, %v2887_v11 }
 0x786   : > { %v2891_v15 = vpop.eup %2890  ;;  %v1762_v16 = vadd.f32 1.0, %v2889_v13  ;;  %v1765_v17 = vmul.f32 0.5, %v1761_v12 }
 0x787   : > { %v1764_v26 = vadd.f32 1.0, %v2891_v15  ;;  %v1767_v27 = vmul.f32 0.5, %v1763_v14 }
 0x788   : > { %v1766_v28 = vmul.f32 0.5, %v1762_v16  ;;  %v1769_v18 = vmul.f32 %v1765_v17, %v1690_v43  ;;  %v2893_v43 = vld [vmem:[#allocation2 + $0x8] sm:$0xff] }
 0x789   : > { %v1768_v29 = vmul.f32 0.5, %v1764_v26  ;;  %v1771_v31 = vmul.f32 %v1767_v27, %v1731_v44  ;;  %v1271_v44 = vrot.slane %v2893_v43, %v3406_v23  ;;  %v2122_v46 = vrot.slane %v2893_v43, %v3423_v5 }
 0x78a   : > { %v1770_v25 = vmul.f32 %v1766_v28, %v1692_v52  ;;  %v1837_v36 = vpack.c.bf16 %v1769_v18, %v1769_v18  ;;  %v2117_v52 = vrot.slane %v2893_v43, %v3409_v24  ;;  %v2127_v35 = vrot.slane %v2893_v43, %v3452_v37 }
 0x78b   : > { %v1772_v32 = vmul.f32 %v1768_v29, %v1733_v19  ;;  %v1839_v38 = vpack.c.bf16 %v1771_v31, %v1771_v31  ;;  %v1272_v4 = vadd.f32 %v1271_v44, %v1267_v20  ;;  %v2133_v55 = vrot.slane %v2893_v43, %v3426_v6 }
 0x78c   : > { %v1838_v33 = vpack.c.bf16 %v1770_v25, %v1770_v25 }
 0x78d   : > { %v1840_v34 = vpack.c.bf16 %v1772_v32, %v1772_v32  ;;  %v2123_v50 = vmul.f32 %v2122_v46, %v1272_v4 }
 0x78e   : > { %2065 = vmatprep.mubr.bf16.mxu0 %v1838_v33 }
 0x78f   : > { %2105 = vmatprep.mubr.bf16.mxu1 %v1840_v34  ;;  %2066 = vmatmul.mubr.bf16.vlgmr.msra.gmra.mxu0 %v1837_v36 }
 0x790   : > { %2106 = vmatmul.mubr.bf16.vlgmr.msra.gmra.mxu1 %v1839_v38 }
 0x84f   : > { %v2515_v39 = vpop.f32.mrf.mxu0 }
 0x850   : > { %v2537_v40 = vpop.f32.mrf.mxu1 }
 0x851   : > { %v2516_v41 = vpop.f32.mrf.mxu0 }
 0x852   : > { %v2517_v42 = vadd.f32 %v2516_v41, %v2515_v39  ;;  %v2538_v51 = vpop.f32.mrf.mxu1 }
 0x853   : > { %v2539_v45 = vadd.f32 %v2538_v51, %v2537_v40  ;;  %v2518_v47 = vpop.f32.mrf.mxu0 }
 0x854   : > { %v2540_v48 = vpop.f32.mrf.mxu1 }
 0x855   : > { %v2108_v49 = vadd.f32 %v2539_v45, %v2517_v42  ;;  %v2519_v19 = vpop.f32.mrf.mxu0 }
 0x856   : > { %v2541_v53 = vpop.f32.mrf.mxu1 }
 0x857   : > { %v2113_v3 = vadd.f32 %v2108_v49, %v3464_v9 }
 0x859   : > { %v2118_v23 = vadd.f32 %v2117_v52, %v2113_v3 }
 0x85b   : > { %v2128_v54 = vmul.f32 %v2127_v35, %v2118_v23 }
 0x85d   : > { %v2129_v24 = vadd.f32 %v2128_v54, %v2123_v50 }
 0x85f   : > { %v2134_v56 = vadd.f32 %v2133_v55, %v2129_v24 }
 0x861   : > { %2135 = vst [vmem:[%s413_s22] sm:$0xff] %v2134_v56 }
 0x862   : > { %3063 = shalt.err (!%p3060_p5)
}
 0x863   : > { %s3064_s14 = scalar_lea.hbm %s2148_s29, 128  ;;  %s3068_s1 = scalar_lea.hbm %s3538_s9, 256 }
 0x864   : > { %p3065_p6 = scmp.ne.s32.totalorder %s2148_s29, %s3064_s14  ;;  %p3069_p8 = scmp.lt.s32.totalorder %s2148_s29, %s3538_s9 }
 0x865   : > { %p3070_p9 = scmp.lt.s32.totalorder %s3068_s1, %s3064_s14 }
 0x866   : > { %p3066_p10 = pnand %p3065_p6, %p3563_p3 }
 0x867   : > { %p3071_p11 = por %p3070_p9, %p3069_p8 }
 0x868   : > { %p3067_p12 = pneg %p3066_p10 }
 0x86a   : > { %p3072_p0 = pnand %p3071_p11, %p3067_p12 }
 0x86c   : > { %3075 = shalt.err (!%p3072_p0)
}
 0x86d   : > { %2607 = dma.vmem_to_hbm [thread:$0]  (%p3563_p3), %s2151_s18, 128, %s2148_s29, %s2137_s17  }
 0x86e PF: > { %p2644_p1 = scmp.ge.s32.totalorder %s3126_s12, 2  ;;  %s2162_s21 = sand.u32 1, %s3114_s30  }
 0x86f   : > { %p3564_p2 = scmp.ne.s32.totalorder %s3547_s20, 0  ;;  %s2163_s24 = scalar_lea.sflag [#allocation4], %s2162_s21 }
 0x871   : > { %p2629_p4 = pnand %p2644_p1, %p3564_p2 }
 0x873   : > { %p2630_p13 = pneg %p2629_p4 }
 0x875   : > { %3109 = dma.done.wait (%p2630_p13), %s2163_s24, 128  }
 0x876   : > { %3111 = vsyncadd (%p2630_p13), %s2163_s24, 4294967168  ;;  %s3565_s25 = sld [smem:[#allocation19_spill]]  ;;  %p23_p7 = scmp.ge.s32.totalorder %s3219_s15, 4  }
 0x877   : > { %s3566_s30 = smov %s3118_s10  ;;  %s3567_s10 = smov %s3122_s11 }
 0x878   : > { %s3569_s12 = smov %s3219_s15  ;;  %25 = sbr.rel (!%p23_p7) target bundleno = 9 (0x9), region = 116 }
 0x87c   : > { %s3568_s11 = smov %s3565_s25 }
 0x87d   :  { %2168 = vsyncpa [#allocation3], 1 }
 0x87e   :  { %2170 = vsyncpa [#allocation3 + $0x1], 1 }
 0x87f   :  { %2171 = vsyncpa [#allocation6], 1 }
 0x880   :  { %2172 = vsyncpa [#allocation9], 1 }
 0x881   :  { %2173 = vsyncpa [#allocation12], 1 }
 0x882   :  { %2174 = vsyncpa [#allocation4], 1 }
 0x883   :  { %2176 = vsyncpa [#allocation4 + $0x1], 1 }

// kernel: block_forward.1
= control target key start
LH: loop header
LB: loop body
LE: loop exit
PB: predicated region body
PF: predicated region fallthrough
CT: control target
= control target key end

     0   :  { %s3529_s0 = inlined_call_operand.vmem [shape: f32[16,256], index: 0, kind: input, shape index: {}]   ;;  %s3530_s1 = inlined_call_operand.hbm [shape: f32[16,128], index: 1, kind: input, shape index: {}]   ;;  %s3531_s2 = inlined_call_operand.vmem [shape: bf16[128,128], index: 2, kind: input, shape index: {}]   ;;  %s3532_s3 = inlined_call_operand.hbm [shape: bf16[128,128], index: 3, kind: input, shape index: {}]   ;;  %s3533_s4 = inlined_call_operand.hbm [shape: bf16[128,512], index: 4, kind: input, shape index: {}]   ;;  %s3534_s5 = inlined_call_operand.hbm [shape: bf16[512,128], index: 5, kind: input, shape index: {}]   ;;  %s3535_s6 = inlined_call_operand.hbm [shape: bf16[128,512], index: 6, kind: input, shape index: {}]   ;;  %s3536_s7 = inlined_call_operand.hbm [shape: bf16[512,128], index: 7, kind: input, shape index: {}]   ;;  %s3537_s8 = inlined_call_operand.vmem [shape: f32[2,512], index: 8, kind: input, shape index: {}]   ;;  %s3538_s9 = inlined_call_operand.hbm [shape: f32[16,128], index: 9, kind: output, shape index: {}]  }
   0x1   :  { %3544 = sst [smem:[#allocation20_spill]] %s3530_s1 }
   0x2   :  { %14 = vsyncpa [#allocation3], 0 }
   0x3   :  { %15 = vsyncpa [#allocation6], 0 }
   0x4   :  { %16 = vsyncpa [#allocation9], 0 }
   0x5   :  { %17 = vsyncpa [#allocation12], 0 }
   0x6   :  { %18 = vsyncpa [#allocation4], 0 }
   0x7   :  { %20 = vsyncpa [#allocation4 + $0x1], 0  ;;  %s3194_s30 = smov 0   ;;  %s3196_s10 = smov 0  }
   0x8   :  { %s3198_s11 = smov 0   ;;  %s3200_s12 = smov 0  }
   0x9 LB: > { %s3215_s13 = sadd.s32 4294967295, %s3126_s12   ;;  %s2269_s14 = sadd.s32 4294967294, %s3126_s12   ;;  %s3126_s12 = sphi %s3200_s12, %s3569_s12   ;;  %s3122_s11 = sphi %s3198_s11, %s3568_s11   ;;  %s3118_s10 = sphi %s3196_s10, %s3567_s10   ;;  %s3114_s30 = sphi %s3194_s30, %s3566_s30  }
   0xa   : > { %s3219_s15 = sadd.s32 1, %s3126_s12   ;;  %s227_s16 = sadd.s32 1, %s3122_s11 }
   0xb   : > { %s224_s17 = ssub.s32 %s3126_s12, %s3219_s15  ;;  %p237_p0 = scmp.ne.s32.totalorder %s3122_s11, %s3118_s10 }
   0xc   : > { %p225_p1 = scmp.eq.s32.totalorder %s224_s17, 0  ;;  %p238_p2 = scmp.eq.s32.totalorder %s3215_s13, 1 }
   0xd   : > { %p243_p3 = scmp.ne.s32.totalorder %s3118_s10, %s3114_s30  ;;  %p244_p4 = scmp.eq.s32.totalorder %s2269_s14, 1 }
   0xe   : > { %s3230_s18 = scalar_select %p225_p1, %s3122_s11, %s227_s16  }
   0xf   : > { %p3232_p5 = por %p238_p2, %p237_p0  ;;  %p3236_p6 = por %p244_p4, %p243_p3 }
  0x10   : > { %3545 = sst [smem:[#allocation19_spill]] %s3230_s18  ;;  %p2270_p7 = scmp.ge.s32.totalorder %s3126_s12, 1 }
  0x11   : > { %s3546_s19 = scalar_select %p3232_p5, 1, 0 }
  0x12   : > { %s3547_s20 = scalar_select %p3236_p6, 1, 0 }
  0x13   : > { %p251_p8 = scmp.lt.s32.totalorder %s3126_s12, 3  ;;  %p3539_p9 = scmp.eq.s32.totalorder %s3215_s13, 0 }
  0x14   : > { %s3128_s22 = smov [#allocation5]   ;;  %s3129_s25 = smov [#allocation8]  }
  0x15   : > { %p3243_p10 = pnand %p2270_p7, %p251_p8  ;;  %s279_s23 = sshll.u32 %s3128_s22, 4  ;;  %s280_s23 = int_to_ptr.vmem [resolvable:$true] %s279_s23 }
  0x16   : > { %s305_s26 = sshll.u32 %s3129_s25, 4  ;;  %s3130_s27 = smov [#allocation2]   ;;  %s306_s26 = int_to_ptr.vmem [resolvable:$true] %s305_s26 }
  0x17   : > { %s3548_s21 = scalar_select %p3243_p10, 1, 0 }
  0x18   : > { %p2609_p11 = pneg %p3243_p10  ;;  %s263_s28 = sshll.u32 %s3130_s27, 4  ;;  %s264_s28 = int_to_ptr.vmem [resolvable:$true] %s263_s28 }
  0x19   : > { %s2905_s14 = scalar_lea.vmem %s280_s23, 1024  ;;  %p2913_p3 = scmp.lt.s32.totalorder %s280_s23, %s280_s23 }
  0x1a   : > { %p3251_p12 = pnand %p3539_p9, %p2609_p11  ;;  %p2906_p0 = scmp.ne.s32.totalorder %s280_s23, %s2905_s14 }
  0x1b   : > { %p2914_p4 = scmp.lt.s32.totalorder %s2905_s14, %s2905_s14 }
  0x1c   : > { %p3257_p13 = pneg %p3251_p12 }
  0x1d   : > { %p2915_p7 = por %p2914_p4, %p2913_p3 }
  0x1e   : > { %p2908_p1 = pnand %p2906_p0, %p3257_p13 }
  0x20   : > { %p2909_p2 = pneg %p2908_p1 }
  0x22   : > { %p2916_p8 = pnand %p2915_p7, %p2909_p2 }
  0x24   : > { %2919 = shalt.err (!%p2916_p8)
}
  0x25   : > { %s3540_s16 = smov 64   ;;  %s3541_s17 = smov 4  }
  0x26   : > { %2615 = dma.hbm_to_vmem [thread:$0]  (!%p3251_p12), %s3532_s3, 1024, %s280_s23, [#allocation6], %s3540_s16, %s3540_s16, %s3541_s17  }
  0x27   : > { %s2931_s27 = scalar_lea.vmem %s306_s26, 4096  ;;  %p2939_p3 = scmp.lt.s32.totalorder %s306_s26, %s306_s26 }
  0x28   : > { %p2932_p11 = scmp.ne.s32.totalorder %s306_s26, %s2931_s27  ;;  %p2940_p2 = scmp.lt.s32.totalorder %s2931_s27, %s2931_s27 }
  0x2a   : > { %p2934_p0 = pnand %p2932_p11, %p3257_p13  ;;  %p2941_p4 = por %p2940_p2, %p2939_p3 }
  0x2c   : > { %p2935_p1 = pneg %p2934_p0 }
  0x2e   : > { %p2942_p7 = pnand %p2941_p4, %p2935_p1 }
  0x30   : > { %2945 = shalt.err (!%p2942_p7)
}
  0x31   : > { %2621 = dma.hbm_to_vmem [thread:$0]  (!%p3251_p12), %s3534_s5, 4096, %s306_s26, [#allocation9], %s3540_s16, %s3540_s16, %s3541_s17  }
  0x32   : > { %s2957_s23 = scalar_lea.vmem %s264_s28, 256  ;;  %p2965_p9 = scmp.lt.s32.totalorder %s264_s28, %s264_s28 }
  0x33   : > { %p2958_p8 = scmp.ne.s32.totalorder %s264_s28, %s2957_s23  ;;  %p2966_p3 = scmp.lt.s32.totalorder %s2957_s23, %s2957_s23 }
  0x35   : > { %p2960_p11 = pnand %p2958_p8, %p3257_p13  ;;  %p2967_p1 = por %p2966_p3, %p2965_p9 }
  0x37   : > { %p2961_p0 = pneg %p2960_p11 }
  0x39   : > { %p2968_p2 = pnand %p2967_p1, %p2961_p0 }
  0x3b   : > { %2971 = shalt.err (!%p2968_p2)
}
  0x3c   : > { %s3133_s22 = smov 128   ;;  %s3134_s25 = smov 8  }
  0x3d   : > { %s3551_s1 = sld [smem:[#allocation20_spill]]  ;;  %s3135_s26 = smov [#allocation7]  }
  0x3e   : > { %s292_s14 = sshll.u32 %s3135_s26, 4  ;;  %s293_s14 = int_to_ptr.vmem [resolvable:$true] %s292_s14 }
  0x3f   : > { %s2983_s16 = scalar_lea.vmem %s293_s14, 4096  ;;  %p2991_p9 = scmp.lt.s32.totalorder %s293_s14, %s293_s14 }
  0x40   : > { %p2984_p4 = scmp.ne.s32.totalorder %s293_s14, %s2983_s16  ;;  %p2992_p11 = scmp.lt.s32.totalorder %s2983_s16, %s2983_s16 }
  0x42   : > { %p2986_p7 = pnand %p2984_p4, %p3257_p13  ;;  %p2993_p0 = por %p2992_p11, %p2991_p9 }
  0x43   : > { %2612 = dma.hbm_to_vmem [thread:$0]  (!%p3251_p12), %s3551_s1, 256, %s264_s28, [#allocation3], %s3133_s22, %s3133_s22, %s3134_s25  }
  0x44   : > { %p2987_p8 = pneg %p2986_p7 }
  0x46   : > { %p2994_p3 = pnand %p2993_p0, %p2987_p8 }
  0x48   : > { %2997 = shalt.err (!%p2994_p3)
}
  0x49   : > { %s3136_s23 = smov 256   ;;  %s3137_s17 = smov 16  }
  0x4a   : > { %2618 = dma.hbm_to_vmem [thread:$0]  (!%p3251_p12), %s3533_s4, 4096, %s293_s14, [#allocation6], %s3136_s23, %s3136_s23, %s3137_s17  }
  0x4b   : > { %s3138_s22 = smov [#allocation10]   ;;  %s3139_s18 = smov [#allocation11]  }
  0x4c   : > { %s318_s25 = sshll.u32 %s3138_s22, 4  ;;  %s331_s26 = sshll.u32 %s3139_s18, 4  ;;  %s319_s25 = int_to_ptr.vmem [resolvable:$true] %s318_s25  ;;  %s332_s26 = int_to_ptr.vmem [resolvable:$true] %s331_s26 }
  0x4d   : > { %s3009_s1 = scalar_lea.vmem %s319_s25, 4096  ;;  %p3017_p7 = scmp.lt.s32.totalorder %s319_s25, %s319_s25 }
  0x4e   : > { %p3010_p1 = scmp.ne.s32.totalorder %s319_s25, %s3009_s1  ;;  %p3018_p8 = scmp.lt.s32.totalorder %s3009_s1, %s3009_s1 }
  0x50   : > { %p3012_p2 = pnand %p3010_p1, %p3257_p13  ;;  %p3019_p9 = por %p3018_p8, %p3017_p7 }
  0x52   : > { %p3013_p4 = pneg %p3012_p2 }
  0x54   : > { %p3020_p11 = pnand %p3019_p9, %p3013_p4 }
  0x56   : > { %3023 = shalt.err (!%p3020_p11)
}
  0x57   : > { %2624 = dma.hbm_to_vmem [thread:$0]  (!%p3251_p12), %s3535_s6, 4096, %s319_s25, [#allocation9], %s3136_s23, %s3136_s23, %s3137_s17  }
  0x58   : > { %s3035_s27 = scalar_lea.vmem %s332_s26, 4096  ;;  %p3043_p5 = scmp.lt.s32.totalorder %s332_s26, %s332_s26 }
  0x59   : > { %p3036_p0 = scmp.ne.s32.totalorder %s332_s26, %s3035_s27  ;;  %p3044_p1 = scmp.lt.s32.totalorder %s3035_s27, %s3035_s27 }
  0x5b   : > { %p3038_p3 = pnand %p3036_p0, %p3257_p13  ;;  %p3045_p2 = por %p3044_p1, %p3043_p5 }
  0x5d   : > { %p3039_p6 = pneg %p3038_p3 }
  0x5f   : > { %p3046_p10 = pnand %p3045_p2, %p3039_p6 }
  0x61   : > { %3049 = shalt.err (!%p3046_p10)
}
  0x62   : > { %s3552_s1 = smov 4   ;;  %s3553_s28 = smov 64  }
  0x63   : > { %2627 = dma.hbm_to_vmem [thread:$0]  (!%p3251_p12), %s3536_s7, 4096, %s332_s26, [#allocation12], %s3553_s28, %s3553_s28, %s3552_s1  }
  0x64   : > { %p3554_p4 = scmp.ne.s32.totalorder %s3548_s21, 0 }
  0x65   : > { %p3555_p13 = scmp.eq.s32.totalorder (!%p3554_p4), %s3215_s13, 0 }
  0x66   : > { %358 = sbr.rel (%p3554_p4) target bundleno = 2158 (0x86e), region = 56 }
  0x6b   : > { %3093 = dma.done.wait (%p3555_p13), [#allocation3], 256   ;;  %p3556_p7 = pmov %p3555_p13 }
  0x6d   : > { %3095 = vsyncadd (%p3556_p7), [#allocation3], 4294967040  ;;  %p3557_p5 = pmov %p3556_p7 }
  0x6f   : > { %3097 = dma.done.wait (%p3557_p5), [#allocation6], 5120   ;;  %p3558_p6 = pmov %p3557_p5 }
  0x70   : > { %p3559_p10 = pmov %p3557_p5 }
  0x71   : > { %3099 = vsyncadd (%p3558_p6), [#allocation6], 4294962176 }
  0x72   : > { %3101 = dma.done.wait (%p3559_p10), [#allocation9], 8192   ;;  %p3560_p12 = pmov %p3557_p5 }
  0x73   : > { %p3561_p8 = pmov %p3557_p5 }
  0x74   : > { %3103 = vsyncadd (%p3560_p12), [#allocation9], 4294959104 }
  0x75   : > { %3105 = dma.done.wait (%p3561_p8), [#allocation12], 4096   ;;  %p3562_p9 = pmov %p3557_p5 }
  0x76   : > { %p414_p11 = scmp.lt.s32.totalorder %s3215_s13, 1  ;;  %v2692_v1 = vld [vmem:[%s3531_s2 + $0x38] sm:$0xff]   ;;  %v2693_v2 = vld [vmem:[%s3531_s2 + $0x30] sm:$0xff]   ;;  %v3140_v3 = vmov 0.0   ;;  %v2694_v8 = vld [vmem:[%s3531_s2 + $0x28] sm:$0xff]   ;;  %vm3141_vm0 = vmmov 0   ;;  %v437_v18 = vlaneseq }
  0x77   : > { %3107 = vsyncadd (%p3562_p9), [#allocation12], 4294963200  ;;  %2543 = vmatprep.subr.bf16.mxu0 %v3140_v3  ;;  %v2695_v9 = vld [vmem:[%s3531_s2 + $0x20] sm:$0xff]   ;;  %2559 = vmatprep.mubr.msk.bf16.mxu0 %vm3141_vm0, %v3140_v3  ;;  %v2696_v10 = vld [vmem:[%s3531_s2 + $0x18] sm:$0xff]   ;;  %s2433_s28 = sshll.u32 %s3215_s13, 7  ;;  %p3563_p3 = scmp.ne.s32.totalorder %s3546_s19, 0 }
  0x78   : > { %s415_s21 = scalar_select %p414_p11, %s3215_s13, 1  ;;  %2544 = vmatpush3.bf16.msra.mxu0 %v2692_v1  ;;  %v2697_v11 = vld [vmem:[%s3531_s2 + $0x10] sm:$0xff]   ;;  %v2698_v12 = vld [vmem:[%s3531_s2 + $0x8] sm:$0xff]   ;;  %v2699_v13 = vld [vmem:[%s3531_s2] sm:$0xff]   ;;  %v3373_v19 = vshrl.u32 %v437_v18, 7 }
  0x79   : > { %2545 = vmatprep.subr.bf16.mxu0 %v3140_v3  ;;  %v3378_v21 = vld [vmem:[#allocation2] sm:$0xff]  ;;  %v3387_v30 = vld [vmem:[#allocation2 + $0x8] sm:$0xff]  ;;  %s2148_s29 = scalar_lea.hbm %s3538_s9, %s2433_s28  ;;  %s3143_s26 = smov [#allocation13]  }
  0x7a   : > { %s2436_s24 = sshll.u32 %s415_s21, 4  ;;  %v3376_v20 = vsub.s32 0, %v3373_v19  ;;  %v3381_v22 = vsub.s32 1, %v3373_v19  ;;  %v2700_v38 = vld [vmem:[#allocation7 + $0xe4] ss:$16 sps:$4 sm:$0xff]   ;;  %s3054_s16 = sshll.u32 %s3143_s26, 4  ;;  %s3055_s16 = int_to_ptr.vmem [resolvable:$false] %s3054_s16 }
  0x7b   : > { %s3335_s23 = scalar_lea.vmem %s3529_s0, %s2436_s24  ;;  %v2702_v39 = vld [vmem:[#allocation7 + $0xe8] ss:$16 sps:$4 sm:$0xff]   ;;  %v2704_v40 = vld [vmem:[#allocation7 + $0xec] ss:$16 sps:$4 sm:$0xff]   ;;  %v2705_v41 = vld [vmem:[#allocation7 + $0xe0] ss:$16 sps:$4 sm:$0xff]   ;;  %809 = vmatprep.subr.bf16.mxu1 %v2700_v38 }
  0x7c   : > { %v424_v0 = vld [vmem:[%s3335_s23 + $0x8] sm:$0xff]  ;;  %2546 = vmatpush3.bf16.msra.mxu0 %v2693_v2  ;;  %v423_v14 = vld [vmem:[%s3335_s23] sm:$0xff]  ;;  %v440_v23 = vrot.slane %v3378_v21, %v3376_v20  ;;  %v445_v26 = vrot.slane %v3378_v21, %v3381_v22  ;;  %v556_v31 = vrot.slane %v3387_v30, %v3376_v20  ;;  %810 = vmatpush1.bf16.msra.mxu1 %v2705_v41  ;;  %s3056_s13 = scalar_lea.vmem %s3055_s16, 256 }
  0x7d   : > { %425 = vadd.xlane.f32.xlu0 %v424_v0  ;;  %2547 = vmatprep.subr.bf16.mxu0 %v3140_v3  ;;  %v2706_v42 = vld [vmem:[#allocation7 + $0xc4] ss:$16 sps:$4 sm:$0xff]   ;;  %v2710_v43 = vld [vmem:[#allocation7 + $0xcc] ss:$16 sps:$4 sm:$0xff]   ;;  %v2708_v44 = vld [vmem:[#allocation7 + $0xc8] ss:$16 sps:$4 sm:$0xff]  }
  0x7e   : > { %v2711_v45 = vld [vmem:[#allocation7 + $0xc0] ss:$16 sps:$4 sm:$0xff]   ;;  %811 = vmatprep.subr.bf16.mxu1 %v2706_v42  ;;  %v2712_v54 = vld [vmem:[#allocation7 + $0xa4] ss:$16 sps:$4 sm:$0xff]   ;;  %v2716_v55 = vld [vmem:[#allocation7 + $0xac] ss:$16 sps:$4 sm:$0xff]  }
  0x7f   : > { %v2714_v56 = vld [vmem:[#allocation7 + $0xa8] ss:$16 sps:$4 sm:$0xff]   ;;  %v2717_v57 = vld [vmem:[#allocation7 + $0xa0] ss:$16 sps:$4 sm:$0xff]   ;;  %v2718_v58 = vld [vmem:[#allocation7 + $0x84] ss:$16 sps:$4 sm:$0xff]  }
  0x80   : > { %2548 = vmatpush3.bf16.msra.mxu0 %v2694_v8  ;;  %812 = vmatpush1.bf16.msra.mxu1 %v2711_v45  ;;  %v2720_v59 = vld [vmem:[#allocation7 + $0x88] ss:$16 sps:$4 sm:$0xff]   ;;  %v2722_v60 = vld [vmem:[#allocation7 + $0x8c] ss:$16 sps:$4 sm:$0xff]   ;;  %v2723_v61 = vld [vmem:[#allocation7 + $0x80] ss:$16 sps:$4 sm:$0xff]  }
  0x81   : > { %2549 = vmatprep.subr.bf16.mxu0 %v3140_v3  ;;  %813 = vmatprep.subr.bf16.mxu1 %v2712_v54  ;;  %v2724_v62 = vld [vmem:[#allocation7 + $0x64] ss:$16 sps:$4 sm:$0xff]   ;;  %v2728_v63 = vld [vmem:[#allocation7 + $0x6c] ss:$16 sps:$4 sm:$0xff]   ;;  %v2729_v1 = vld [vmem:[#allocation7 + $0x60] ss:$16 sps:$4 sm:$0xff]  }
  0x82   : > { %v2730_v2 = vld [vmem:[#allocation7 + $0x44] ss:$16 sps:$4 sm:$0xff]   ;;  %v2740_v8 = vld [vmem:[#allocation7 + $0x2c] ss:$16 sps:$4 sm:$0xff]  }
  0x83   : > { %v2752_v38 = vld [vmem:[#allocation8 + $0x70] sm:$0xff]   ;;  %v2756_v42 = vld [vmem:[#allocation8 + $0x68] sm:$0xff]   ;;  %v2767_v54 = vld [vmem:[#allocation8 + $0x98] sm:$0xff]  }
  0x84   : > { %2550 = vmatpush3.bf16.msra.mxu0 %v2695_v9  ;;  %814 = vmatpush1.bf16.msra.mxu1 %v2717_v57  ;;  %v3142_v9 = vmov 0   ;;  %v2755_v41 = vld [vmem:[#allocation8 + $0xb0] sm:$0xff]   ;;  %v2759_v45 = vld [vmem:[#allocation8 + $0xa8] sm:$0xff]  }
  0x85   : > { %2551 = vmatprep.subr.bf16.mxu0 %v3140_v3  ;;  %815 = vmatprep.subr.bf16.mxu1 %v2718_v58  ;;  %v2769_v57 = vld [vmem:[#allocation8 + $0x10] sm:$0xff]  }
  0x86   : > { %841 = vmatprep.mubr.bf16.mxu1 %v3142_v9  ;;  %v2771_v58 = vld [vmem:[#allocation8 + $0x90] sm:$0xff]  }
  0x88   : > { %2552 = vmatpush3.bf16.msra.mxu0 %v2696_v10  ;;  %816 = vmatpush1.bf16.msra.mxu1 %v2723_v61  ;;  %v2738_v10 = vld [vmem:[#allocation7 + $0x28] ss:$16 sps:$4 sm:$0xff]  }
  0x89   : > { %2553 = vmatprep.subr.bf16.mxu0 %v3140_v3  ;;  %817 = vmatprep.subr.bf16.mxu1 %v2724_v62  ;;  %v2773_v61 = vld [vmem:[#allocation8 + $0x8] sm:$0xff]  }
  0x8a   : > { %v2775_v62 = vld [vmem:[#allocation8 + $0x88] sm:$0xff]  }
  0x8c   : > { %2554 = vmatpush3.bf16.msra.mxu0 %v2697_v11  ;;  %818 = vmatpush1.bf16.msra.mxu1 %v2729_v1  ;;  %v2741_v11 = vld [vmem:[#allocation7 + $0x20] ss:$16 sps:$4 sm:$0xff]  }
  0x8d   : > { %2555 = vmatprep.subr.bf16.mxu0 %v3140_v3  ;;  %819 = vmatprep.subr.bf16.mxu1 %v2730_v2  ;;  %v2777_v1 = vld [vmem:[#allocation8] sm:$0xff]  }
  0x8e   : > { %v2779_v2 = vld [vmem:[#allocation8 + $0x80] sm:$0xff]  }
  0x90   : > { %2556 = vmatpush3.bf16.msra.mxu0 %v2698_v12  ;;  %v2742_v12 = vld [vmem:[#allocation7 + $0x4] ss:$16 sps:$4 sm:$0xff]  }
  0x91   : > { %2557 = vmatprep.subr.bf16.mxu0 %v3140_v3 }
  0x94   : > { %2558 = vmatpush3.bf16.msra.mxu0 %v2699_v13  ;;  %v2746_v13 = vld [vmem:[#allocation7 + $0xc] ss:$16 sps:$4 sm:$0xff]  }
  0x95   : > { %850 = vmatprep.subr.bf16.mxu0 %v2704_v40  ;;  %v2754_v40 = vld [vmem:[#allocation8 + $0xf0] sm:$0xff]  }
 0x106   : > { %v426_v4 = vpop.xlane.xlu0 %425 }
 0x107   : > { %v428_v5 = vmul.f32 0.0078125, %v426_v4  ;;  %v2734_v4 = vld [vmem:[#allocation7 + $0x4c] ss:$16 sps:$4 sm:$0xff]  }
 0x109   : > { %v429_v6 = vsub.f32 %v424_v0, %v428_v5  ;;  %v2726_v0 = vld [vmem:[#allocation7 + $0x68] ss:$16 sps:$4 sm:$0xff]  }
 0x10a   : > { %v2732_v5 = vld [vmem:[#allocation7 + $0x48] ss:$16 sps:$4 sm:$0xff]  }
 0x10b   : > { %v430_v7 = vmul.f32 %v429_v6, %v429_v6 }
 0x10d   : > { %431 = vadd.xlane.f32.xlu0 %v430_v7  ;;  %v2736_v7 = vld [vmem:[#allocation7 + $0x24] ss:$16 sps:$4 sm:$0xff]  }
 0x111   : > { %1273 = vadd.xlane.f32.xlu0 %v423_v14 }
 0x196   : > { %v432_v15 = vpop.xlane.xlu0 %431 }
 0x197   : > { %v433_v16 = vmul.f32 0.0078125, %v432_v15  ;;  %v2747_v15 = vld [vmem:[#allocation7] ss:$16 sps:$4 sm:$0xff]  }
 0x199   : > { %v434_v17 = vadd.f32 1e-05, %v433_v16 }
 0x19a   : > { %v1274_v46 = vpop.xlane.xlu0 %1273 }
 0x19b   : > { %2868 = vrsqrt.f32 %v434_v17  ;;  %v1275_v47 = vmul.f32 0.0078125, %v1274_v46  ;;  %v2760_v46 = vld [vmem:[#allocation8 + $0x60] sm:$0xff]  }
 0x19d   : > { %v3397_v51 = vsub.f32 %v423_v14, %v1275_v47  ;;  %v2761_v47 = vld [vmem:[#allocation8 + $0x20] sm:$0xff]  }
 0x19f   : > { %v1277_v53 = vmul.f32 %v3397_v51, %v3397_v51 }
 0x1a8   : > { %v2869_v24 = vpop.eup %2868 }
 0x1a9   : > { %v436_v25 = vmul.f32 %v2869_v24, %v429_v6  ;;  %v2735_v6 = vld [vmem:[#allocation7 + $0x40] ss:$16 sps:$4 sm:$0xff]   ;;  %v3409_v24 = vsub.s32 3, %v3373_v19 }
 0x1aa   : > { %820 = vmatpush1.bf16.msra.mxu1 %v2735_v6  ;;  %v3426_v6 = vsub.s32 6, %v3373_v19 }
 0x1ab   : > { %v441_v27 = vmul.f32 %v440_v23, %v436_v25  ;;  %821 = vmatprep.subr.bf16.mxu1 %v2736_v7  ;;  %v3406_v23 = vsub.s32 2, %v3373_v19 }
 0x1ad   : > { %v446_v28 = vadd.f32 %v445_v26, %v441_v27  ;;  %v572_v25 = vrot.slane %v3378_v21, %v3406_v23 }
 0x1ae   : > { %822 = vmatpush1.bf16.msra.mxu1 %v2741_v11 }
 0x1af   : > { %v463_v29 = vpack.c.bf16 %v446_v28, %v446_v28  ;;  %823 = vmatprep.subr.bf16.mxu1 %v2742_v12  ;;  %v577_v28 = vrot.slane %v3378_v21, %v3409_v24 }
 0x1b1   : > { %2560 = vmatmul.mubr.bf16.vlgmr.msra.gmra.mxu0 %v463_v29 }
 0x1b2   : > { %851 = vmatpush1.bf16.msra.mxu0 %v2702_v39  ;;  %882 = vmatprep.mubr.bf16.mxu0 %v3142_v9  ;;  %v2753_v39 = vld [vmem:[#allocation8 + $0x30] sm:$0xff]  }
 0x1b3   : > { %852 = vmatprep.subr.bf16.mxu0 %v2710_v43  ;;  %824 = vmatpush1.bf16.msra.mxu1 %v2747_v15  ;;  %v2757_v43 = vld [vmem:[#allocation8 + $0x28] sm:$0xff]  }
 0x1b6   : > { %853 = vmatpush1.bf16.msra.mxu0 %v2708_v44  ;;  %v2758_v44 = vld [vmem:[#allocation8 + $0xe8] sm:$0xff]  }
 0x1b7   : > { %854 = vmatprep.subr.bf16.mxu0 %v2716_v55  ;;  %v2768_v55 = vld [vmem:[#allocation8 + $0x50] sm:$0xff]  }
 0x1ba   : > { %855 = vmatpush1.bf16.msra.mxu0 %v2714_v56  ;;  %v2770_v56 = vld [vmem:[#allocation8 + $0xd0] sm:$0xff]  }
 0x1bb   : > { %856 = vmatprep.subr.bf16.mxu0 %v2722_v60  ;;  %v2774_v60 = vld [vmem:[#allocation8 + $0xc8] sm:$0xff]  }
 0x1be   : > { %857 = vmatpush1.bf16.msra.mxu0 %v2720_v59  ;;  %v2772_v59 = vld [vmem:[#allocation8 + $0x48] sm:$0xff]  }
 0x1bf   : > { %858 = vmatprep.subr.bf16.mxu0 %v2728_v63  ;;  %v2776_v63 = vld [vmem:[#allocation8 + $0x40] sm:$0xff]  }
 0x1c2   : > { %859 = vmatpush1.bf16.msra.mxu0 %v2726_v0  ;;  %v2778_v0 = vld [vmem:[#allocation8 + $0xc0] sm:$0xff]  }
 0x1c3   : > { %860 = vmatprep.subr.bf16.mxu0 %v2734_v4  ;;  %v3420_v4 = vld [vmem:[%s3537_s8] sm:$0xff] }
 0x1c4   : > { %v616_v7 = vrot.slane %v3420_v4, %v3376_v20  ;;  %v628_v11 = vrot.slane %v3420_v4, %v3426_v6 }
 0x1c6   : > { %861 = vmatpush1.bf16.msra.mxu0 %v2732_v5  ;;  %v3423_v5 = vsub.s32 4, %v3373_v19  ;;  %v636_v12 = vrot.slane %v616_v7, %v3376_v20  ;;  %v648_v15 = vrot.slane %v628_v11, %v3376_v20 }
 0x1c7   : > { %862 = vmatprep.subr.bf16.mxu0 %v2740_v8 }
 0x1c8   : > { %v624_v8 = vrot.slane %v3420_v4, %v3423_v5 }
 0x1ca   : > { %863 = vmatpush1.bf16.msra.mxu0 %v2738_v10  ;;  %v620_v10 = vrot.slane %v3420_v4, %v3406_v23 }
 0x1cb   : > { %864 = vmatprep.subr.bf16.mxu0 %v2746_v13  ;;  %v644_v13 = vrot.slane %v624_v8, %v3376_v20 }
 0x271   : > { %v546_v32 = vpop.f32.mrf.mxu0 }
 0x272   : > { %v552_v33 = vadd.f32 %v546_v32, %v423_v14  ;;  %v2744_v14 = vld [vmem:[#allocation7 + $0x8] ss:$16 sps:$4 sm:$0xff]  }
 0x273   : > { %v2561_v34 = vpop.f32.mrf.mxu0  ;;  %865 = vmatpush1.bf16.msra.mxu0 %v2744_v14  ;;  %v640_v14 = vrot.slane %v620_v10, %v3376_v20 }
 0x274   : > { %v3391_v35 = vadd.f32 %v556_v31, %v552_v33  ;;  %v2748_v33 = vld [vmem:[#allocation8 + $0x78] sm:$0xff]  }
 0x275   : > { %v549_v36 = vpop.f32.mrf.mxu0  ;;  %v2749_v34 = vld [vmem:[#allocation8 + $0x38] sm:$0xff]   ;;  %2446 = vmatprep.subr.bf16.mxu1 %v2748_v33 }
 0x276   : > { %558 = vadd.xlane.f32.xlu1 %v3391_v35  ;;  %v2750_v36 = vld [vmem:[#allocation8 + $0xf8] sm:$0xff]  }
 0x277   : > { %v2562_v37 = vpop.f32.mrf.mxu0  ;;  %2468 = vmatprep.subr.bf16.mxu0 %v2750_v36 }
 0x278   : > { %v2751_v37 = vld [vmem:[#allocation8 + $0xb8] sm:$0xff]  }
 0x2ff   : > { %v559_v48 = vpop.xlane.xlu1 %558 }
 0x300   : > { %v560_v49 = vmul.f32 0.0078125, %v559_v48  ;;  %v2762_v48 = vld [vmem:[#allocation8 + $0xe0] sm:$0xff]  }
 0x302   : > { %v3395_v50 = vsub.f32 %v3391_v35, %v560_v49  ;;  %v2763_v49 = vld [vmem:[#allocation8 + $0xa0] sm:$0xff]  }
 0x304   : > { %v562_v52 = vmul.f32 %v3395_v50, %v3395_v50 }
 0x306   : > { %563 = vadd.xlane.f32.xlu1 %v562_v52  ;;  %v2766_v52 = vld [vmem:[#allocation8 + $0xd8] sm:$0xff]  }
 0x30a   : > { %1278 = vadd.xlane.f32.xlu1 %v1277_v53  ;;  %v2765_v53 = vld [vmem:[#allocation8 + $0x18] sm:$0xff]  }
 0x38f   : > { %v564_v16 = vpop.xlane.xlu1 %563 }
 0x390   : > { %v565_v17 = vmul.f32 0.0078125, %v564_v16 }
 0x392   : > { %v566_v18 = vadd.f32 1e-05, %v565_v17 }
 0x394   : > { %2870 = vrsqrt.f32 %v566_v18 }
 0x3a1   : > { %v2871_v26 = vpop.eup %2870 }
 0x3a2   : > { %v568_v27 = vmul.f32 %v2871_v26, %v3395_v50  ;;  %v2764_v50 = vld [vmem:[#allocation8 + $0x58] sm:$0xff]  }
 0x3a4   : > { %v573_v29 = vmul.f32 %v572_v25, %v568_v27 }
 0x3a6   : > { %v578_v31 = vadd.f32 %v577_v28, %v573_v29 }
 0x3a8   : > { %v611_v32 = vpack.c.bf16 %v578_v31, %v578_v31 }
 0x3aa   : > { %842 = vmatmul.mubr.bf16.vlgmr.msra.gmra.mxu1 %v611_v32  ;;  %883 = vmatmul.mubr.bf16.vlgmr.msra.gmra.mxu0 %v611_v32 }
 0x3ab   : > { %2447 = vmatpush3.bf16.msra.mxu1 %v2749_v34  ;;  %2469 = vmatpush3.bf16.msra.mxu0 %v2751_v37 }
 0x3ac   : > { %2448 = vmatprep.subr.bf16.mxu1 %v2752_v38  ;;  %2470 = vmatprep.subr.bf16.mxu0 %v2754_v40 }
 0x3af   : > { %2449 = vmatpush3.bf16.msra.mxu1 %v2753_v39  ;;  %2471 = vmatpush3.bf16.msra.mxu0 %v2755_v41 }
 0x3b0   : > { %2450 = vmatprep.subr.bf16.mxu1 %v2756_v42  ;;  %2472 = vmatprep.subr.bf16.mxu0 %v2758_v44 }
 0x3b3   : > { %2451 = vmatpush3.bf16.msra.mxu1 %v2757_v43  ;;  %2473 = vmatpush3.bf16.msra.mxu0 %v2759_v45 }
 0x3b4   : > { %2452 = vmatprep.subr.bf16.mxu1 %v2760_v46  ;;  %2474 = vmatprep.subr.bf16.mxu0 %v2762_v48 }
 0x3b7   : > { %2453 = vmatpush3.bf16.msra.mxu1 %v2761_v47  ;;  %2475 = vmatpush3.bf16.msra.mxu0 %v2763_v49 }
 0x3b8   : > { %2454 = vmatprep.subr.bf16.mxu1 %v2764_v50  ;;  %2476 = vmatprep.subr.bf16.mxu0 %v2766_v52 }
 0x3bb   : > { %2455 = vmatpush3.bf16.msra.mxu1 %v2765_v53  ;;  %2477 = vmatpush3.bf16.msra.mxu0 %v2767_v54 }
 0x3bc   : > { %2456 = vmatprep.subr.bf16.mxu1 %v2768_v55  ;;  %2478 = vmatprep.subr.bf16.mxu0 %v2770_v56 }
 0x3bf   : > { %2457 = vmatpush3.bf16.msra.mxu1 %v2769_v57  ;;  %2479 = vmatpush3.bf16.msra.mxu0 %v2771_v58 }
 0x3c0   : > { %2458 = vmatprep.subr.bf16.mxu1 %v2772_v59  ;;  %2480 = vmatprep.subr.bf16.mxu0 %v2774_v60 }
 0x3c3   : > { %2459 = vmatpush3.bf16.msra.mxu1 %v2773_v61  ;;  %2481 = vmatpush3.bf16.msra.mxu0 %v2775_v62  ;;  %v1279_v62 = vpop.xlane.xlu1 %1278 }
 0x3c4   : > { %2460 = vmatprep.subr.bf16.mxu1 %v2776_v63  ;;  %2482 = vmatprep.subr.bf16.mxu0 %v2778_v0  ;;  %v1280_v8 = vmul.f32 0.0078125, %v1279_v62  ;;  %v2791_v62 = vld [vmem:[#allocation10 + $0xe8] ss:$16 sps:$4 sm:$0xff]  }
 0x3c7   : > { %2461 = vmatpush3.bf16.msra.mxu1 %v2777_v1  ;;  %2483 = vmatpush3.bf16.msra.mxu0 %v2779_v2 }
 0x3c8   : > { %2563 = vmatprep.subr.bf16.mxu1 %v3140_v3 }
 0x46a   : > { %v843_v16 = vpop.f32.mrf.mxu1  ;;  %v884_v17 = vpop.f32.mrf.mxu0 }
 0x46b   : > { %v844_v18 = vadd.f32 %v843_v16, %v636_v12  ;;  %v885_v25 = vadd.f32 %v884_v17, %v644_v13  ;;  %v2780_v16 = vld [vmem:[#allocation5 + $0x38] sm:$0xff]   ;;  %v1281_v17 = vadd.f32 1e-05, %v1280_v8 }
 0x46c   : > { %v845_v26 = vpop.f32.mrf.mxu1  ;;  %v886_v27 = vpop.f32.mrf.mxu0 }
 0x46d   : > { %v891_v28 = vmul.f32 %v844_v18, %v844_v18  ;;  %v893_v29 = vmul.f32 %v885_v25, %v885_v25  ;;  %v846_v31 = vadd.f32 %v845_v26, %v640_v14  ;;  %v887_v32 = vadd.f32 %v886_v27, %v648_v15 }
 0x46e   : > { %v847_v33 = vpop.f32.mrf.mxu1  ;;  %v888_v34 = vpop.f32.mrf.mxu0 }
 0x46f   : > { %v895_v36 = vmul.f32 %v891_v28, %v844_v18  ;;  %v897_v37 = vmul.f32 %v893_v29, %v885_v25  ;;  %v892_v38 = vmul.f32 %v846_v31, %v846_v31  ;;  %v894_v39 = vmul.f32 %v887_v32, %v887_v32  ;;  %v2781_v29 = vld [vmem:[#allocation5 + $0x30] sm:$0xff]  }
 0x470   : > { %v848_v40 = vpop.f32.mrf.mxu1  ;;  %v889_v41 = vpop.f32.mrf.mxu0  ;;  %v2785_v33 = vld [vmem:[#allocation5 + $0x10] sm:$0xff]  }
 0x471   : > { %v899_v42 = vmul.f32 0.044715, %v895_v36  ;;  %v901_v20 = vmul.f32 0.044715, %v897_v37  ;;  %v896_v43 = vmul.f32 %v892_v38, %v846_v31  ;;  %v898_v44 = vmul.f32 %v894_v39, %v887_v32  ;;  %v2786_v38 = vld [vmem:[#allocation5 + $0x8] sm:$0xff]   ;;  %v2787_v41 = vld [vmem:[#allocation5] sm:$0xff]  }
 0x472   : > { %v1287_v36 = vrot.slane %v3378_v21, %v3423_v5  ;;  %v3452_v37 = vsub.s32 5, %v3373_v19 }
 0x473   : > { %v903_v45 = vadd.f32 %v899_v42, %v844_v18  ;;  %v905_v46 = vadd.f32 %v901_v20, %v885_v25  ;;  %v900_v47 = vmul.f32 0.044715, %v896_v43  ;;  %v902_v48 = vmul.f32 0.044715, %v898_v44 }
 0x474   : > { %v1292_v40 = vrot.slane %v3378_v21, %v3452_v37 }
 0x475   : > { %v907_v49 = vmul.f32 0.7978846, %v903_v45  ;;  %v909_v50 = vmul.f32 0.7978846, %v905_v46  ;;  %v904_v52 = vadd.f32 %v900_v47, %v846_v31  ;;  %v906_v53 = vadd.f32 %v902_v48, %v887_v32 }
 0x477   : > { %2872 = vtanh.f32 %v907_v49  ;;  %v908_v54 = vmul.f32 0.7978846, %v904_v52  ;;  %v910_v55 = vmul.f32 0.7978846, %v906_v53 }
 0x478   : > { %2874 = vtanh.f32 %v909_v50 }
 0x479   : > { %2876 = vtanh.f32 %v908_v54 }
 0x47a   : > { %2878 = vtanh.f32 %v910_v55  ;;  %v2892_v55 = vld [vmem:[%s3335_s23 + $0x8] sm:$0xff]  ;;  %s411_s23 = sand.u32 1, %s3118_s10  }
 0x47b   : > { %2880 = vrsqrt.f32 %v1281_v17  ;;  %v2808_v17 = vld [vmem:[#allocation10 + $0x84] ss:$16 sps:$4 sm:$0xff]   ;;  %s2285_s1 = sshll.u32 %s411_s23, 3  ;;  %s2137_s17 = scalar_lea.sflag [#allocation4], %s411_s23 }
 0x47c   : > { %s413_s22 = scalar_lea.vmem [#allocation13], %s2285_s1 }
 0x47d   : > { %s2150_s18 = sshll.u32 %s413_s22, 4  ;;  %s2151_s18 = int_to_ptr.vmem [resolvable:$true] %s2150_s18 }
 0x47e   : > { %s3050_s25 = scalar_lea.vmem %s2151_s18, 128  ;;  %p3057_p4 = scmp.lt.s32.totalorder %s2151_s18, %s3055_s16 }
 0x47f   : > { %p3051_p0 = scmp.ne.s32.totalorder %s2151_s18, %s3050_s25  ;;  %p3058_p13 = scmp.lt.s32.totalorder %s3056_s13, %s3050_s25 }
 0x481   : > { %p3052_p1 = pnand %p3051_p0, %p3563_p3  ;;  %p3059_p7 = por %p3058_p13, %p3057_p4 }
 0x483   : > { %p3053_p2 = pneg %p3052_p1 }
 0x484   : > { %v2873_v56 = vpop.eup %2872 }
 0x485   : > { %v2875_v57 = vpop.eup %2874  ;;  %v915_v58 = vadd.f32 1.0, %v2873_v56  ;;  %p3060_p5 = pnand %p3059_p7, %p3053_p2 }
 0x486   : > { %v2877_v59 = vpop.eup %2876  ;;  %v917_v60 = vadd.f32 1.0, %v2875_v57 }
 0x487   : > { %v2879_v61 = vpop.eup %2878  ;;  %v916_v63 = vadd.f32 1.0, %v2877_v59  ;;  %v919_v0 = vmul.f32 0.5, %v915_v58 }
 0x488   : > { %v918_v1 = vadd.f32 1.0, %v2879_v61  ;;  %v921_v2 = vmul.f32 0.5, %v917_v60  ;;  %v2788_v60 = vld [vmem:[#allocation10 + $0xe0] ss:$16 sps:$4 sm:$0xff]   ;;  %v2790_v61 = vld [vmem:[#allocation10 + $0xe4] ss:$16 sps:$4 sm:$0xff]  }
 0x489   : > { %v920_v7 = vmul.f32 0.5, %v916_v63  ;;  %v923_v11 = vmul.f32 %v919_v0, %v844_v18  ;;  %v2782_v18 = vld [vmem:[#allocation5 + $0x28] sm:$0xff]   ;;  %v2796_v0 = vld [vmem:[#allocation10 + $0xc4] ss:$16 sps:$4 sm:$0xff]   ;;  %1655 = vmatprep.subr.bf16.mxu0 %v2790_v61 }
 0x48a   : > { %v922_v10 = vmul.f32 0.5, %v918_v1  ;;  %v925_v13 = vmul.f32 %v921_v2, %v885_v25  ;;  %v2783_v25 = vld [vmem:[#allocation5 + $0x20] sm:$0xff]   ;;  %v2793_v63 = vld [vmem:[#allocation10 + $0xec] ss:$16 sps:$4 sm:$0xff]   ;;  %v2797_v2 = vld [vmem:[#allocation10 + $0xc8] ss:$16 sps:$4 sm:$0xff]  }
 0x48b   : > { %v924_v12 = vmul.f32 %v920_v7, %v846_v31  ;;  %v991_v27 = vpack.c.bf16 %v923_v11, %v923_v11  ;;  %v2784_v31 = vld [vmem:[#allocation5 + $0x18] sm:$0xff]   ;;  %v2842_v61 = vld [vmem:[#allocation11 + $0x30] sm:$0xff]  }
 0x48c   : > { %v926_v14 = vmul.f32 %v922_v10, %v887_v32  ;;  %v993_v28 = vpack.c.bf16 %v925_v13, %v925_v13  ;;  %v2881_v32 = vpop.eup %2880  ;;  %v2799_v1 = vld [vmem:[#allocation10 + $0xcc] ss:$16 sps:$4 sm:$0xff]  }
 0x48d   : > { %v992_v15 = vpack.c.bf16 %v924_v12, %v924_v12  ;;  %v1283_v34 = vmul.f32 %v2881_v32, %v3397_v51  ;;  %v2802_v12 = vld [vmem:[#allocation10 + $0xa4] ss:$16 sps:$4 sm:$0xff]   ;;  %v2805_v13 = vld [vmem:[#allocation10 + $0xac] ss:$16 sps:$4 sm:$0xff]  }
 0x48e   : > { %v994_v26 = vpack.c.bf16 %v926_v14, %v926_v14  ;;  %v2800_v14 = vld [vmem:[#allocation10 + $0xa0] ss:$16 sps:$4 sm:$0xff]   ;;  %v2823_v32 = vld [vmem:[#allocation10 + $0x4c] ss:$16 sps:$4 sm:$0xff]  }
 0x48f   : > { %1219 = vmatprep.mubr.bf16.mxu1 %v992_v15  ;;  %v1288_v39 = vmul.f32 %v1287_v36, %v1283_v34  ;;  %v2803_v15 = vld [vmem:[#allocation10 + $0xa8] ss:$16 sps:$4 sm:$0xff]   ;;  %v2826_v36 = vld [vmem:[#allocation10 + $0x24] ss:$16 sps:$4 sm:$0xff]  }
 0x490   : > { %1259 = vmatprep.mubr.bf16.mxu0 %v994_v26  ;;  %1220 = vmatmul.mubr.bf16.vlgmr.msra.gmra.mxu1 %v991_v27  ;;  %v2809_v26 = vld [vmem:[#allocation10 + $0x88] ss:$16 sps:$4 sm:$0xff]   ;;  %v2811_v27 = vld [vmem:[#allocation10 + $0x8c] ss:$16 sps:$4 sm:$0xff]  }
 0x491   : > { %1260 = vmatmul.mubr.bf16.vlgmr.msra.gmra.mxu0 %v993_v28  ;;  %2564 = vmatpush3.bf16.msra.mxu1 %v2780_v16  ;;  %v1293_v42 = vadd.f32 %v1292_v40, %v1288_v39  ;;  %v2806_v16 = vld [vmem:[#allocation10 + $0x80] ss:$16 sps:$4 sm:$0xff]   ;;  %v2814_v28 = vld [vmem:[#allocation10 + $0x64] ss:$16 sps:$4 sm:$0xff]   ;;  %v2821_v34 = vld [vmem:[#allocation10 + $0x48] ss:$16 sps:$4 sm:$0xff]  }
 0x492   : > { %2565 = vmatprep.subr.bf16.mxu1 %v3140_v3  ;;  %2579 = vmatprep.mubr.msk.bf16.mxu1 %vm3141_vm0, %v3140_v3  ;;  %v2824_v39 = vld [vmem:[#allocation10 + $0x20] ss:$16 sps:$4 sm:$0xff]   ;;  %v2827_v40 = vld [vmem:[#allocation10 + $0x28] ss:$16 sps:$4 sm:$0xff]  }
 0x493   : > { %1687 = vmatprep.mubr.bf16.mxu0 %v3142_v9  ;;  %v1310_v51 = vpack.c.bf16 %v1293_v42, %v1293_v42  ;;  %1656 = vmatpush1.bf16.msra.mxu0 %v2788_v60  ;;  %v2835_v42 = vld [vmem:[#allocation10 + $0xc] ss:$16 sps:$4 sm:$0xff]   ;;  %v2841_v60 = vld [vmem:[#allocation11 + $0xf0] sm:$0xff]  }
 0x494   : > { %1657 = vmatprep.subr.bf16.mxu0 %v2796_v0  ;;  %v2846_v0 = vld [vmem:[#allocation11 + $0x28] sm:$0xff]  }
 0x495   : > { %2566 = vmatpush3.bf16.msra.mxu1 %v2781_v29  ;;  %v2817_v29 = vld [vmem:[#allocation10 + $0x6c] ss:$16 sps:$4 sm:$0xff]  }
 0x496   : > { %2567 = vmatprep.subr.bf16.mxu1 %v3140_v3 }
 0x499   : > { %2568 = vmatpush3.bf16.msra.mxu1 %v2782_v18  ;;  %v2812_v18 = vld [vmem:[#allocation10 + $0x60] ss:$16 sps:$4 sm:$0xff]  }
 0x49a   : > { %2569 = vmatprep.subr.bf16.mxu1 %v3140_v3 }
 0x49d   : > { %2570 = vmatpush3.bf16.msra.mxu1 %v2783_v25  ;;  %v2815_v25 = vld [vmem:[#allocation10 + $0x68] ss:$16 sps:$4 sm:$0xff]  }
 0x49e   : > { %2571 = vmatprep.subr.bf16.mxu1 %v3140_v3 }
 0x4a1   : > { %2572 = vmatpush3.bf16.msra.mxu1 %v2784_v31  ;;  %v2820_v31 = vld [vmem:[#allocation10 + $0x44] ss:$16 sps:$4 sm:$0xff]  }
 0x4a2   : > { %2573 = vmatprep.subr.bf16.mxu1 %v3140_v3 }
 0x4a5   : > { %2574 = vmatpush3.bf16.msra.mxu1 %v2785_v33  ;;  %v2818_v33 = vld [vmem:[#allocation10 + $0x40] ss:$16 sps:$4 sm:$0xff]  }
 0x4a6   : > { %2575 = vmatprep.subr.bf16.mxu1 %v3140_v3 }
 0x4a9   : > { %2576 = vmatpush3.bf16.msra.mxu1 %v2786_v38  ;;  %v2829_v38 = vld [vmem:[#allocation10 + $0x2c] ss:$16 sps:$4 sm:$0xff]  }
 0x4aa   : > { %2577 = vmatprep.subr.bf16.mxu1 %v3140_v3  ;;  %v1403_v3 = vrot.slane %v3387_v30, %v3381_v22  ;;  %v2794_v30 = vld [vmem:[#allocation10 + $0xc0] ss:$16 sps:$4 sm:$0xff]  }
 0x4ab   : > { %1658 = vmatpush1.bf16.msra.mxu0 %v2794_v30  ;;  %v2848_v30 = vld [vmem:[#allocation11 + $0x60] sm:$0xff]  }
 0x4ac   : > { %1659 = vmatprep.subr.bf16.mxu0 %v2802_v12  ;;  %v2854_v12 = vld [vmem:[#allocation11 + $0x18] sm:$0xff]  }
 0x4ad   : > { %2578 = vmatpush3.bf16.msra.mxu1 %v2787_v41  ;;  %v2832_v41 = vld [vmem:[#allocation10 + $0x4] ss:$16 sps:$4 sm:$0xff]  }
 0x4ae   : > { %1696 = vmatprep.subr.bf16.mxu1 %v2793_v63  ;;  %v2845_v63 = vld [vmem:[#allocation11 + $0xe8] sm:$0xff]  }
 0x4af   : > { %1660 = vmatpush1.bf16.msra.mxu0 %v2800_v14  ;;  %v2856_v14 = vld [vmem:[#allocation11 + $0x50] sm:$0xff]  }
 0x4b0   : > { %2580 = vmatmul.mubr.bf16.vlgmr.msra.gmra.mxu1 %v1310_v51  ;;  %1661 = vmatprep.subr.bf16.mxu0 %v2808_v17  ;;  %v2830_v51 = vld [vmem:[#allocation10] ss:$16 sps:$4 sm:$0xff]  }
 0x4b1   : > { %1728 = vmatprep.mubr.bf16.mxu1 %v3142_v9  ;;  %1697 = vmatpush1.bf16.msra.mxu1 %v2791_v62  ;;  %v2843_v62 = vld [vmem:[#allocation11 + $0xb0] sm:$0xff]  }
 0x4b2   : > { %1698 = vmatprep.subr.bf16.mxu1 %v2799_v1  ;;  %v2847_v1 = vld [vmem:[#allocation11 + $0xa8] sm:$0xff]   ;;  %v2859_v17 = vld [vmem:[#allocation11 + $0x90] sm:$0xff]  }
 0x4b3   : > { %1662 = vmatpush1.bf16.msra.mxu0 %v2806_v16  ;;  %v2858_v16 = vld [vmem:[#allocation11 + $0x10] sm:$0xff]  }
 0x4b4   : > { %1663 = vmatprep.subr.bf16.mxu0 %v2814_v28  ;;  %v2862_v28 = vld [vmem:[#allocation11 + $0x8] sm:$0xff]  }
 0x4b5   : > { %1699 = vmatpush1.bf16.msra.mxu1 %v2797_v2  ;;  %v2849_v2 = vld [vmem:[#allocation11 + $0xe0] sm:$0xff]  }
 0x4b6   : > { %1700 = vmatprep.subr.bf16.mxu1 %v2805_v13  ;;  %v2855_v13 = vld [vmem:[#allocation11 + $0x98] sm:$0xff]  }
 0x4b7   : > { %1664 = vmatpush1.bf16.msra.mxu0 %v2812_v18  ;;  %v2864_v18 = vld [vmem:[#allocation11 + $0x40] sm:$0xff]  }
 0x4b8   : > { %1665 = vmatprep.subr.bf16.mxu0 %v2820_v31  ;;  %v2866_v31 = vld [vmem:[#allocation11] sm:$0xff]  }
 0x4b9   : > { %1701 = vmatpush1.bf16.msra.mxu1 %v2803_v15  ;;  %v2857_v15 = vld [vmem:[#allocation11 + $0xd0] sm:$0xff]  }
 0x4ba   : > { %1702 = vmatprep.subr.bf16.mxu1 %v2811_v27  ;;  %v2861_v27 = vld [vmem:[#allocation11 + $0xc8] sm:$0xff]  }
 0x4bb   : > { %1666 = vmatpush1.bf16.msra.mxu0 %v2818_v33  ;;  %v1462_v33 = vrot.slane %v3420_v4, %v3381_v22 }
 0x4bc   : > { %1667 = vmatprep.subr.bf16.mxu0 %v2826_v36  ;;  %v1466_v36 = vrot.slane %v3420_v4, %v3409_v24 }
 0x4bd   : > { %1703 = vmatpush1.bf16.msra.mxu1 %v2809_v26  ;;  %v2860_v26 = vld [vmem:[#allocation11 + $0x48] sm:$0xff]  }
 0x4be   : > { %1704 = vmatprep.subr.bf16.mxu1 %v2817_v29  ;;  %v2863_v29 = vld [vmem:[#allocation11 + $0x88] sm:$0xff]  }
 0x4bf   : > { %1668 = vmatpush1.bf16.msra.mxu0 %v2824_v39  ;;  %v1482_v39 = vrot.slane %v1462_v33, %v3381_v22 }
 0x4c0   : > { %1669 = vmatprep.subr.bf16.mxu0 %v2832_v41  ;;  %v1486_v41 = vrot.slane %v1466_v36, %v3381_v22 }
 0x4c1   : > { %1705 = vmatpush1.bf16.msra.mxu1 %v2815_v25  ;;  %v2865_v25 = vld [vmem:[#allocation11 + $0xc0] sm:$0xff]  }
 0x4c2   : > { %1706 = vmatprep.subr.bf16.mxu1 %v2823_v32  ;;  %v2867_v32 = vld [vmem:[#allocation11 + $0x80] sm:$0xff]  }
 0x4c3   : > { %1670 = vmatpush1.bf16.msra.mxu0 %v2830_v51 }
 0x4c5   : > { %1707 = vmatpush1.bf16.msra.mxu1 %v2821_v34  ;;  %v1470_v34 = vrot.slane %v3420_v4, %v3452_v37 }
 0x4c6   : > { %1708 = vmatprep.subr.bf16.mxu1 %v2829_v38 }
 0x4c9   : > { %1709 = vmatpush1.bf16.msra.mxu1 %v2827_v40  ;;  %v1490_v40 = vrot.slane %v1470_v34, %v3381_v22 }
 0x4ca   : > { %1710 = vmatprep.subr.bf16.mxu1 %v2835_v42 }
 0x550   : > { %v2462_v20 = vpop.f32.mrf.mxu1 }
 0x551   : > { %v2484_v43 = vpop.f32.mrf.mxu0 }
 0x552   : > { %v2463_v44 = vpop.f32.mrf.mxu1 }
 0x553   : > { %v2464_v45 = vadd.f32 %v2463_v44, %v2462_v20  ;;  %v2485_v46 = vpop.f32.mrf.mxu0  ;;  %v2833_v20 = vld [vmem:[#allocation10 + $0x8] ss:$16 sps:$4 sm:$0xff]  }
 0x554   : > { %v2486_v47 = vadd.f32 %v2485_v46, %v2484_v43  ;;  %v2465_v48 = vpop.f32.mrf.mxu1  ;;  %1711 = vmatpush1.bf16.msra.mxu1 %v2833_v20  ;;  %v1423_v46 = vsub.s32 7, %v3373_v19 }
 0x555   : > { %v2487_v49 = vpop.f32.mrf.mxu0 }
 0x556   : > { %v3459_v50 = vadd.f32 %v2486_v47, %v2464_v45  ;;  %v2466_v52 = vpop.f32.mrf.mxu1  ;;  %v1419_v47 = vrot.slane %v3378_v21, %v3426_v6  ;;  %v1474_v38 = vrot.slane %v3420_v4, %v1423_v46 }
 0x557   : > { %v2488_v53 = vpop.f32.mrf.mxu0  ;;  %v1424_v52 = vrot.slane %v3378_v21, %v1423_v46  ;;  %v2844_v21 = vld [vmem:[#allocation11 + $0x68] sm:$0xff]  }
 0x558   : > { %v1494_v42 = vrot.slane %v1474_v38, %v3381_v22 }
 0x570   : > { %v1393_v54 = vpop.f32.mrf.mxu1 }
 0x571   : > { %v1399_v56 = vadd.f32 %v2892_v55, %v1393_v54  ;;  %v2836_v55 = vld [vmem:[#allocation11 + $0x78] sm:$0xff]  }
 0x572   : > { %v2581_v57 = vpop.f32.mrf.mxu1  ;;  %2499 = vmatprep.subr.bf16.mxu0 %v2836_v55 }
 0x573   : > { %v3464_v9 = vadd.f32 %v1403_v3, %v1399_v56  ;;  %v2837_v56 = vld [vmem:[#allocation11 + $0xf8] sm:$0xff]  }
 0x574   : > { %v1396_v58 = vpop.f32.mrf.mxu1  ;;  %v2838_v57 = vld [vmem:[#allocation11 + $0x38] sm:$0xff]   ;;  %2521 = vmatprep.subr.bf16.mxu1 %v2837_v56 }
 0x575   : > { %1405 = vadd.xlane.f32.xlu0 %v3464_v9  ;;  %v2839_v58 = vld [vmem:[#allocation11 + $0xb8] sm:$0xff]  }
 0x576   : > { %v2582_v59 = vpop.f32.mrf.mxu1 }
 0x577   : > { %v2840_v59 = vld [vmem:[#allocation11 + $0x70] sm:$0xff]  }
 0x5fe   : > { %v1406_v7 = vpop.xlane.xlu0 %1405 }
 0x5ff   : > { %v1407_v8 = vmul.f32 0.0078125, %v1406_v7  ;;  %v2850_v7 = vld [vmem:[#allocation11 + $0x20] sm:$0xff]  }
 0x601   : > { %v1408_v10 = vsub.f32 %v3464_v9, %v1407_v8  ;;  %v2851_v8 = vld [vmem:[#allocation11 + $0xa0] sm:$0xff]  }
 0x603   : > { %v1409_v11 = vmul.f32 %v1408_v10, %v1408_v10 }
 0x605   : > { %1410 = vadd.xlane.f32.xlu1 %v1409_v11  ;;  %v2853_v11 = vld [vmem:[#allocation11 + $0xd8] sm:$0xff]  }
 0x68e   : > { %v1411_v43 = vpop.xlane.xlu1 %1410 }
 0x68f   : > { %v1412_v44 = vmul.f32 0.0078125, %v1411_v43 }
 0x691   : > { %v1413_v45 = vadd.f32 1e-05, %v1412_v44 }
 0x693   : > { %2882 = vrsqrt.f32 %v1413_v45 }
 0x6a0   : > { %v2883_v48 = vpop.eup %2882 }
 0x6a1   : > { %v1415_v49 = vmul.f32 %v2883_v48, %v1408_v10  ;;  %v2852_v10 = vld [vmem:[#allocation11 + $0x58] sm:$0xff]  }
 0x6a3   : > { %v1420_v53 = vmul.f32 %v1419_v47, %v1415_v49 }
 0x6a5   : > { %v1425_v3 = vadd.f32 %v1424_v52, %v1420_v53 }
 0x6a7   : > { %v1458_v54 = vpack.c.bf16 %v1425_v3, %v1425_v3 }
 0x6a9   : > { %1688 = vmatmul.mubr.bf16.vlgmr.msra.gmra.mxu0 %v1458_v54  ;;  %1729 = vmatmul.mubr.bf16.vlgmr.msra.gmra.mxu1 %v1458_v54 }
 0x6aa   : > { %2500 = vmatpush3.bf16.msra.mxu0 %v2838_v57  ;;  %2522 = vmatpush3.bf16.msra.mxu1 %v2839_v58 }
 0x6ab   : > { %2501 = vmatprep.subr.bf16.mxu0 %v2840_v59  ;;  %2523 = vmatprep.subr.bf16.mxu1 %v2841_v60 }
 0x6ae   : > { %2502 = vmatpush3.bf16.msra.mxu0 %v2842_v61  ;;  %2524 = vmatpush3.bf16.msra.mxu1 %v2843_v62 }
 0x6af   : > { %2503 = vmatprep.subr.bf16.mxu0 %v2844_v21  ;;  %2525 = vmatprep.subr.bf16.mxu1 %v2845_v63 }
 0x6b2   : > { %2504 = vmatpush3.bf16.msra.mxu0 %v2846_v0  ;;  %2526 = vmatpush3.bf16.msra.mxu1 %v2847_v1 }
 0x6b3   : > { %2505 = vmatprep.subr.bf16.mxu0 %v2848_v30  ;;  %2527 = vmatprep.subr.bf16.mxu1 %v2849_v2 }
 0x6b6   : > { %2506 = vmatpush3.bf16.msra.mxu0 %v2850_v7  ;;  %2528 = vmatpush3.bf16.msra.mxu1 %v2851_v8 }
 0x6b7   : > { %2507 = vmatprep.subr.bf16.mxu0 %v2852_v10  ;;  %2529 = vmatprep.subr.bf16.mxu1 %v2853_v11 }
 0x6ba   : > { %2508 = vmatpush3.bf16.msra.mxu0 %v2854_v12  ;;  %2530 = vmatpush3.bf16.msra.mxu1 %v2855_v13 }
 0x6bb   : > { %2509 = vmatprep.subr.bf16.mxu0 %v2856_v14  ;;  %2531 = vmatprep.subr.bf16.mxu1 %v2857_v15 }
 0x6be   : > { %2510 = vmatpush3.bf16.msra.mxu0 %v2858_v16  ;;  %2532 = vmatpush3.bf16.msra.mxu1 %v2859_v17 }
 0x6bf   : > { %2511 = vmatprep.subr.bf16.mxu0 %v2860_v26  ;;  %2533 = vmatprep.subr.bf16.mxu1 %v2861_v27 }
 0x6c2   : > { %2512 = vmatpush3.bf16.msra.mxu0 %v2862_v28  ;;  %2534 = vmatpush3.bf16.msra.mxu1 %v2863_v29 }
 0x6c3   : > { %2513 = vmatprep.subr.bf16.mxu0 %v2864_v18  ;;  %2535 = vmatprep.subr.bf16.mxu1 %v2865_v25 }
 0x6c6   : > { %2514 = vmatpush3.bf16.msra.mxu0 %v2866_v31  ;;  %2536 = vmatpush3.bf16.msra.mxu1 %v2867_v32 }
 0x769   : > { %v1689_v51 = vpop.f32.mrf.mxu0  ;;  %v1730_v20 = vpop.f32.mrf.mxu1 }
 0x76a   : > { %v1690_v43 = vadd.f32 %v1689_v51, %v1482_v39  ;;  %v1731_v44 = vadd.f32 %v1730_v20, %v1490_v40  ;;  %v1267_v20 = vadd.f32 %v3459_v50, %v3391_v35 }
 0x76b   : > { %v1691_v45 = vpop.f32.mrf.mxu0  ;;  %v1732_v47 = vpop.f32.mrf.mxu1 }
 0x76c   : > { %v1737_v48 = vmul.f32 %v1690_v43, %v1690_v43  ;;  %v1739_v49 = vmul.f32 %v1731_v44, %v1731_v44  ;;  %v1692_v52 = vadd.f32 %v1691_v45, %v1486_v41  ;;  %v1733_v19 = vadd.f32 %v1732_v47, %v1494_v42 }
 0x76d   : > { %v1693_v53 = vpop.f32.mrf.mxu0  ;;  %v1734_v4 = vpop.f32.mrf.mxu1 }
 0x76e   : > { %v1741_v46 = vmul.f32 %v1737_v48, %v1690_v43  ;;  %v1743_v3 = vmul.f32 %v1739_v49, %v1731_v44  ;;  %v1738_v54 = vmul.f32 %v1692_v52, %v1692_v52  ;;  %v1740_v55 = vmul.f32 %v1733_v19, %v1733_v19 }
 0x76f   : > { %v1694_v56 = vpop.f32.mrf.mxu0  ;;  %v1735_v57 = vpop.f32.mrf.mxu1 }
 0x770   : > { %v1745_v58 = vmul.f32 0.044715, %v1741_v46  ;;  %v1747_v22 = vmul.f32 0.044715, %v1743_v3  ;;  %v1742_v59 = vmul.f32 %v1738_v54, %v1692_v52  ;;  %v1744_v60 = vmul.f32 %v1740_v55, %v1733_v19 }
 0x772   : > { %v1749_v61 = vadd.f32 %v1745_v58, %v1690_v43  ;;  %v1751_v62 = vadd.f32 %v1747_v22, %v1731_v44  ;;  %v1746_v21 = vmul.f32 0.044715, %v1742_v59  ;;  %v1748_v63 = vmul.f32 0.044715, %v1744_v60 }
 0x774   : > { %v1753_v0 = vmul.f32 0.7978846, %v1749_v61  ;;  %v1755_v1 = vmul.f32 0.7978846, %v1751_v62  ;;  %v1750_v30 = vadd.f32 %v1746_v21, %v1692_v52  ;;  %v1752_v2 = vadd.f32 %v1748_v63, %v1733_v19 }
 0x776   : > { %2884 = vtanh.f32 %v1753_v0  ;;  %v1754_v7 = vmul.f32 0.7978846, %v1750_v30  ;;  %v1756_v8 = vmul.f32 0.7978846, %v1752_v2 }
 0x777   : > { %2886 = vtanh.f32 %v1755_v1 }
 0x778   : > { %2888 = vtanh.f32 %v1754_v7 }
 0x779   : > { %2890 = vtanh.f32 %v1756_v8 }
 0x783   : > { %v2885_v10 = vpop.eup %2884 }
 0x784   : > { %v2887_v11 = vpop.eup %2886  ;;  %v1761_v12 = vadd.f32 1.0, %v2885_v10 }
 0x785   : > { %v2889_v13 = vpop.eup %2888  ;;  %v1763_v14 = vadd.f32 1.0, %v2887_v11 }
 0x786   : > { %v2891_v15 = vpop.eup %2890  ;;  %v1762_v16 = vadd.f32 1.0, %v2889_v13  ;;  %v1765_v17 = vmul.f32 0.5, %v1761_v12 }
 0x787   : > { %v1764_v26 = vadd.f32 1.0, %v2891_v15  ;;  %v1767_v27 = vmul.f32 0.5, %v1763_v14 }
 0x788   : > { %v1766_v28 = vmul.f32 0.5, %v1762_v16  ;;  %v1769_v18 = vmul.f32 %v1765_v17, %v1690_v43  ;;  %v2893_v43 = vld [vmem:[#allocation2 + $0x8] sm:$0xff] }
 0x789   : > { %v1768_v29 = vmul.f32 0.5, %v1764_v26  ;;  %v1771_v31 = vmul.f32 %v1767_v27, %v1731_v44  ;;  %v1271_v44 = vrot.slane %v2893_v43, %v3406_v23  ;;  %v2122_v46 = vrot.slane %v2893_v43, %v3423_v5 }
 0x78a   : > { %v1770_v25 = vmul.f32 %v1766_v28, %v1692_v52  ;;  %v1837_v36 = vpack.c.bf16 %v1769_v18, %v1769_v18  ;;  %v2117_v52 = vrot.slane %v2893_v43, %v3409_v24  ;;  %v2127_v35 = vrot.slane %v2893_v43, %v3452_v37 }
 0x78b   : > { %v1772_v32 = vmul.f32 %v1768_v29, %v1733_v19  ;;  %v1839_v38 = vpack.c.bf16 %v1771_v31, %v1771_v31  ;;  %v1272_v4 = vadd.f32 %v1271_v44, %v1267_v20  ;;  %v2133_v55 = vrot.slane %v2893_v43, %v3426_v6 }
 0x78c   : > { %v1838_v33 = vpack.c.bf16 %v1770_v25, %v1770_v25 }
 0x78d   : > { %v1840_v34 = vpack.c.bf16 %v1772_v32, %v1772_v32  ;;  %v2123_v50 = vmul.f32 %v2122_v46, %v1272_v4 }
 0x78e   : > { %2065 = vmatprep.mubr.bf16.mxu0 %v1838_v33 }
 0x78f   : > { %2105 = vmatprep.mubr.bf16.mxu1 %v1840_v34  ;;  %2066 = vmatmul.mubr.bf16.vlgmr.msra.gmra.mxu0 %v1837_v36 }
 0x790   : > { %2106 = vmatmul.mubr.bf16.vlgmr.msra.gmra.mxu1 %v1839_v38 }
 0x84f   : > { %v2515_v39 = vpop.f32.mrf.mxu0 }
 0x850   : > { %v2537_v40 = vpop.f32.mrf.mxu1 }
 0x851   : > { %v2516_v41 = vpop.f32.mrf.mxu0 }
 0x852   : > { %v2517_v42 = vadd.f32 %v2516_v41, %v2515_v39  ;;  %v2538_v51 = vpop.f32.mrf.mxu1 }
 0x853   : > { %v2539_v45 = vadd.f32 %v2538_v51, %v2537_v40  ;;  %v2518_v47 = vpop.f32.mrf.mxu0 }
 0x854   : > { %v2540_v48 = vpop.f32.mrf.mxu1 }
 0x855   : > { %v2108_v49 = vadd.f32 %v2539_v45, %v2517_v42  ;;  %v2519_v19 = vpop.f32.mrf.mxu0 }
 0x856   : > { %v2541_v53 = vpop.f32.mrf.mxu1 }
 0x857   : > { %v2113_v3 = vadd.f32 %v2108_v49, %v3464_v9 }
 0x859   : > { %v2118_v23 = vadd.f32 %v2117_v52, %v2113_v3 }
 0x85b   : > { %v2128_v54 = vmul.f32 %v2127_v35, %v2118_v23 }
 0x85d   : > { %v2129_v24 = vadd.f32 %v2128_v54, %v2123_v50 }
 0x85f   : > { %v2134_v56 = vadd.f32 %v2133_v55, %v2129_v24 }
 0x861   : > { %2135 = vst [vmem:[%s413_s22] sm:$0xff] %v2134_v56 }
 0x862   : > { %3063 = shalt.err (!%p3060_p5)
}
 0x863   : > { %s3064_s14 = scalar_lea.hbm %s2148_s29, 128  ;;  %s3068_s1 = scalar_lea.hbm %s3538_s9, 256 }
 0x864   : > { %p3065_p6 = scmp.ne.s32.totalorder %s2148_s29, %s3064_s14  ;;  %p3069_p8 = scmp.lt.s32.totalorder %s2148_s29, %s3538_s9 }
 0x865   : > { %p3070_p9 = scmp.lt.s32.totalorder %s3068_s1, %s3064_s14 }
 0x866   : > { %p3066_p10 = pnand %p3065_p6, %p3563_p3 }
 0x867   : > { %p3071_p11 = por %p3070_p9, %p3069_p8 }
 0x868   : > { %p3067_p12 = pneg %p3066_p10 }
 0x86a   : > { %p3072_p0 = pnand %p3071_p11, %p3067_p12 }
 0x86c   : > { %3075 = shalt.err (!%p3072_p0)
}
 0x86d   : > { %2607 = dma.vmem_to_hbm [thread:$0]  (%p3563_p3), %s2151_s18, 128, %s2148_s29, %s2137_s17  }
 0x86e PF: > { %p2644_p1 = scmp.ge.s32.totalorder %s3126_s12, 2  ;;  %s2162_s21 = sand.u32 1, %s3114_s30  }
 0x86f   : > { %p3564_p2 = scmp.ne.s32.totalorder %s3547_s20, 0  ;;  %s2163_s24 = scalar_lea.sflag [#allocation4], %s2162_s21 }
 0x871   : > { %p2629_p4 = pnand %p2644_p1, %p3564_p2 }
 0x873   : > { %p2630_p13 = pneg %p2629_p4 }
 0x875   : > { %3109 = dma.done.wait (%p2630_p13), %s2163_s24, 128  }
 0x876   : > { %3111 = vsyncadd (%p2630_p13), %s2163_s24, 4294967168  ;;  %s3565_s25 = sld [smem:[#allocation19_spill]]  ;;  %p23_p7 = scmp.ge.s32.totalorder %s3219_s15, 4  }
 0x877   : > { %s3566_s30 = smov %s3118_s10  ;;  %s3567_s10 = smov %s3122_s11 }
 0x878   : > { %s3569_s12 = smov %s3219_s15  ;;  %25 = sbr.rel (!%p23_p7) target bundleno = 9 (0x9), region = 116 }
 0x87c   : > { %s3568_s11 = smov %s3565_s25 }
 0x87d   :  { %2168 = vsyncpa [#allocation3], 1 }
 0x87e   :  { %2170 = vsyncpa [#allocation3 + $0x1], 1 }
 0x87f   :  { %2171 = vsyncpa [#allocation6], 1 }
 0x880   :  { %2172 = vsyncpa [#allocation9], 1 }
 0x881   :  { %2173 = vsyncpa [#allocation12], 1 }
 0x882   :  { %2174 = vsyncpa [#allocation4], 1 }
 0x883   :  { %2176 = vsyncpa [#allocation4 + $0x1], 1 }

</bundles_post_ra>
